<compile_context>
chip_gen: v7x
topology: tpu7x:2x2x1
jax: 0.10.0
libtpu: 0.0.40
codegen_flags: <defaults>
</compile_context>

<pallas_src>
import jax
import jax.numpy as jnp
import numpy as np
from jax import lax
from jax.experimental import pallas as pl
from jax.experimental.pallas import tpu as pltpu

PAD_IDX = 5144

# bf16 MXU operands on all generations (v5e/v6e/v7x are bf16-native); accumulation
# stays f32 via preferred_element_type and the h/c carries stay f32.
MATMUL_DTYPE = jnp.bfloat16

_NEG_BIAS = jnp.float32(-1e9)  # bias for padded tag columns (exp underflows to 0)


def _round_up(x, m):
    return (x + m - 1) // m * m


def _pad_gate_weight(w, H, Hp):
    """(4H, K) PyTorch gate-stacked weight -> (4Hp, K), each gate block zero-padded."""
    K = w.shape[1]
    w4 = w.reshape(4, H, K)
    w4 = jnp.pad(w4, ((0, 0), (0, Hp - H), (0, 0)))
    return w4.reshape(4 * Hp, K)


def _pad_gate_bias(b, H, Hp):
    """(4H,) -> (4Hp,), each gate block zero-padded (keeps padded hidden units at 0)."""
    return jnp.pad(b.reshape(4, H), ((0, 0), (0, Hp - H))).reshape(4 * Hp)


def _make_kernel(chunk, Bb, Hp, unroll):
    """Kernel closure over static sizes.

    chunk : timesteps handled per grid step
    Bb    : batch-block rows (multiple of the f32 sublane, 8)
    Hp    : padded hidden width (multiple of 128)
    """
    G = 4 * Hp

    def kernel(x_ref, wih0_ref, whh0_ref, b0_ref, wih1_ref, whh1_ref, b1_ref,
               wout_ref, bout_ref, out_ref,
               h0_ref, c0_ref, h1_ref, c1_ref, xg0_ref, h1s_ref):
        # x_ref:    (chunk*Bb, Ep)  bf16 time-major embeddings, rows = t_local*Bb + b
        # w*_ref:   bf16 weights (full-array resident); b*_ref: f32 biases
        # out_ref:  (chunk*Bb, Tp)  f32 time-major log-softmax (lane-dense)
        # h0/c0/h1/c1: (Bb, Hp) f32 persistent state, carried across seq chunks
        # xg0_ref:  (chunk*Bb, 4Hp) f32 scratch: x @ Wih0 + b0 for this chunk
        # h1s_ref:  (chunk*Bb, Hp)  f32 scratch: layer-1 hidden states of this chunk
        sc = pl.program_id(1)

        @pl.when(sc == 0)
        def _():
            # Fresh recurrence for every batch block.  Zero initial c also keeps
            # the padded hidden lanes exactly zero (padded-gate pre = 0 -> f = 0.5).
            h0_ref[...] = jnp.zeros_like(h0_ref)
            c0_ref[...] = jnp.zeros_like(c0_ref)
            h1_ref[...] = jnp.zeros_like(h1_ref)
            c1_ref[...] = jnp.zeros_like(c1_ref)

        # ---- hoisted layer-0 input GEMM: whole chunk at once ----
        xg0_ref[...] = (
            jnp.dot(x_ref[...], wih0_ref[...], preferred_element_type=jnp.float32)
            + b0_ref[...])

        # Hoisted bias broadcast (JAX does not CSE broadcast_in_dim per step).
        b1b = jnp.broadcast_to(b1_ref[...], (Bb, G))

        def cell(pre, c_prev):
            # PyTorch gate order i, f, g, o; each slice is a lane-aligned Hp block.
            i = jax.nn.sigmoid(pre[:, 0 * Hp:1 * Hp])
            f = jax.nn.sigmoid(pre[:, 1 * Hp:2 * Hp])
            g = jnp.tanh(pre[:, 2 * Hp:3 * Hp])
            o = jax.nn.sigmoid(pre[:, 3 * Hp:4 * Hp])
            c = f * c_prev + i * g
            h = o * jnp.tanh(c)
            return h, c

        def step(t, carry):
            h0, c0, h1, c1 = carry
            row = pl.multiple_of(t * Bb, Bb)

            # Layer-1 recurrent dot first: depends only on the previous h1, so its
            # MXU push overlaps layer-0's EUP (sigmoid/tanh) work below.
            rec1 = jnp.dot(h1.astype(whh1_ref.dtype), whh1_ref[...],
                           preferred_element_type=jnp.float32)

            # Layer 0: only the recurrent dot remains inside the loop.
            pre0 = xg0_ref[pl.ds(row, Bb), :] + jnp.dot(
                h0.astype(whh0_ref.dtype), whh0_ref[...],
                preferred_element_type=jnp.float32)
            h0n, c0n = cell(pre0, c0)

            # Layer 1: input dot on the fresh h0' plus the pre-issued recurrent part.
            pre1 = rec1 + jnp.dot(h0n.astype(wih1_ref.dtype), wih1_ref[...],
                                  preferred_element_type=jnp.float32) + b1b
            h1n, c1n = cell(pre1, c1)

            h1s_ref[pl.ds(row, Bb), :] = h1n
            return h0n, c0n, h1n, c1n

        carry0 = (h0_ref[...], c0_ref[...], h1_ref[...], c1_ref[...])
        h0, c0, h1, c1 = lax.fori_loop(0, chunk, step, carry0, unroll=unroll)
        h0_ref[...] = h0
        c0_ref[...] = c0
        h1_ref[...] = h1
        c1_ref[...] = c1

        # ---- batched hidden2tag + log_softmax for the chunk (lane-dense Tp) ----
        logits = jnp.dot(h1s_ref[...].astype(wout_ref.dtype), wout_ref[...],
                         preferred_element_type=jnp.float32) + bout_ref[...]
        m = jnp.max(logits, axis=-1, keepdims=True)
        z = logits - m
        lse = jnp.log(jnp.sum(jnp.exp(z), axis=-1, keepdims=True))
        out_ref[...] = (z - lse).astype(out_ref.dtype)

    return kernel


def lstm_net_forward(sequences, params, *, seq_chunk=64, batch_block=8):
    """Pallas implementation of LSTMNet.forward.  Returns (B, T, S) log-probs."""
    B, S = sequences.shape
    E = params["embedding"].shape[1]
    H = params["whh0"].shape[1]
    T = params["wout"].shape[0]

    # Padded sizes: batch blocks on the f32 sublane (8); E/H/T on the 128-lane width.
    Bb = max(8, _round_up(batch_block, 8))
    Bp = _round_up(max(B, 1), Bb)
    num_bc = Bp // Bb
    Ep = _round_up(E, 128)
    Hp = _round_up(H, 128)
    Tp = _round_up(T, 128)
    G = 4 * Hp

    chunk = min(seq_chunk, S)
    Sp = _round_up(S, chunk)
    num_sc = Sp // chunk
    rows = chunk * Bb
    unroll = 4 if chunk % 4 == 0 else (2 if chunk % 2 == 0 else 1)

    # ---- embedding gather + time-major layout + padding (XLA glue) ----
    emb = jnp.take(params["embedding"], sequences, axis=0)         # (B, S, E)
    x = jnp.transpose(emb, (1, 0, 2)).astype(jnp.float32)          # (S, B, E)
    x = jnp.pad(x, ((0, Sp - S), (0, Bp - B), (0, Ep - E)))        # (Sp, Bp, Ep)
    # -> (num_bc, Sp*Bb, Ep); rows within a batch block ordered t*Bb + b
    x = x.reshape(Sp, num_bc, Bb, Ep).transpose(1, 0, 2, 3)
    x = x.reshape(num_bc, Sp * Bb, Ep).astype(MATMUL_DTYPE)

    # ---- weight preparation (gate-block padding keeps the math exact) ----
    wih0 = jnp.pad(_pad_gate_weight(params["wih0"], H, Hp), ((0, 0), (0, Ep - E)))
    wih0_t = wih0.T.astype(MATMUL_DTYPE)                           # (Ep, 4Hp)
    whh0 = jnp.pad(_pad_gate_weight(params["whh0"], H, Hp), ((0, 0), (0, Hp - H)))
    whh0_t = whh0.T.astype(MATMUL_DTYPE)                           # (Hp, 4Hp)
    b0 = _pad_gate_bias(params["bih0"] + params["bhh0"], H, Hp).reshape(1, G)

    wih1 = jnp.pad(_pad_gate_weight(params["wih1"], H, Hp), ((0, 0), (0, Hp - H)))
    wih1_t = wih1.T.astype(MATMUL_DTYPE)                           # (Hp, 4Hp)
    whh1 = jnp.pad(_pad_gate_weight(params["whh1"], H, Hp), ((0, 0), (0, Hp - H)))
    whh1_t = whh1.T.astype(MATMUL_DTYPE)                           # (Hp, 4Hp)
    b1 = _pad_gate_bias(params["bih1"] + params["bhh1"], H, Hp).reshape(1, G)

    wout = jnp.pad(params["wout"], ((0, Tp - T), (0, Hp - H)))     # (Tp, Hp)
    wout_t = wout.T.astype(MATMUL_DTYPE)                           # (Hp, Tp)
    bout = jnp.concatenate(
        [params["bout"].astype(jnp.float32),
         jnp.full((Tp - T,), _NEG_BIAS, jnp.float32)]).reshape(1, Tp)

    # ---- grid & specs: batch blocks parallel (v7x 2nd TC), seq chunks arbitrary ----
    def _full(shape):
        n = len(shape)
        return pl.BlockSpec(shape, lambda bc, sc, n=n: (0,) * n)

    in_specs = [
        pl.BlockSpec((None, rows, Ep), lambda bc, sc: (bc, sc, 0)),   # x (chunked)
        _full((Ep, G)),   # wih0_t
        _full((Hp, G)),   # whh0_t
        _full((1, G)),    # b0
        _full((Hp, G)),   # wih1_t
        _full((Hp, G)),   # whh1_t
        _full((1, G)),    # b1
        _full((Hp, Tp)),  # wout_t
        _full((1, Tp)),   # bout
    ]
    out_specs = pl.BlockSpec((None, rows, Tp), lambda bc, sc: (bc, sc, 0))
    scratch_shapes = [
        pltpu.VMEM((Bb, Hp), jnp.float32),    # h0 (persistent across seq chunks)
        pltpu.VMEM((Bb, Hp), jnp.float32),    # c0
        pltpu.VMEM((Bb, Hp), jnp.float32),    # h1
        pltpu.VMEM((Bb, Hp), jnp.float32),    # c1
        pltpu.VMEM((rows, G), jnp.float32),   # xg0: x @ Wih0 + b0 for the chunk
        pltpu.VMEM((rows, Hp), jnp.float32),  # h1s: layer-1 states of the chunk
    ]

    # ---- explicit VMEM budget: buffers (double-buffered) + weights + scratch ----
    isz = jnp.dtype(MATMUL_DTYPE).itemsize
    weight_bytes = isz * (Ep * G + 3 * Hp * G + Hp * Tp) + 4 * (2 * G + Tp)
    buf_bytes = 2 * (rows * Ep * isz + rows * Tp * 4 + weight_bytes)
    scratch_bytes = 4 * (4 * Bb * Hp + rows * G + rows * Hp)
    vmem_limit = int(buf_bytes + scratch_bytes) + (8 << 20)
    vmem_limit = min(max(vmem_limit, 32 << 20), 128 << 20)

    # Advisory cost hint for the surrounding XLA schedule.
    grid_pts = num_bc * num_sc
    flops = grid_pts * (
        2 * rows * Ep * G               # hoisted input GEMM per chunk
        + chunk * 3 * 2 * Bb * Hp * G   # three (Bb,Hp)@(Hp,4Hp) dots per timestep
        + 2 * rows * Hp * Tp)           # hidden2tag per chunk
    transcendentals = grid_pts * (chunk * 10 * Bb * Hp + rows * (Tp + 1))
    bytes_accessed = (num_bc * Sp * Bb * Ep * isz   # x in
                      + weight_bytes                # weights + biases
                      + num_bc * Sp * Bb * Tp * 4)  # log-probs out

    out_flat = pl.pallas_call(
        _make_kernel(chunk, Bb, Hp, unroll),
        out_shape=jax.ShapeDtypeStruct((num_bc, Sp * Bb, Tp), jnp.float32),
        grid=(num_bc, num_sc),
        in_specs=in_specs,
        out_specs=out_specs,
        scratch_shapes=scratch_shapes,
        compiler_params=pltpu.CompilerParams(
            dimension_semantics=("parallel", "arbitrary"),
            vmem_limit_bytes=vmem_limit),
        cost_estimate=pl.CostEstimate(
            flops=flops, transcendentals=transcendentals,
            bytes_accessed=bytes_accessed),
    )(x, wih0_t, whh0_t, b0, wih1_t, whh1_t, b1, wout_t, bout)

    # (num_bc, Sp*Bb, Tp) -> (S, B, T) -> (B, T, S): matches PyTorch tag_scores.
    out = out_flat.reshape(num_bc, Sp, Bb, Tp).transpose(1, 0, 2, 3)
    out = out.reshape(Sp, Bp, Tp)[:S, :B, :T]
    return jnp.transpose(out, (1, 2, 0))


def lstm_net_reference(sequences, params):
    """Pure-JAX f32 reference for correctness checking (matches PyTorch semantics)."""
    emb = jnp.take(params["embedding"], sequences, axis=0)
    x = jnp.transpose(emb, (1, 0, 2)).astype(jnp.float32)  # (S, B, E)
    H = params["whh0"].shape[1]

    def cell(x_t, h, c, wih, whh, bih, bhh):
        pre = x_t @ wih.T + h @ whh.T + bih + bhh
        i = jax.nn.sigmoid(pre[:, 0 * H:1 * H])
        f = jax.nn.sigmoid(pre[:, 1 * H:2 * H])
        g = jnp.tanh(pre[:, 2 * H:3 * H])
        o = jax.nn.sigmoid(pre[:, 3 * H:4 * H])
        c = f * c + i * g
        h = o * jnp.tanh(c)
        return h, c

    B = x.shape[1]
    zero = jnp.zeros((B, H), jnp.float32)

    def scan_fn(carry, x_t):
        h0, c0, h1, c1 = carry
        h0, c0 = cell(x_t, h0, c0, params["wih0"], params["whh0"],
                      params["bih0"], params["bhh0"])
        h1, c1 = cell(h0, h1, c1, params["wih1"], params["whh1"],
                      params["bih1"], params["bhh1"])
        return (h0, c0, h1, c1), h1

    _, hs = lax.scan(scan_fn, (zero, zero, zero, zero), x)    # (S, B, H)
    lstm_out = jnp.transpose(hs, (1, 0, 2))                   # (B, S, H)
    tag_space = lstm_out @ params["wout"].T + params["bout"]  # (B, S, T)
    tag_space = jnp.transpose(tag_space, (0, 2, 1))           # (B, T, S)
    return jax.nn.log_softmax(tag_space, axis=1)


def init_params(key, vocab_size, embedding_dim, hidden_dim, tagset_size):
    H, E, T = hidden_dim, embedding_dim, tagset_size
    k = 1.0 / np.sqrt(H)
    keys = jax.random.split(key, 12)

    emb = jax.random.normal(keys[0], (vocab_size, E), jnp.float32) * 0.1
    emb = emb.at[PAD_IDX].set(0.0)  # padding_idx row is zero

    def u(kk, shape):
        return jax.random.uniform(kk, shape, jnp.float32, minval=-k, maxval=k)

    return {
        "embedding": emb,
        "wih0": u(keys[1], (4 * H, E)),
        "whh0": u(keys[2], (4 * H, H)),
        "bih0": u(keys[3], (4 * H,)),
        "bhh0": u(keys[4], (4 * H,)),
        "wih1": u(keys[5], (4 * H, H)),
        "whh1": u(keys[6], (4 * H, H)),
        "bih1": u(keys[7], (4 * H,)),
        "bhh1": u(keys[8], (4 * H,)),
        "wout": u(keys[9], (T, H)),
        "bout": u(keys[10], (T,)),
    }


if __name__ == "__main__":
    batch, seq_len = 2, 8
    embedding_dim, hidden_dim, tagset_size = 32, 32, 16
    vocab_size = PAD_IDX + 8  # must exceed PAD_IDX=5144

    key = jax.random.PRNGKey(0)
    pkey, skey = jax.random.split(key)
    params = init_params(pkey, vocab_size, embedding_dim, hidden_dim, tagset_size)

    sequences = jax.random.randint(skey, (batch, seq_len), 0, vocab_size, jnp.int32)
    sequences = sequences.at[0, -1].set(PAD_IDX)  # exercise the padding row

    # seq_chunk=4 -> grid=(1, 2): exercises the persistent-state carry across chunks.
    out = lstm_net_forward(sequences, params, seq_chunk=4)
    out = jax.block_until_ready(out)

    ref = jax.block_until_ready(lstm_net_reference(sequences, params))
    assert out.shape == (batch, tagset_size, seq_len), out.shape
    # bf16 MXU operands (f32 accumulation) vs. the f32 reference.
    np.testing.assert_allclose(np.asarray(out), np.asarray(ref), atol=2e-2, rtol=2e-2)

    print("KERNEL_OK")
</pallas_src>

<mosaic_0001>
module attributes {stable_mosaic.version = 11 : i64} {
  func.func @kernel(%arg0: i32, %arg1: i32, %arg2: memref<1x32x128xbf16, #tpu.memory_space<vmem>>, %arg3: memref<128x512xbf16, #tpu.memory_space<vmem>>, %arg4: memref<128x512xbf16, #tpu.memory_space<vmem>>, %arg5: memref<1x512xf32, #tpu.memory_space<vmem>>, %arg6: memref<128x512xbf16, #tpu.memory_space<vmem>>, %arg7: memref<128x512xbf16, #tpu.memory_space<vmem>>, %arg8: memref<1x512xf32, #tpu.memory_space<vmem>>, %arg9: memref<128x128xbf16, #tpu.memory_space<vmem>>, %arg10: memref<1x128xf32, #tpu.memory_space<vmem>>, %arg11: memref<1x32x128xf32, #tpu.memory_space<vmem>>, %arg12: memref<8x128xf32, #tpu.memory_space<vmem>>, %arg13: memref<8x128xf32, #tpu.memory_space<vmem>>, %arg14: memref<8x128xf32, #tpu.memory_space<vmem>>, %arg15: memref<8x128xf32, #tpu.memory_space<vmem>>, %arg16: memref<32x512xf32, #tpu.memory_space<vmem>>, %arg17: memref<32x128xf32, #tpu.memory_space<vmem>>) attributes {dimension_semantics = [#tpu.dimension_semantics<parallel>, #tpu.dimension_semantics<arbitrary>], iteration_bounds = array<i64: 1, 2>, scalar_prefetch = 0 : i64, scratch_operands = 6 : i64, tpu.core_type = #tpu.core_type<tc>, window_params = [{transform_indices = @transform_0, window_bounds = array<i64: 1, 32, 128>}, {pipeline_mode = #tpu.pipeline_mode<synchronous>, transform_indices = @transform_1, window_bounds = array<i64: 128, 512>}, {pipeline_mode = #tpu.pipeline_mode<synchronous>, transform_indices = @transform_2, window_bounds = array<i64: 128, 512>}, {pipeline_mode = #tpu.pipeline_mode<synchronous>, transform_indices = @transform_3, window_bounds = array<i64: 1, 512>}, {pipeline_mode = #tpu.pipeline_mode<synchronous>, transform_indices = @transform_4, window_bounds = array<i64: 128, 512>}, {pipeline_mode = #tpu.pipeline_mode<synchronous>, transform_indices = @transform_5, window_bounds = array<i64: 128, 512>}, {pipeline_mode = #tpu.pipeline_mode<synchronous>, transform_indices = @transform_6, window_bounds = array<i64: 1, 512>}, {pipeline_mode = #tpu.pipeline_mode<synchronous>, transform_indices = @transform_7, window_bounds = array<i64: 128, 128>}, {pipeline_mode = #tpu.pipeline_mode<synchronous>, transform_indices = @transform_8, window_bounds = array<i64: 1, 128>}, {transform_indices = @transform_9, window_bounds = array<i64: 1, 32, 128>}]} {
    %c0_i32 = arith.constant 0 : i32
    %0 = arith.cmpi eq, %arg1, %c0_i32 : i32
    %1 = arith.extui %0 : i1 to i32
    %c0_i32_0 = arith.constant 0 : i32
    %2 = arith.cmpi ne, %1, %c0_i32_0 : i32
    scf.if %2 {
      %cst_111 = arith.constant 0.000000e+00 : f32
      %314 = vector.broadcast %cst_111 : f32 to vector<8x128xf32>
      %c0_112 = arith.constant 0 : index
      %c0_113 = arith.constant 0 : index
      %315 = vector.load %arg12[%c0_112, %c0_113] : memref<8x128xf32, #tpu.memory_space<vmem>>, vector<8x128xf32>
      tpu.vector_store %arg12[%c0_112, %c0_113], %314 {strides = array<i32>} : memref<8x128xf32, #tpu.memory_space<vmem>>, vector<8x128xf32>,
      %cst_114 = arith.constant 0.000000e+00 : f32
      %316 = vector.broadcast %cst_114 : f32 to vector<8x128xf32>
      %c0_115 = arith.constant 0 : index
      %c0_116 = arith.constant 0 : index
      %317 = vector.load %arg13[%c0_115, %c0_116] : memref<8x128xf32, #tpu.memory_space<vmem>>, vector<8x128xf32>
      tpu.vector_store %arg13[%c0_115, %c0_116], %316 {strides = array<i32>} : memref<8x128xf32, #tpu.memory_space<vmem>>, vector<8x128xf32>,
      %cst_117 = arith.constant 0.000000e+00 : f32
      %318 = vector.broadcast %cst_117 : f32 to vector<8x128xf32>
      %c0_118 = arith.constant 0 : index
      %c0_119 = arith.constant 0 : index
      %319 = vector.load %arg14[%c0_118, %c0_119] : memref<8x128xf32, #tpu.memory_space<vmem>>, vector<8x128xf32>
      tpu.vector_store %arg14[%c0_118, %c0_119], %318 {strides = array<i32>} : memref<8x128xf32, #tpu.memory_space<vmem>>, vector<8x128xf32>,
      %cst_120 = arith.constant 0.000000e+00 : f32
      %320 = vector.broadcast %cst_120 : f32 to vector<8x128xf32>
      %c0_121 = arith.constant 0 : index
      %c0_122 = arith.constant 0 : index
      %321 = vector.load %arg15[%c0_121, %c0_122] : memref<8x128xf32, #tpu.memory_space<vmem>>, vector<8x128xf32>
      tpu.vector_store %arg15[%c0_121, %c0_122], %320 {strides = array<i32>} : memref<8x128xf32, #tpu.memory_space<vmem>>, vector<8x128xf32>,
    } else {
    }
    %c0 = arith.constant 0 : index
    %c0_1 = arith.constant 0 : index
    %c0_2 = arith.constant 0 : index
    %3 = vector.load %arg2[%c0, %c0_1, %c0_2] : memref<1x32x128xbf16, #tpu.memory_space<vmem>>, vector<1x32x128xbf16>
    %4 = vector.shape_cast %3 : vector<1x32x128xbf16> to vector<32x128xbf16>
    %c0_3 = arith.constant 0 : index
    %c0_4 = arith.constant 0 : index
    %5 = vector.load %arg3[%c0_3, %c0_4] : memref<128x512xbf16, #tpu.memory_space<vmem>>, vector<128x512xbf16>
    %cst = arith.constant dense<0.000000e+00> : vector<32x512xf32>
    %6 = tpu.matmul %4, %5, %cst {dimension_numbers = #tpu.dot_dimension_numbers<[1], [0], [0], [1], [0, 0, 1, 1], [], []>} : vector<32x128xbf16>, vector<128x512xbf16>, vector<32x512xf32> -> vector<32x512xf32>
    %c0_5 = arith.constant 0 : index
    %c0_6 = arith.constant 0 : index
    %7 = vector.load %arg5[%c0_5, %c0_6] : memref<1x512xf32, #tpu.memory_space<vmem>>, vector<1x512xf32>
    %8 = vector.broadcast %7 : vector<1x512xf32> to vector<32x512xf32>
    %9 = arith.addf %6, %8 : vector<32x512xf32>
    %c0_7 = arith.constant 0 : index
    %c0_8 = arith.constant 0 : index
    %10 = vector.load %arg16[%c0_7, %c0_8] : memref<32x512xf32, #tpu.memory_space<vmem>>, vector<32x512xf32>
    tpu.vector_store %arg16[%c0_7, %c0_8], %9 {strides = array<i32>} : memref<32x512xf32, #tpu.memory_space<vmem>>, vector<32x512xf32>,
    %c0_9 = arith.constant 0 : index
    %c0_10 = arith.constant 0 : index
    %11 = vector.load %arg8[%c0_9, %c0_10] : memref<1x512xf32, #tpu.memory_space<vmem>>, vector<1x512xf32>
    %12 = vector.shape_cast %11 : vector<1x512xf32> to vector<1x512xf32>
    %13 = vector.broadcast %12 : vector<1x512xf32> to vector<8x512xf32>
    %c0_11 = arith.constant 0 : index
    %c0_12 = arith.constant 0 : index
    %14 = vector.load %arg12[%c0_11, %c0_12] : memref<8x128xf32, #tpu.memory_space<vmem>>, vector<8x128xf32>
    %c0_13 = arith.constant 0 : index
    %c0_14 = arith.constant 0 : index
    %15 = vector.load %arg13[%c0_13, %c0_14] : memref<8x128xf32, #tpu.memory_space<vmem>>, vector<8x128xf32>
    %c0_15 = arith.constant 0 : index
    %c0_16 = arith.constant 0 : index
    %16 = vector.load %arg14[%c0_15, %c0_16] : memref<8x128xf32, #tpu.memory_space<vmem>>, vector<8x128xf32>
    %c0_17 = arith.constant 0 : index
    %c0_18 = arith.constant 0 : index
    %17 = vector.load %arg15[%c0_17, %c0_18] : memref<8x128xf32, #tpu.memory_space<vmem>>, vector<8x128xf32>
    %c0_i32_19 = arith.constant 0 : i32
    %c8_i32 = arith.constant 8 : i32
    %18 = arith.muli %c0_i32_19, %c8_i32 : i32
    %19 = tpu.assume_multiple %18, 8 : i32
    %20 = arith.truncf %16 : vector<8x128xf32> to vector<8x128xbf16>
    %c0_20 = arith.constant 0 : index
    %c0_21 = arith.constant 0 : index
    %21 = vector.load %arg7[%c0_20, %c0_21] : memref<128x512xbf16, #tpu.memory_space<vmem>>, vector<128x512xbf16>
    %cst_22 = arith.constant dense<0.000000e+00> : vector<8x512xf32>
    %22 = tpu.matmul %20, %21, %cst_22 {dimension_numbers = #tpu.dot_dimension_numbers<[1], [0], [0], [1], [0, 0, 1, 1], [], []>} : vector<8x128xbf16>, vector<128x512xbf16>, vector<8x512xf32> -> vector<8x512xf32>
    %23 = arith.index_cast %19 : i32 to index
    %c0_23 = arith.constant 0 : index
    %24 = vector.load %arg16[%23, %c0_23] : memref<32x512xf32, #tpu.memory_space<vmem>>, vector<8x512xf32>
    %25 = arith.truncf %14 : vector<8x128xf32> to vector<8x128xbf16>
    %c0_24 = arith.constant 0 : index
    %c0_25 = arith.constant 0 : index
    %26 = vector.load %arg4[%c0_24, %c0_25] : memref<128x512xbf16, #tpu.memory_space<vmem>>, vector<128x512xbf16>
    %cst_26 = arith.constant dense<0.000000e+00> : vector<8x512xf32>
    %27 = tpu.matmul %25, %26, %cst_26 {dimension_numbers = #tpu.dot_dimension_numbers<[1], [0], [0], [1], [0, 0, 1, 1], [], []>} : vector<8x128xbf16>, vector<128x512xbf16>, vector<8x512xf32> -> vector<8x512xf32>
    %28 = arith.addf %24, %27 : vector<8x512xf32>
    %29 = vector.extract_strided_slice %28 {offsets = [0, 0], sizes = [8, 128], strides = [1, 1]} : vector<8x512xf32> to vector<8x128xf32>
    %30 = arith.negf %29 : vector<8x128xf32>
    %31 = math.exp %30 : vector<8x128xf32>
    %cst_27 = arith.constant 1.000000e+00 : f32
    %32 = vector.broadcast %cst_27 : f32 to vector<8x128xf32>
    %33 = arith.addf %32, %31 : vector<8x128xf32>
    %34 = arith.divf %32, %33 : vector<8x128xf32>
    %35 = vector.extract_strided_slice %28 {offsets = [0, 128], sizes = [8, 128], strides = [1, 1]} : vector<8x512xf32> to vector<8x128xf32>
    %36 = arith.negf %35 : vector<8x128xf32>
    %37 = math.exp %36 : vector<8x128xf32>
    %cst_28 = arith.constant 1.000000e+00 : f32
    %38 = vector.broadcast %cst_28 : f32 to vector<8x128xf32>
    %39 = arith.addf %38, %37 : vector<8x128xf32>
    %40 = arith.divf %38, %39 : vector<8x128xf32>
    %41 = vector.extract_strided_slice %28 {offsets = [0, 256], sizes = [8, 128], strides = [1, 1]} : vector<8x512xf32> to vector<8x128xf32>
    %42 = math.tanh %41 : vector<8x128xf32>
    %43 = vector.extract_strided_slice %28 {offsets = [0, 384], sizes = [8, 128], strides = [1, 1]} : vector<8x512xf32> to vector<8x128xf32>
    %44 = arith.negf %43 : vector<8x128xf32>
    %45 = math.exp %44 : vector<8x128xf32>
    %cst_29 = arith.constant 1.000000e+00 : f32
    %46 = vector.broadcast %cst_29 : f32 to vector<8x128xf32>
    %47 = arith.addf %46, %45 : vector<8x128xf32>
    %48 = arith.divf %46, %47 : vector<8x128xf32>
    %49 = arith.mulf %40, %15 : vector<8x128xf32>
    %50 = arith.mulf %34, %42 : vector<8x128xf32>
    %51 = arith.addf %49, %50 : vector<8x128xf32>
    %52 = math.tanh %51 : vector<8x128xf32>
    %53 = arith.mulf %48, %52 : vector<8x128xf32>
    %54 = arith.truncf %53 : vector<8x128xf32> to vector<8x128xbf16>
    %c0_30 = arith.constant 0 : index
    %c0_31 = arith.constant 0 : index
    %55 = vector.load %arg6[%c0_30, %c0_31] : memref<128x512xbf16, #tpu.memory_space<vmem>>, vector<128x512xbf16>
    %cst_32 = arith.constant dense<0.000000e+00> : vector<8x512xf32>
    %56 = tpu.matmul %54, %55, %cst_32 {dimension_numbers = #tpu.dot_dimension_numbers<[1], [0], [0], [1], [0, 0, 1, 1], [], []>} : vector<8x128xbf16>, vector<128x512xbf16>, vector<8x512xf32> -> vector<8x512xf32>
    %57 = arith.addf %22, %56 : vector<8x512xf32>
    %58 = arith.addf %57, %13 : vector<8x512xf32>
    %59 = vector.extract_strided_slice %58 {offsets = [0, 0], sizes = [8, 128], strides = [1, 1]} : vector<8x512xf32> to vector<8x128xf32>
    %60 = arith.negf %59 : vector<8x128xf32>
    %61 = math.exp %60 : vector<8x128xf32>
    %cst_33 = arith.constant 1.000000e+00 : f32
    %62 = vector.broadcast %cst_33 : f32 to vector<8x128xf32>
    %63 = arith.addf %62, %61 : vector<8x128xf32>
    %64 = arith.divf %62, %63 : vector<8x128xf32>
    %65 = vector.extract_strided_slice %58 {offsets = [0, 128], sizes = [8, 128], strides = [1, 1]} : vector<8x512xf32> to vector<8x128xf32>
    %66 = arith.negf %65 : vector<8x128xf32>
    %67 = math.exp %66 : vector<8x128xf32>
    %cst_34 = arith.constant 1.000000e+00 : f32
    %68 = vector.broadcast %cst_34 : f32 to vector<8x128xf32>
    %69 = arith.addf %68, %67 : vector<8x128xf32>
    %70 = arith.divf %68, %69 : vector<8x128xf32>
    %71 = vector.extract_strided_slice %58 {offsets = [0, 256], sizes = [8, 128], strides = [1, 1]} : vector<8x512xf32> to vector<8x128xf32>
    %72 = math.tanh %71 : vector<8x128xf32>
    %73 = vector.extract_strided_slice %58 {offsets = [0, 384], sizes = [8, 128], strides = [1, 1]} : vector<8x512xf32> to vector<8x128xf32>
    %74 = arith.negf %73 : vector<8x128xf32>
    %75 = math.exp %74 : vector<8x128xf32>
    %cst_35 = arith.constant 1.000000e+00 : f32
    %76 = vector.broadcast %cst_35 : f32 to vector<8x128xf32>
    %77 = arith.addf %76, %75 : vector<8x128xf32>
    %78 = arith.divf %76, %77 : vector<8x128xf32>
    %79 = arith.mulf %70, %17 : vector<8x128xf32>
    %80 = arith.mulf %64, %72 : vector<8x128xf32>
    %81 = arith.addf %79, %80 : vector<8x128xf32>
    %82 = math.tanh %81 : vector<8x128xf32>
    %83 = arith.mulf %78, %82 : vector<8x128xf32>
    %84 = arith.index_cast %19 : i32 to index
    %c0_36 = arith.constant 0 : index
    %85 = vector.load %arg17[%84, %c0_36] : memref<32x128xf32, #tpu.memory_space<vmem>>, vector<8x128xf32>
    tpu.vector_store %arg17[%84, %c0_36], %83 {strides = array<i32>} : memref<32x128xf32, #tpu.memory_space<vmem>>, vector<8x128xf32>,
    %c1_i32 = arith.constant 1 : i32
    %c8_i32_37 = arith.constant 8 : i32
    %86 = arith.muli %c1_i32, %c8_i32_37 : i32
    %87 = tpu.assume_multiple %86, 8 : i32
    %88 = arith.truncf %83 : vector<8x128xf32> to vector<8x128xbf16>
    %c0_38 = arith.constant 0 : index
    %c0_39 = arith.constant 0 : index
    %89 = vector.load %arg7[%c0_38, %c0_39] : memref<128x512xbf16, #tpu.memory_space<vmem>>, vector<128x512xbf16>
    %cst_40 = arith.constant dense<0.000000e+00> : vector<8x512xf32>
    %90 = tpu.matmul %88, %89, %cst_40 {dimension_numbers = #tpu.dot_dimension_numbers<[1], [0], [0], [1], [0, 0, 1, 1], [], []>} : vector<8x128xbf16>, vector<128x512xbf16>, vector<8x512xf32> -> vector<8x512xf32>
    %91 = arith.index_cast %87 : i32 to index
    %c0_41 = arith.constant 0 : index
    %92 = vector.load %arg16[%91, %c0_41] : memref<32x512xf32, #tpu.memory_space<vmem>>, vector<8x512xf32>
    %93 = arith.truncf %53 : vector<8x128xf32> to vector<8x128xbf16>
    %c0_42 = arith.constant 0 : index
    %c0_43 = arith.constant 0 : index
    %94 = vector.load %arg4[%c0_42, %c0_43] : memref<128x512xbf16, #tpu.memory_space<vmem>>, vector<128x512xbf16>
    %cst_44 = arith.constant dense<0.000000e+00> : vector<8x512xf32>
    %95 = tpu.matmul %93, %94, %cst_44 {dimension_numbers = #tpu.dot_dimension_numbers<[1], [0], [0], [1], [0, 0, 1, 1], [], []>} : vector<8x128xbf16>, vector<128x512xbf16>, vector<8x512xf32> -> vector<8x512xf32>
    %96 = arith.addf %92, %95 : vector<8x512xf32>
    %97 = vector.extract_strided_slice %96 {offsets = [0, 0], sizes = [8, 128], strides = [1, 1]} : vector<8x512xf32> to vector<8x128xf32>
    %98 = arith.negf %97 : vector<8x128xf32>
    %99 = math.exp %98 : vector<8x128xf32>
    %cst_45 = arith.constant 1.000000e+00 : f32
    %100 = vector.broadcast %cst_45 : f32 to vector<8x128xf32>
    %101 = arith.addf %100, %99 : vector<8x128xf32>
    %102 = arith.divf %100, %101 : vector<8x128xf32>
    %103 = vector.extract_strided_slice %96 {offsets = [0, 128], sizes = [8, 128], strides = [1, 1]} : vector<8x512xf32> to vector<8x128xf32>
    %104 = arith.negf %103 : vector<8x128xf32>
    %105 = math.exp %104 : vector<8x128xf32>
    %cst_46 = arith.constant 1.000000e+00 : f32
    %106 = vector.broadcast %cst_46 : f32 to vector<8x128xf32>
    %107 = arith.addf %106, %105 : vector<8x128xf32>
    %108 = arith.divf %106, %107 : vector<8x128xf32>
    %109 = vector.extract_strided_slice %96 {offsets = [0, 256], sizes = [8, 128], strides = [1, 1]} : vector<8x512xf32> to vector<8x128xf32>
    %110 = math.tanh %109 : vector<8x128xf32>
    %111 = vector.extract_strided_slice %96 {offsets = [0, 384], sizes = [8, 128], strides = [1, 1]} : vector<8x512xf32> to vector<8x128xf32>
    %112 = arith.negf %111 : vector<8x128xf32>
    %113 = math.exp %112 : vector<8x128xf32>
    %cst_47 = arith.constant 1.000000e+00 : f32
    %114 = vector.broadcast %cst_47 : f32 to vector<8x128xf32>
    %115 = arith.addf %114, %113 : vector<8x128xf32>
    %116 = arith.divf %114, %115 : vector<8x128xf32>
    %117 = arith.mulf %108, %51 : vector<8x128xf32>
    %118 = arith.mulf %102, %110 : vector<8x128xf32>
    %119 = arith.addf %117, %118 : vector<8x128xf32>
    %120 = math.tanh %119 : vector<8x128xf32>
    %121 = arith.mulf %116, %120 : vector<8x128xf32>
    %122 = arith.truncf %121 : vector<8x128xf32> to vector<8x128xbf16>
    %c0_48 = arith.constant 0 : index
    %c0_49 = arith.constant 0 : index
    %123 = vector.load %arg6[%c0_48, %c0_49] : memref<128x512xbf16, #tpu.memory_space<vmem>>, vector<128x512xbf16>
    %cst_50 = arith.constant dense<0.000000e+00> : vector<8x512xf32>
    %124 = tpu.matmul %122, %123, %cst_50 {dimension_numbers = #tpu.dot_dimension_numbers<[1], [0], [0], [1], [0, 0, 1, 1], [], []>} : vector<8x128xbf16>, vector<128x512xbf16>, vector<8x512xf32> -> vector<8x512xf32>
    %125 = arith.addf %90, %124 : vector<8x512xf32>
    %126 = arith.addf %125, %13 : vector<8x512xf32>
    %127 = vector.extract_strided_slice %126 {offsets = [0, 0], sizes = [8, 128], strides = [1, 1]} : vector<8x512xf32> to vector<8x128xf32>
    %128 = arith.negf %127 : vector<8x128xf32>
    %129 = math.exp %128 : vector<8x128xf32>
    %cst_51 = arith.constant 1.000000e+00 : f32
    %130 = vector.broadcast %cst_51 : f32 to vector<8x128xf32>
    %131 = arith.addf %130, %129 : vector<8x128xf32>
    %132 = arith.divf %130, %131 : vector<8x128xf32>
    %133 = vector.extract_strided_slice %126 {offsets = [0, 128], sizes = [8, 128], strides = [1, 1]} : vector<8x512xf32> to vector<8x128xf32>
    %134 = arith.negf %133 : vector<8x128xf32>
    %135 = math.exp %134 : vector<8x128xf32>
    %cst_52 = arith.constant 1.000000e+00 : f32
    %136 = vector.broadcast %cst_52 : f32 to vector<8x128xf32>
    %137 = arith.addf %136, %135 : vector<8x128xf32>
    %138 = arith.divf %136, %137 : vector<8x128xf32>
    %139 = vector.extract_strided_slice %126 {offsets = [0, 256], sizes = [8, 128], strides = [1, 1]} : vector<8x512xf32> to vector<8x128xf32>
    %140 = math.tanh %139 : vector<8x128xf32>
    %141 = vector.extract_strided_slice %126 {offsets = [0, 384], sizes = [8, 128], strides = [1, 1]} : vector<8x512xf32> to vector<8x128xf32>
    %142 = arith.negf %141 : vector<8x128xf32>
    %143 = math.exp %142 : vector<8x128xf32>
    %cst_53 = arith.constant 1.000000e+00 : f32
    %144 = vector.broadcast %cst_53 : f32 to vector<8x128xf32>
    %145 = arith.addf %144, %143 : vector<8x128xf32>
    %146 = arith.divf %144, %145 : vector<8x128xf32>
    %147 = arith.mulf %138, %81 : vector<8x128xf32>
    %148 = arith.mulf %132, %140 : vector<8x128xf32>
    %149 = arith.addf %147, %148 : vector<8x128xf32>
    %150 = math.tanh %149 : vector<8x128xf32>
    %151 = arith.mulf %146, %150 : vector<8x128xf32>
    %152 = arith.index_cast %87 : i32 to index
    %c0_54 = arith.constant 0 : index
    %153 = vector.load %arg17[%152, %c0_54] : memref<32x128xf32, #tpu.memory_space<vmem>>, vector<8x128xf32>
    tpu.vector_store %arg17[%152, %c0_54], %151 {strides = array<i32>} : memref<32x128xf32, #tpu.memory_space<vmem>>, vector<8x128xf32>,
    %c2_i32 = arith.constant 2 : i32
    %c8_i32_55 = arith.constant 8 : i32
    %154 = arith.muli %c2_i32, %c8_i32_55 : i32
    %155 = tpu.assume_multiple %154, 8 : i32
    %156 = arith.truncf %151 : vector<8x128xf32> to vector<8x128xbf16>
    %c0_56 = arith.constant 0 : index
    %c0_57 = arith.constant 0 : index
    %157 = vector.load %arg7[%c0_56, %c0_57] : memref<128x512xbf16, #tpu.memory_space<vmem>>, vector<128x512xbf16>
    %cst_58 = arith.constant dense<0.000000e+00> : vector<8x512xf32>
    %158 = tpu.matmul %156, %157, %cst_58 {dimension_numbers = #tpu.dot_dimension_numbers<[1], [0], [0], [1], [0, 0, 1, 1], [], []>} : vector<8x128xbf16>, vector<128x512xbf16>, vector<8x512xf32> -> vector<8x512xf32>
    %159 = arith.index_cast %155 : i32 to index
    %c0_59 = arith.constant 0 : index
    %160 = vector.load %arg16[%159, %c0_59] : memref<32x512xf32, #tpu.memory_space<vmem>>, vector<8x512xf32>
    %161 = arith.truncf %121 : vector<8x128xf32> to vector<8x128xbf16>
    %c0_60 = arith.constant 0 : index
    %c0_61 = arith.constant 0 : index
    %162 = vector.load %arg4[%c0_60, %c0_61] : memref<128x512xbf16, #tpu.memory_space<vmem>>, vector<128x512xbf16>
    %cst_62 = arith.constant dense<0.000000e+00> : vector<8x512xf32>
    %163 = tpu.matmul %161, %162, %cst_62 {dimension_numbers = #tpu.dot_dimension_numbers<[1], [0], [0], [1], [0, 0, 1, 1], [], []>} : vector<8x128xbf16>, vector<128x512xbf16>, vector<8x512xf32> -> vector<8x512xf32>
    %164 = arith.addf %160, %163 : vector<8x512xf32>
    %165 = vector.extract_strided_slice %164 {offsets = [0, 0], sizes = [8, 128], strides = [1, 1]} : vector<8x512xf32> to vector<8x128xf32>
    %166 = arith.negf %165 : vector<8x128xf32>
    %167 = math.exp %166 : vector<8x128xf32>
    %cst_63 = arith.constant 1.000000e+00 : f32
    %168 = vector.broadcast %cst_63 : f32 to vector<8x128xf32>
    %169 = arith.addf %168, %167 : vector<8x128xf32>
    %170 = arith.divf %168, %169 : vector<8x128xf32>
    %171 = vector.extract_strided_slice %164 {offsets = [0, 128], sizes = [8, 128], strides = [1, 1]} : vector<8x512xf32> to vector<8x128xf32>
    %172 = arith.negf %171 : vector<8x128xf32>
    %173 = math.exp %172 : vector<8x128xf32>
    %cst_64 = arith.constant 1.000000e+00 : f32
    %174 = vector.broadcast %cst_64 : f32 to vector<8x128xf32>
    %175 = arith.addf %174, %173 : vector<8x128xf32>
    %176 = arith.divf %174, %175 : vector<8x128xf32>
    %177 = vector.extract_strided_slice %164 {offsets = [0, 256], sizes = [8, 128], strides = [1, 1]} : vector<8x512xf32> to vector<8x128xf32>
    %178 = math.tanh %177 : vector<8x128xf32>
    %179 = vector.extract_strided_slice %164 {offsets = [0, 384], sizes = [8, 128], strides = [1, 1]} : vector<8x512xf32> to vector<8x128xf32>
    %180 = arith.negf %179 : vector<8x128xf32>
    %181 = math.exp %180 : vector<8x128xf32>
    %cst_65 = arith.constant 1.000000e+00 : f32
    %182 = vector.broadcast %cst_65 : f32 to vector<8x128xf32>
    %183 = arith.addf %182, %181 : vector<8x128xf32>
    %184 = arith.divf %182, %183 : vector<8x128xf32>
    %185 = arith.mulf %176, %119 : vector<8x128xf32>
    %186 = arith.mulf %170, %178 : vector<8x128xf32>
    %187 = arith.addf %185, %186 : vector<8x128xf32>
    %188 = math.tanh %187 : vector<8x128xf32>
    %189 = arith.mulf %184, %188 : vector<8x128xf32>
    %190 = arith.truncf %189 : vector<8x128xf32> to vector<8x128xbf16>
    %c0_66 = arith.constant 0 : index
    %c0_67 = arith.constant 0 : index
    %191 = vector.load %arg6[%c0_66, %c0_67] : memref<128x512xbf16, #tpu.memory_space<vmem>>, vector<128x512xbf16>
    %cst_68 = arith.constant dense<0.000000e+00> : vector<8x512xf32>
    %192 = tpu.matmul %190, %191, %cst_68 {dimension_numbers = #tpu.dot_dimension_numbers<[1], [0], [0], [1], [0, 0, 1, 1], [], []>} : vector<8x128xbf16>, vector<128x512xbf16>, vector<8x512xf32> -> vector<8x512xf32>
    %193 = arith.addf %158, %192 : vector<8x512xf32>
    %194 = arith.addf %193, %13 : vector<8x512xf32>
    %195 = vector.extract_strided_slice %194 {offsets = [0, 0], sizes = [8, 128], strides = [1, 1]} : vector<8x512xf32> to vector<8x128xf32>
    %196 = arith.negf %195 : vector<8x128xf32>
    %197 = math.exp %196 : vector<8x128xf32>
    %cst_69 = arith.constant 1.000000e+00 : f32
    %198 = vector.broadcast %cst_69 : f32 to vector<8x128xf32>
    %199 = arith.addf %198, %197 : vector<8x128xf32>
    %200 = arith.divf %198, %199 : vector<8x128xf32>
    %201 = vector.extract_strided_slice %194 {offsets = [0, 128], sizes = [8, 128], strides = [1, 1]} : vector<8x512xf32> to vector<8x128xf32>
    %202 = arith.negf %201 : vector<8x128xf32>
    %203 = math.exp %202 : vector<8x128xf32>
    %cst_70 = arith.constant 1.000000e+00 : f32
    %204 = vector.broadcast %cst_70 : f32 to vector<8x128xf32>
    %205 = arith.addf %204, %203 : vector<8x128xf32>
    %206 = arith.divf %204, %205 : vector<8x128xf32>
    %207 = vector.extract_strided_slice %194 {offsets = [0, 256], sizes = [8, 128], strides = [1, 1]} : vector<8x512xf32> to vector<8x128xf32>
    %208 = math.tanh %207 : vector<8x128xf32>
    %209 = vector.extract_strided_slice %194 {offsets = [0, 384], sizes = [8, 128], strides = [1, 1]} : vector<8x512xf32> to vector<8x128xf32>
    %210 = arith.negf %209 : vector<8x128xf32>
    %211 = math.exp %210 : vector<8x128xf32>
    %cst_71 = arith.constant 1.000000e+00 : f32
    %212 = vector.broadcast %cst_71 : f32 to vector<8x128xf32>
    %213 = arith.addf %212, %211 : vector<8x128xf32>
    %214 = arith.divf %212, %213 : vector<8x128xf32>
    %215 = arith.mulf %206, %149 : vector<8x128xf32>
    %216 = arith.mulf %200, %208 : vector<8x128xf32>
    %217 = arith.addf %215, %216 : vector<8x128xf32>
    %218 = math.tanh %217 : vector<8x128xf32>
    %219 = arith.mulf %214, %218 : vector<8x128xf32>
    %220 = arith.index_cast %155 : i32 to index
    %c0_72 = arith.constant 0 : index
    %221 = vector.load %arg17[%220, %c0_72] : memref<32x128xf32, #tpu.memory_space<vmem>>, vector<8x128xf32>
    tpu.vector_store %arg17[%220, %c0_72], %219 {strides = array<i32>} : memref<32x128xf32, #tpu.memory_space<vmem>>, vector<8x128xf32>,
    %c3_i32 = arith.constant 3 : i32
    %c8_i32_73 = arith.constant 8 : i32
    %222 = arith.muli %c3_i32, %c8_i32_73 : i32
    %223 = tpu.assume_multiple %222, 8 : i32
    %224 = arith.truncf %219 : vector<8x128xf32> to vector<8x128xbf16>
    %c0_74 = arith.constant 0 : index
    %c0_75 = arith.constant 0 : index
    %225 = vector.load %arg7[%c0_74, %c0_75] : memref<128x512xbf16, #tpu.memory_space<vmem>>, vector<128x512xbf16>
    %cst_76 = arith.constant dense<0.000000e+00> : vector<8x512xf32>
    %226 = tpu.matmul %224, %225, %cst_76 {dimension_numbers = #tpu.dot_dimension_numbers<[1], [0], [0], [1], [0, 0, 1, 1], [], []>} : vector<8x128xbf16>, vector<128x512xbf16>, vector<8x512xf32> -> vector<8x512xf32>
    %227 = arith.index_cast %223 : i32 to index
    %c0_77 = arith.constant 0 : index
    %228 = vector.load %arg16[%227, %c0_77] : memref<32x512xf32, #tpu.memory_space<vmem>>, vector<8x512xf32>
    %229 = arith.truncf %189 : vector<8x128xf32> to vector<8x128xbf16>
    %c0_78 = arith.constant 0 : index
    %c0_79 = arith.constant 0 : index
    %230 = vector.load %arg4[%c0_78, %c0_79] : memref<128x512xbf16, #tpu.memory_space<vmem>>, vector<128x512xbf16>
    %cst_80 = arith.constant dense<0.000000e+00> : vector<8x512xf32>
    %231 = tpu.matmul %229, %230, %cst_80 {dimension_numbers = #tpu.dot_dimension_numbers<[1], [0], [0], [1], [0, 0, 1, 1], [], []>} : vector<8x128xbf16>, vector<128x512xbf16>, vector<8x512xf32> -> vector<8x512xf32>
    %232 = arith.addf %228, %231 : vector<8x512xf32>
    %233 = vector.extract_strided_slice %232 {offsets = [0, 0], sizes = [8, 128], strides = [1, 1]} : vector<8x512xf32> to vector<8x128xf32>
    %234 = arith.negf %233 : vector<8x128xf32>
    %235 = math.exp %234 : vector<8x128xf32>
    %cst_81 = arith.constant 1.000000e+00 : f32
    %236 = vector.broadcast %cst_81 : f32 to vector<8x128xf32>
    %237 = arith.addf %236, %235 : vector<8x128xf32>
    %238 = arith.divf %236, %237 : vector<8x128xf32>
    %239 = vector.extract_strided_slice %232 {offsets = [0, 128], sizes = [8, 128], strides = [1, 1]} : vector<8x512xf32> to vector<8x128xf32>
    %240 = arith.negf %239 : vector<8x128xf32>
    %241 = math.exp %240 : vector<8x128xf32>
    %cst_82 = arith.constant 1.000000e+00 : f32
    %242 = vector.broadcast %cst_82 : f32 to vector<8x128xf32>
    %243 = arith.addf %242, %241 : vector<8x128xf32>
    %244 = arith.divf %242, %243 : vector<8x128xf32>
    %245 = vector.extract_strided_slice %232 {offsets = [0, 256], sizes = [8, 128], strides = [1, 1]} : vector<8x512xf32> to vector<8x128xf32>
    %246 = math.tanh %245 : vector<8x128xf32>
    %247 = vector.extract_strided_slice %232 {offsets = [0, 384], sizes = [8, 128], strides = [1, 1]} : vector<8x512xf32> to vector<8x128xf32>
    %248 = arith.negf %247 : vector<8x128xf32>
    %249 = math.exp %248 : vector<8x128xf32>
    %cst_83 = arith.constant 1.000000e+00 : f32
    %250 = vector.broadcast %cst_83 : f32 to vector<8x128xf32>
    %251 = arith.addf %250, %249 : vector<8x128xf32>
    %252 = arith.divf %250, %251 : vector<8x128xf32>
    %253 = arith.mulf %244, %187 : vector<8x128xf32>
    %254 = arith.mulf %238, %246 : vector<8x128xf32>
    %255 = arith.addf %253, %254 : vector<8x128xf32>
    %256 = math.tanh %255 : vector<8x128xf32>
    %257 = arith.mulf %252, %256 : vector<8x128xf32>
    %258 = arith.truncf %257 : vector<8x128xf32> to vector<8x128xbf16>
    %c0_84 = arith.constant 0 : index
    %c0_85 = arith.constant 0 : index
    %259 = vector.load %arg6[%c0_84, %c0_85] : memref<128x512xbf16, #tpu.memory_space<vmem>>, vector<128x512xbf16>
    %cst_86 = arith.constant dense<0.000000e+00> : vector<8x512xf32>
    %260 = tpu.matmul %258, %259, %cst_86 {dimension_numbers = #tpu.dot_dimension_numbers<[1], [0], [0], [1], [0, 0, 1, 1], [], []>} : vector<8x128xbf16>, vector<128x512xbf16>, vector<8x512xf32> -> vector<8x512xf32>
    %261 = arith.addf %226, %260 : vector<8x512xf32>
    %262 = arith.addf %261, %13 : vector<8x512xf32>
    %263 = vector.extract_strided_slice %262 {offsets = [0, 0], sizes = [8, 128], strides = [1, 1]} : vector<8x512xf32> to vector<8x128xf32>
    %264 = arith.negf %263 : vector<8x128xf32>
    %265 = math.exp %264 : vector<8x128xf32>
    %cst_87 = arith.constant 1.000000e+00 : f32
    %266 = vector.broadcast %cst_87 : f32 to vector<8x128xf32>
    %267 = arith.addf %266, %265 : vector<8x128xf32>
    %268 = arith.divf %266, %267 : vector<8x128xf32>
    %269 = vector.extract_strided_slice %262 {offsets = [0, 128], sizes = [8, 128], strides = [1, 1]} : vector<8x512xf32> to vector<8x128xf32>
    %270 = arith.negf %269 : vector<8x128xf32>
    %271 = math.exp %270 : vector<8x128xf32>
    %cst_88 = arith.constant 1.000000e+00 : f32
    %272 = vector.broadcast %cst_88 : f32 to vector<8x128xf32>
    %273 = arith.addf %272, %271 : vector<8x128xf32>
    %274 = arith.divf %272, %273 : vector<8x128xf32>
    %275 = vector.extract_strided_slice %262 {offsets = [0, 256], sizes = [8, 128], strides = [1, 1]} : vector<8x512xf32> to vector<8x128xf32>
    %276 = math.tanh %275 : vector<8x128xf32>
    %277 = vector.extract_strided_slice %262 {offsets = [0, 384], sizes = [8, 128], strides = [1, 1]} : vector<8x512xf32> to vector<8x128xf32>
    %278 = arith.negf %277 : vector<8x128xf32>
    %279 = math.exp %278 : vector<8x128xf32>
    %cst_89 = arith.constant 1.000000e+00 : f32
    %280 = vector.broadcast %cst_89 : f32 to vector<8x128xf32>
    %281 = arith.addf %280, %279 : vector<8x128xf32>
    %282 = arith.divf %280, %281 : vector<8x128xf32>
    %283 = arith.mulf %274, %217 : vector<8x128xf32>
    %284 = arith.mulf %268, %276 : vector<8x128xf32>
    %285 = arith.addf %283, %284 : vector<8x128xf32>
    %286 = math.tanh %285 : vector<8x128xf32>
    %287 = arith.mulf %282, %286 : vector<8x128xf32>
    %288 = arith.index_cast %223 : i32 to index
    %c0_90 = arith.constant 0 : index
    %289 = vector.load %arg17[%288, %c0_90] : memref<32x128xf32, #tpu.memory_space<vmem>>, vector<8x128xf32>
    tpu.vector_store %arg17[%288, %c0_90], %287 {strides = array<i32>} : memref<32x128xf32, #tpu.memory_space<vmem>>, vector<8x128xf32>,
    %c4_i32 = arith.constant 4 : i32
    %c0_91 = arith.constant 0 : index
    %c0_92 = arith.constant 0 : index
    %290 = vector.load %arg12[%c0_91, %c0_92] : memref<8x128xf32, #tpu.memory_space<vmem>>, vector<8x128xf32>
    tpu.vector_store %arg12[%c0_91, %c0_92], %257 {strides = array<i32>} : memref<8x128xf32, #tpu.memory_space<vmem>>, vector<8x128xf32>,
    %c0_93 = arith.constant 0 : index
    %c0_94 = arith.constant 0 : index
    %291 = vector.load %arg13[%c0_93, %c0_94] : memref<8x128xf32, #tpu.memory_space<vmem>>, vector<8x128xf32>
    tpu.vector_store %arg13[%c0_93, %c0_94], %255 {strides = array<i32>} : memref<8x128xf32, #tpu.memory_space<vmem>>, vector<8x128xf32>,
    %c0_95 = arith.constant 0 : index
    %c0_96 = arith.constant 0 : index
    %292 = vector.load %arg14[%c0_95, %c0_96] : memref<8x128xf32, #tpu.memory_space<vmem>>, vector<8x128xf32>
    tpu.vector_store %arg14[%c0_95, %c0_96], %287 {strides = array<i32>} : memref<8x128xf32, #tpu.memory_space<vmem>>, vector<8x128xf32>,
    %c0_97 = arith.constant 0 : index
    %c0_98 = arith.constant 0 : index
    %293 = vector.load %arg15[%c0_97, %c0_98] : memref<8x128xf32, #tpu.memory_space<vmem>>, vector<8x128xf32>
    tpu.vector_store %arg15[%c0_97, %c0_98], %285 {strides = array<i32>} : memref<8x128xf32, #tpu.memory_space<vmem>>, vector<8x128xf32>,
    %c0_99 = arith.constant 0 : index
    %c0_100 = arith.constant 0 : index
    %294 = vector.load %arg17[%c0_99, %c0_100] : memref<32x128xf32, #tpu.memory_space<vmem>>, vector<32x128xf32>
    %295 = arith.truncf %294 : vector<32x128xf32> to vector<32x128xbf16>
    %c0_101 = arith.constant 0 : index
    %c0_102 = arith.constant 0 : index
    %296 = vector.load %arg9[%c0_101, %c0_102] : memref<128x128xbf16, #tpu.memory_space<vmem>>, vector<128x128xbf16>
    %cst_103 = arith.constant dense<0.000000e+00> : vector<32x128xf32>
    %297 = tpu.matmul %295, %296, %cst_103 {dimension_numbers = #tpu.dot_dimension_numbers<[1], [0], [0], [1], [0, 0, 1, 1], [], []>} : vector<32x128xbf16>, vector<128x128xbf16>, vector<32x128xf32> -> vector<32x128xf32>
    %c0_104 = arith.constant 0 : index
    %c0_105 = arith.constant 0 : index
    %298 = vector.load %arg10[%c0_104, %c0_105] : memref<1x128xf32, #tpu.memory_space<vmem>>, vector<1x128xf32>
    %299 = vector.broadcast %298 : vector<1x128xf32> to vector<32x128xf32>
    %300 = arith.addf %297, %299 : vector<32x128xf32>
    %cst_106 = arith.constant dense<0xFF800000> : vector<32xf32>
    %301 = vector.multi_reduction <maximumf>, %300, %cst_106 [1] : vector<32x128xf32> to vector<32xf32>
    %302 = vector.shape_cast %301 : vector<32xf32> to vector<32x1xf32>
    %303 = vector.broadcast %302 : vector<32x1xf32> to vector<32x128xf32>
    %304 = arith.subf %300, %303 : vector<32x128xf32>
    %305 = math.exp %304 : vector<32x128xf32>
    %cst_107 = arith.constant dense<0.000000e+00> : vector<32xf32>
    %306 = vector.multi_reduction <add>, %305, %cst_107 [1] : vector<32x128xf32> to vector<32xf32>
    %307 = vector.shape_cast %306 : vector<32xf32> to vector<32x1xf32>
    %308 = math.log %307 : vector<32x1xf32>
    %309 = vector.broadcast %308 : vector<32x1xf32> to vector<32x128xf32>
    %310 = arith.subf %304, %309 : vector<32x128xf32>
    %c0_108 = arith.constant 0 : index
    %c0_109 = arith.constant 0 : index
    %c0_110 = arith.constant 0 : index
    %311 = vector.load %arg11[%c0_108, %c0_109, %c0_110] : memref<1x32x128xf32, #tpu.memory_space<vmem>>, vector<1x32x128xf32>
    %312 = vector.shape_cast %311 : vector<1x32x128xf32> to vector<32x128xf32>
    %313 = vector.shape_cast %310 : vector<32x128xf32> to vector<1x32x128xf32>
    tpu.vector_store %arg11[%c0_108, %c0_109, %c0_110], %313 {strides = array<i32>} : memref<1x32x128xf32, #tpu.memory_space<vmem>>, vector<1x32x128xf32>,
    return
  }
  func.func @transform_0(%arg0: i32, %arg1: i32) -> (i32, i32, i32) {
    %c0_i32 = arith.constant 0 : i32
    %c0_i32_0 = arith.constant 0 : i32
    return %arg0, %arg1, %c0_i32 : i32, i32, i32
  }
  func.func @transform_1(%arg0: i32, %arg1: i32) -> (i32, i32) {
    %c0_i32 = arith.constant 0 : i32
    %c0_i32_0 = arith.constant 0 : i32
    %c0_i32_1 = arith.constant 0 : i32
    return %c0_i32, %c0_i32_0 : i32, i32
  }
  func.func @transform_2(%arg0: i32, %arg1: i32) -> (i32, i32) {
    %c0_i32 = arith.constant 0 : i32
    %c0_i32_0 = arith.constant 0 : i32
    %c0_i32_1 = arith.constant 0 : i32
    return %c0_i32, %c0_i32_0 : i32, i32
  }
  func.func @transform_3(%arg0: i32, %arg1: i32) -> (i32, i32) {
    %c0_i32 = arith.constant 0 : i32
    %c0_i32_0 = arith.constant 0 : i32
    %c0_i32_1 = arith.constant 0 : i32
    return %c0_i32, %c0_i32_0 : i32, i32
  }
  func.func @transform_4(%arg0: i32, %arg1: i32) -> (i32, i32) {
    %c0_i32 = arith.constant 0 : i32
    %c0_i32_0 = arith.constant 0 : i32
    %c0_i32_1 = arith.constant 0 : i32
    return %c0_i32, %c0_i32_0 : i32, i32
  }
  func.func @transform_5(%arg0: i32, %arg1: i32) -> (i32, i32) {
    %c0_i32 = arith.constant 0 : i32
    %c0_i32_0 = arith.constant 0 : i32
    %c0_i32_1 = arith.constant 0 : i32
    return %c0_i32, %c0_i32_0 : i32, i32
  }
  func.func @transform_6(%arg0: i32, %arg1: i32) -> (i32, i32) {
    %c0_i32 = arith.constant 0 : i32
    %c0_i32_0 = arith.constant 0 : i32
    %c0_i32_1 = arith.constant 0 : i32
    return %c0_i32, %c0_i32_0 : i32, i32
  }
  func.func @transform_7(%arg0: i32, %arg1: i32) -> (i32, i32) {
    %c0_i32 = arith.constant 0 : i32
    %c0_i32_0 = arith.constant 0 : i32
    %c0_i32_1 = arith.constant 0 : i32
    return %c0_i32, %c0_i32_0 : i32, i32
  }
  func.func @transform_8(%arg0: i32, %arg1: i32) -> (i32, i32) {
    %c0_i32 = arith.constant 0 : i32
    %c0_i32_0 = arith.constant 0 : i32
    %c0_i32_1 = arith.constant 0 : i32
    return %c0_i32, %c0_i32_0 : i32, i32
  }
  func.func @transform_9(%arg0: i32, %arg1: i32) -> (i32, i32, i32) {
    %c0_i32 = arith.constant 0 : i32
    %c0_i32_0 = arith.constant 0 : i32
    return %arg0, %arg1, %c0_i32 : i32, i32, i32
  }
}

</mosaic_0001>

<bundles_post_ra>
// kernel: tpu_custom_call.1
= control target key start
LH: loop header
LB: loop body
LE: loop exit
PB: predicated region body
PF: predicated region fallthrough
CT: control target
= control target key end

     0   :  { %s7472_s0 = inlined_call_operand.hbm [shape: bf16[1,64,128], index: 0, kind: input, shape index: {}]   ;;  %s7473_s1 = inlined_call_operand.hbm [shape: bf16[128,512], index: 1, kind: input, shape index: {}]   ;;  %s7474_s2 = inlined_call_operand.hbm [shape: bf16[128,512], index: 2, kind: input, shape index: {}]   ;;  %s7475_s3 = inlined_call_operand.vmem [shape: f32[1,512], index: 3, kind: input, shape index: {}]   ;;  %s7476_s4 = inlined_call_operand.hbm [shape: bf16[128,512], index: 4, kind: input, shape index: {}]   ;;  %s7477_s5 = inlined_call_operand.hbm [shape: bf16[128,512], index: 5, kind: input, shape index: {}]   ;;  %s7478_s6 = inlined_call_operand.vmem [shape: f32[1,512], index: 6, kind: input, shape index: {}]   ;;  %s7479_s7 = inlined_call_operand.hbm [shape: bf16[128,128], index: 7, kind: input, shape index: {}]   ;;  %s7480_s8 = inlined_call_operand.vmem [shape: f32[1,128], index: 8, kind: input, shape index: {}]   ;;  %s7481_s9 = inlined_call_operand.hbm [shape: f32[1,64,128], index: 9, kind: output, shape index: {}]  }
   0x1   :  { %7579 = sst [smem:[#allocation75_spill]] %s7473_s1 }
   0x2   :  { %7580 = sst [smem:[#allocation76_spill]] %s7478_s6 }
   0x3   :  { %7581 = sst [smem:[#allocation77_spill]] %s7480_s8 }
   0x4   :  { %7582 = sst [smem:[#allocation78_spill]] %s7481_s9 }
   0x5   :  { %14 = vsyncpa [#allocation9], 0 }
   0x6   :  { %16 = vsyncpa [#allocation9 + $0x1], 0 }
   0x7   :  { %17 = vsyncpa [#allocation12], 0 }
   0x8   :  { %18 = vsyncpa [#allocation15], 0 }
   0x9   :  { %19 = vsyncpa [#allocation18], 0 }
   0xa   :  { %20 = vsyncpa [#allocation10], 0 }
   0xb   :  { %22 = vsyncpa [#allocation10 + $0x1], 0  ;;  %s6166_s30 = smov 0   ;;  %s6168_s10 = smov 0  }
   0xc   :  { %s6170_s11 = smov 0   ;;  %s6172_s12 = smov 0  }
   0xd   :  { %s6174_s13 = smov 0   ;;  %s6176_s14 = smov 0  }
   0xe LB: > { %s7482_s15 = sadd.s32 4294967295, %s6099_s14   ;;  %p4717_p0 = scmp.ge.s32.totalorder %s6099_s14, 1  ;;  %s6099_s14 = sphi %s6176_s14, %s28_s14   ;;  %s6095_s13 = sphi %s6174_s13, %s7803_s13   ;;  %s6091_s12 = sphi %s6172_s12, %s7802_s12   ;;  %s6087_s11 = sphi %s6170_s11, %s7801_s11   ;;  %s6083_s10 = sphi %s6168_s10, %s7800_s10   ;;  %s6079_s30 = sphi %s6166_s30, %s7799_s30  }
   0xf   : > { %p6200_p1 = scmp.eq.s32.totalorder %s7482_s15, 0  ;;  %p269_p2 = scmp.lt.s32.totalorder %s6099_s14, 3 }
  0x10   : > { %s6101_s18 = smov [#allocation11]   ;;  %s6102_s21 = smov [#allocation14]  }
  0x11   : > { %s7583_s16 = scalar_select %p6200_p1, 1, 0 }
  0x12   : > { %p6205_p3 = pnand %p4717_p0, %p269_p2  ;;  %s281_s19 = sshll.u32 %s6101_s18, 4  ;;  %s6209_s19 = int_to_ptr.vmem [resolvable:$true] %s281_s19 }
  0x13   : > { %s310_s22 = sshll.u32 %s6102_s21, 4  ;;  %s6103_s23 = smov [#allocation13]   ;;  %s6220_s22 = int_to_ptr.vmem [resolvable:$true] %s310_s22 }
  0x14   : > { %s7584_s17 = scalar_select %p6205_p3, 1, 0 }
  0x15   : > { %p5248_p4 = pneg %p6205_p3  ;;  %s6222_s24 = sshll.u32 %s6103_s23, 4  ;;  %s295_s24 = int_to_ptr.vmem [resolvable:$true] %s6222_s24 }
  0x16   : > { %s7586_s1 = sld [smem:[#allocation75_spill]] }
  0x17   : > { %p6216_p6 = pnand %p5248_p4, %p6200_p1 }
  0x19   : > { %p6232_p8 = pneg %p6216_p6 }
  0x1c   : > { %s5835_s27 = scalar_lea.hbm %s7586_s1, 4096 }
  0x1d   : > { %p5836_p7 = scmp.ne.s32.totalorder %s7586_s1, %s5835_s27  ;;  %p5842_p11 = scmp.lt.u32.totalorder %s5835_s27, %s7586_s1 }
  0x1f   : > { %p5838_p9 = pnand %p6232_p8, %p5836_p7 }
  0x21   : > { %p5839_p10 = pneg %p5838_p9 }
  0x23   : > { %p5844_p12 = pnand %p5842_p11, %p5839_p10 }
  0x25   : > { %5847 = shalt.err (!%p5844_p12)
}
  0x26   : > { %s5848_s25 = scalar_lea.vmem %s6209_s19, 4096  ;;  %p5856_p4 = scmp.lt.s32.totalorder %s6209_s19, %s6209_s19 }
  0x27   : > { %p5849_p13 = scmp.ne.s32.totalorder %s6209_s19, %s5848_s25  ;;  %p5857_p5 = scmp.lt.s32.totalorder %s5848_s25, %s5848_s25 }
  0x29   : > { %p5851_p0 = pnand %p5849_p13, %p6232_p8  ;;  %p5858_p7 = por %p5857_p5, %p5856_p4 }
  0x2b   : > { %p5852_p2 = pneg %p5851_p0 }
  0x2d   : > { %p5859_p9 = pnand %p5858_p7, %p5852_p2 }
  0x2f   : > { %5862 = shalt.err (!%p5859_p9)
}
  0x30   : > { %s6104_s26 = smov 256   ;;  %s6105_s27 = smov 16  }
  0x31   : > { %5251 = dma.hbm_to_vmem [thread:$0]  (!%p6216_p6), %s7586_s1, 4096, %s6209_s19, [#allocation12], %s6104_s26, %s6104_s26, %s6105_s27  }
  0x32   : > { %s5863_s25 = scalar_lea.hbm %s7476_s4, 4096 }
  0x33   : > { %p5864_p5 = scmp.ne.s32.totalorder %s7476_s4, %s5863_s25  ;;  %p5870_p12 = scmp.lt.u32.totalorder %s5863_s25, %s7476_s4 }
  0x35   : > { %p5866_p10 = pnand %p5864_p5, %p6232_p8 }
  0x37   : > { %p5867_p11 = pneg %p5866_p10 }
  0x39   : > { %p5872_p13 = pnand %p5870_p12, %p5867_p11 }
  0x3b   : > { %5875 = shalt.err (!%p5872_p13)
}
  0x3c   : > { %s5876_s19 = scalar_lea.vmem %s6220_s22, 4096  ;;  %p5884_p7 = scmp.lt.s32.totalorder %s6220_s22, %s6220_s22 }
  0x3d   : > { %p5877_p0 = scmp.ne.s32.totalorder %s6220_s22, %s5876_s19  ;;  %p5885_p9 = scmp.lt.s32.totalorder %s5876_s19, %s5876_s19 }
  0x3f   : > { %p5879_p2 = pnand %p5877_p0, %p6232_p8  ;;  %p5886_p5 = por %p5885_p9, %p5884_p7 }
  0x41   : > { %p5880_p4 = pneg %p5879_p2 }
  0x43   : > { %p5887_p10 = pnand %p5886_p5, %p5880_p4 }
  0x45   : > { %5890 = shalt.err (!%p5887_p10)
}
  0x46   : > { %5257 = dma.hbm_to_vmem [thread:$0]  (!%p6216_p6), %s7476_s4, 4096, %s6220_s22, [#allocation15], %s6104_s26, %s6104_s26, %s6105_s27  }
  0x47   : > { %s5891_s28 = scalar_lea.hbm %s7474_s2, 4096 }
  0x48   : > { %p5892_p11 = scmp.ne.s32.totalorder %s7474_s2, %s5891_s28  ;;  %p5898_p0 = scmp.lt.u32.totalorder %s5891_s28, %s7474_s2 }
  0x4a   : > { %p5894_p12 = pnand %p5892_p11, %p6232_p8 }
  0x4c   : > { %p5895_p13 = pneg %p5894_p12 }
  0x4e   : > { %p5900_p2 = pnand %p5898_p0, %p5895_p13 }
  0x50   : > { %5903 = shalt.err (!%p5900_p2)
}
  0x51   : > { %s5904_s19 = scalar_lea.vmem %s295_s24, 4096  ;;  %p5912_p5 = scmp.lt.s32.totalorder %s295_s24, %s295_s24 }
  0x52   : > { %p5905_p4 = scmp.ne.s32.totalorder %s295_s24, %s5904_s19  ;;  %p5913_p10 = scmp.lt.s32.totalorder %s5904_s19, %s5904_s19 }
  0x54   : > { %p5907_p7 = pnand %p5905_p4, %p6232_p8  ;;  %p5914_p3 = por %p5913_p10, %p5912_p5 }
  0x56   : > { %p5908_p9 = pneg %p5907_p7 }
  0x58   : > { %p5915_p1 = pnand %p5914_p3, %p5908_p9 }
  0x5a   : > { %5918 = shalt.err (!%p5915_p1)
}
  0x5b   : > { %5254 = dma.hbm_to_vmem [thread:$0]  (!%p6216_p6), %s7474_s2, 4096, %s295_s24, [#allocation12], %s6104_s26, %s6104_s26, %s6105_s27  }
  0x5c   : > { %s6106_s8 = smov [#allocation16]   ;;  %s6107_s15 = smov [#allocation17]  }
  0x5d   : > { %s323_s9 = sshll.u32 %s6106_s8, 4  ;;  %s339_s28 = sshll.u32 %s6107_s15, 4  ;;  %s324_s9 = int_to_ptr.vmem [resolvable:$true] %s323_s9  ;;  %s340_s28 = int_to_ptr.vmem [resolvable:$true] %s339_s28 }
  0x5e   : > { %s5919_s23 = scalar_lea.hbm %s7477_s5, 4096 }
  0x5f   : > { %p5920_p1 = scmp.ne.s32.totalorder %s7477_s5, %s5919_s23  ;;  %p5926_p12 = scmp.lt.u32.totalorder %s5919_s23, %s7477_s5 }
  0x61   : > { %p5922_p3 = pnand %p5920_p1, %p6232_p8 }
  0x63   : > { %p5923_p11 = pneg %p5922_p3 }
  0x65   : > { %p5928_p13 = pnand %p5926_p12, %p5923_p11 }
  0x67   : > { %5931 = shalt.err (!%p5928_p13)
}
  0x68   : > { %s5932_s24 = scalar_lea.vmem %s324_s9, 4096  ;;  %p5940_p7 = scmp.lt.s32.totalorder %s324_s9, %s324_s9 }
  0x69   : > { %p5933_p0 = scmp.ne.s32.totalorder %s324_s9, %s5932_s24  ;;  %p5941_p9 = scmp.lt.s32.totalorder %s5932_s24, %s5932_s24 }
  0x6b   : > { %p5935_p2 = pnand %p5933_p0, %p6232_p8  ;;  %p5942_p5 = por %p5941_p9, %p5940_p7 }
  0x6d   : > { %p5936_p4 = pneg %p5935_p2 }
  0x6f   : > { %p5943_p10 = pnand %p5942_p5, %p5936_p4 }
  0x71   : > { %5946 = shalt.err (!%p5943_p10)
}
  0x72   : > { %5260 = dma.hbm_to_vmem [thread:$0]  (!%p6216_p6), %s7477_s5, 4096, %s324_s9, [#allocation15], %s6104_s26, %s6104_s26, %s6105_s27  }
  0x73   : > { %s5947_s29 = scalar_lea.hbm %s7479_s7, 1024 }
  0x74   : > { %p5948_p1 = scmp.ne.s32.totalorder %s7479_s7, %s5947_s29  ;;  %p5954_p12 = scmp.lt.u32.totalorder %s5947_s29, %s7479_s7 }
  0x76   : > { %p5950_p3 = pnand %p5948_p1, %p6232_p8 }
  0x78   : > { %p5951_p11 = pneg %p5950_p3 }
  0x7a   : > { %p5956_p13 = pnand %p5954_p12, %p5951_p11 }
  0x7c   : > { %5959 = shalt.err (!%p5956_p13)
}
  0x7d   : > { %s5960_s22 = scalar_lea.vmem %s340_s28, 1024  ;;  %p5968_p7 = scmp.lt.s32.totalorder %s340_s28, %s340_s28 }
  0x7e   : > { %p5961_p0 = scmp.ne.s32.totalorder %s340_s28, %s5960_s22  ;;  %p5969_p9 = scmp.lt.s32.totalorder %s5960_s22, %s5960_s22 }
  0x80   : > { %p5963_p2 = pnand %p5961_p0, %p6232_p8  ;;  %p5970_p5 = por %p5969_p9, %p5968_p7 }
  0x82   : > { %p5964_p4 = pneg %p5963_p2 }
  0x84   : > { %p5971_p10 = pnand %p5970_p5, %p5964_p4 }
  0x86   : > { %5974 = shalt.err (!%p5971_p10)
}
  0x87   : > { %s7487_s26 = smov 64   ;;  %s6109_s18 = smov 4  }
  0x88   : > { %5263 = dma.hbm_to_vmem [thread:$0]  (!%p6216_p6), %s7479_s7, 1024, %s340_s28, [#allocation18], %s7487_s26, %s7487_s26, %s6109_s18  }
  0x89   : > { %s4716_s24 = sadd.s32 4294967294, %s6099_s14   ;;  %s37_s1 = sadd.s32 1, %s6095_s13 }
  0x8a   : > { %s49_s6 = sadd.s32 1, %s6087_s11  ;;  %p38_p8 = scmp.ge.s32.totalorder %s37_s1, 2 }
  0x8b   : > { %p56_p1 = scmp.ne.s32.totalorder %s6087_s11, %s6083_s10  ;;  %p57_p3 = scmp.eq.s32.totalorder %s6099_s14, 0 }
  0x8c   : > { %p62_p11 = scmp.ne.s32.totalorder %s6083_s10, %s6079_s30  ;;  %s7805_s1 = smov (%p38_p8, %s37_s1), 0 }
  0x8d   : > { %p6356_p12 = por %p57_p3, %p56_p1  ;;  %p7589_p13 = scmp.ne.s32.totalorder %s7583_s16, 0 }
  0x8e   : > { %s45_s8 = ssub.s32 %s6095_s13, %s7805_s1  ;;  %s7591_s15 = sadd.s32 4294967295, %s6099_s14  }
  0x8f   : > { %p6362_p6 = por %p7589_p13, %p62_p11  ;;  %p256_p0 = scmp.eq.s32.totalorder %s7591_s15, 1 }
  0x90   : > { %p47_p2 = scmp.eq.s32.totalorder %s45_s8, 0  ;;  %p262_p4 = scmp.eq.s32.totalorder %s4716_s24, 1 }
  0x91   : > { %p6370_p7 = por %p256_p0, %p56_p1  ;;  %p5277_p9 = scmp.lt.s32.totalorder %s6099_s14, 2 }
  0x92   : > { %s6376_s21 = scalar_select %p47_p2, %s6087_s11, %s49_s6  }
  0x93   : > { %s7592_s29 = scalar_select %p6370_p7, 1, 0 }
  0x94   : > { %p6378_p5 = por %p262_p4, %p62_p11  ;;  %s356_s25 = sand.u32 1, %s6087_s11  }
  0x95   : > { %s4724_s19 = sshll.u32 %s356_s25, 4  ;;  %s5192_s22 = sshll.u32 %s6095_s13, 8 }
  0x96   : > { %s7593_s23 = scalar_select %p6378_p5, 1, 0 }
  0x97   : > { %s6387_s15 = scalar_lea.hbm %s7472_s0, %s5192_s22  ;;  %s360_s24 = scalar_lea.vmem [#allocation8], %s4724_s19 }
  0x98   : > { %s369_s8 = sshll.u32 %s360_s24, 4  ;;  %p6393_p10 = pnand %p5277_p9, %p6356_p12  ;;  %s6389_s8 = int_to_ptr.vmem [resolvable:$true] %s369_s8 }
  0x99   : > { %s6397_s26 = scalar_lea.sflag [#allocation9], %s356_s25  ;;  %s5975_s27 = scalar_lea.hbm %s6387_s15, 256 }
  0x9a   : > { %p5976_p8 = scmp.ne.s32.totalorder %s6387_s15, %s5975_s27  ;;  %p5977_p1 = pneg %p6393_p10 }
  0x9b   : > { %s5980_s20 = scalar_lea.hbm %s7472_s0, 512  ;;  %p5981_p12 = scmp.lt.u32.totalorder %s6387_s15, %s7472_s0 }
  0x9c   : > { %p5978_p3 = pnand %p5977_p1, %p5976_p8  ;;  %p5982_p13 = scmp.lt.u32.totalorder %s5980_s20, %s5975_s27 }
  0x9d   : > { %p5984_p2 = scmp.lt.u32.totalorder %s5975_s27, %s6387_s15 }
  0x9e   : > { %p5979_p11 = pneg %p5978_p3  ;;  %p5983_p0 = por %p5982_p13, %p5981_p12 }
  0xa0   : > { %p5985_p4 = por %p5984_p2, %p5983_p0 }
  0xa2   : > { %p5986_p9 = pnand %p5985_p4, %p5979_p11 }
  0xa4   : > { %5989 = shalt.err (!%p5986_p9)
}
  0xa5   : > { %s5990_s25 = scalar_lea.vmem %s6389_s8, 256  ;;  %s6110_s19 = smov [#allocation8]  }
  0xa6   : > { %p5991_p8 = scmp.ne.s32.totalorder %s6389_s8, %s5990_s25  ;;  %s5995_s22 = sshll.u32 %s6110_s19, 4  ;;  %s5996_s22 = int_to_ptr.vmem [resolvable:$false] %s5995_s22 }
  0xa7   : > { %s5997_s9 = scalar_lea.vmem %s5996_s22, 512  ;;  %p5998_p7 = scmp.lt.s32.totalorder %s6389_s8, %s5996_s22 }
  0xa8   : > { %p5993_p3 = pnand %p5991_p8, %p5977_p1  ;;  %p5999_p12 = scmp.lt.s32.totalorder %s5997_s9, %s5990_s25 }
  0xaa   : > { %p5994_p5 = pneg %p5993_p3  ;;  %p6000_p13 = por %p5999_p12, %p5998_p7 }
  0xac   : > { %p6001_p0 = pnand %p6000_p13, %p5994_p5 }
  0xae   : > { %6004 = shalt.err (!%p6001_p0)
}
  0xaf   : > { %s7595_s27 = smov 64   ;;  %p7596_p1 = scmp.ne.s32.totalorder %s7584_s17, 0 }
  0xb0   : > { %5267 = dma.hbm_to_vmem [thread:$0]  (!%p6393_p10), %s6387_s15, 256, %s6389_s8, %s6397_s26, %s7595_s27, %s7595_s27, %s6109_s18  }
  0xb1   : > { %381 = sbr.rel (%p7596_p1) target bundleno = 2348 (0x92c), region = 56 }
  0xb8   : > { %s6431_s20 = sand.u32 1, %s6083_s10  }
  0xb9   : > { %s4728_s24 = sshll.u32 %s6431_s20, 4  ;;  %s384_s25 = scalar_lea.sflag [#allocation9], %s6431_s20 }
  0xba   : > { %s6435_s19 = scalar_lea.vmem [#allocation8], %s4728_s24 }
  0xbb   : > { %6058 = dma.done.wait (%p6362_p6), %s384_s25, 256  }
  0xbc   : > { %6060 = vsyncadd (%p6362_p6), %s384_s25, 4294967040  ;;  %p7597_p7 = scmp.ne.s32.totalorder %s7583_s16, 0 }
  0xbe   : > { %6062 = dma.done.wait (%p7597_p7), [#allocation12], 8192  }
  0xbf   : > { %6064 = vsyncadd (%p7597_p7), [#allocation12], 4294959104 }
  0xc0   : > { %6066 = dma.done.wait (%p7597_p7), [#allocation15], 8192  }
  0xc1   : > { %6068 = vsyncadd (%p7597_p7), [#allocation15], 4294959104 }
  0xc2   : > { %6070 = dma.done.wait (%p7597_p7), [#allocation18], 1024  }
  0xc3   : > { %6072 = vsyncadd (%p7597_p7), [#allocation18], 4294966272  ;;  %s4734_s17 = sshll.u32 %s6431_s20, 5  ;;  %p4735_p6 = scmp.ne.s32.totalorder %s6091_s12, 0 }
  0xc4   : > { %s6454_s26 = scalar_lea.vmem [#allocation19], %s4734_s17  ;;  %v6111_v0 = vmov (!%p4735_p6), 0.0  }
  0xc5   : > { %448 = sbr.rel (%p4735_p6) target bundleno = 204 (0xcc), region = 84  ;;  %449 = vst [vmem:[#allocation2] sm:$0xff] (!%p4735_p6), %v6111_v0  ;;  %450 = vst [vmem:[#allocation3] sm:$0xff] (!%p4735_p6), %v6111_v0 }
  0xc6   : > { %451 = vst [vmem:[#allocation4] sm:$0xff] (!%p4735_p6), %v6111_v0  ;;  %452 = vst [vmem:[#allocation5] sm:$0xff] (!%p4735_p6), %v6111_v0 }
  0xcc PF: > { %v5345_v1 = vld [vmem:[#allocation11 + $0x4] ss:$16 sps:$4 sm:$0xff]   ;;  %v5347_v2 = vld [vmem:[#allocation11 + $0xc] ss:$16 sps:$4 sm:$0xff]   ;;  %v7489_v3 = vmov 0   ;;  %s7679_s8 = sld [smem:[#allocation76_spill]] }
  0xcd   : > { %715 = vmatprep.mubr.bf16.mxu0 %v7489_v3  ;;  %768 = vmatprep.mubr.bf16.mxu1 %v7489_v3  ;;  %v5349_v4 = vld [vmem:[#allocation11] ss:$16 sps:$4 sm:$0xff]   ;;  %v5350_v5 = vld [vmem:[#allocation11 + $0x8] ss:$16 sps:$4 sm:$0xff]   ;;  %v5351_v6 = vld [vmem:[#allocation11 + $0x24] ss:$16 sps:$4 sm:$0xff]  }
  0xce   : > { %683 = vmatprep.subr.bf16.mxu0 %v5345_v1  ;;  %736 = vmatprep.subr.bf16.mxu1 %v5347_v2  ;;  %v5353_v7 = vld [vmem:[#allocation11 + $0x2c] ss:$16 sps:$4 sm:$0xff]   ;;  %v5355_v8 = vld [vmem:[#allocation11 + $0x20] ss:$16 sps:$4 sm:$0xff]   ;;  %v5356_v9 = vld [vmem:[#allocation11 + $0x28] ss:$16 sps:$4 sm:$0xff]  }
  0xcf   : > { %684 = vmatpush1.bf16.msra.mxu0 %v5349_v4  ;;  %737 = vmatpush1.bf16.msra.mxu1 %v5350_v5  ;;  %v5357_v10 = vld [vmem:[#allocation11 + $0x44] ss:$16 sps:$4 sm:$0xff]   ;;  %v5359_v11 = vld [vmem:[#allocation11 + $0x4c] ss:$16 sps:$4 sm:$0xff]   ;;  %v5361_v12 = vld [vmem:[#allocation11 + $0x40] ss:$16 sps:$4 sm:$0xff]  }
  0xd0   : > { %685 = vmatprep.subr.bf16.mxu0 %v5351_v6  ;;  %738 = vmatprep.subr.bf16.mxu1 %v5353_v7  ;;  %v5362_v13 = vld [vmem:[#allocation11 + $0x48] ss:$16 sps:$4 sm:$0xff]   ;;  %v5363_v14 = vld [vmem:[#allocation11 + $0x64] ss:$16 sps:$4 sm:$0xff]   ;;  %v5365_v15 = vld [vmem:[#allocation11 + $0x6c] ss:$16 sps:$4 sm:$0xff]  }
  0xd1   : > { %v5367_v16 = vld [vmem:[#allocation11 + $0x60] ss:$16 sps:$4 sm:$0xff]   ;;  %v5368_v17 = vld [vmem:[#allocation11 + $0x68] ss:$16 sps:$4 sm:$0xff]   ;;  %v5369_v18 = vld [vmem:[#allocation11 + $0x84] ss:$16 sps:$4 sm:$0xff]  }
  0xd2   : > { %v5371_v19 = vld [vmem:[#allocation11 + $0x8c] ss:$16 sps:$4 sm:$0xff]   ;;  %v5373_v20 = vld [vmem:[#allocation11 + $0x80] ss:$16 sps:$4 sm:$0xff]   ;;  %v5374_v21 = vld [vmem:[#allocation11 + $0x88] ss:$16 sps:$4 sm:$0xff]  }
  0xd3   : > { %686 = vmatpush1.bf16.msra.mxu0 %v5355_v8  ;;  %739 = vmatpush1.bf16.msra.mxu1 %v5356_v9  ;;  %v5375_v22 = vld [vmem:[#allocation11 + $0xa4] ss:$16 sps:$4 sm:$0xff]   ;;  %v5377_v23 = vld [vmem:[#allocation11 + $0xac] ss:$16 sps:$4 sm:$0xff]   ;;  %v5379_v24 = vld [vmem:[#allocation11 + $0xa0] ss:$16 sps:$4 sm:$0xff]  }
  0xd4   : > { %687 = vmatprep.subr.bf16.mxu0 %v5357_v10  ;;  %740 = vmatprep.subr.bf16.mxu1 %v5359_v11  ;;  %v5380_v25 = vld [vmem:[#allocation11 + $0xa8] ss:$16 sps:$4 sm:$0xff]   ;;  %v5381_v26 = vld [vmem:[#allocation11 + $0xc4] ss:$16 sps:$4 sm:$0xff]   ;;  %v5383_v27 = vld [vmem:[#allocation11 + $0xcc] ss:$16 sps:$4 sm:$0xff]  }
  0xd5   : > { %v5385_v28 = vld [vmem:[#allocation11 + $0xc0] ss:$16 sps:$4 sm:$0xff]   ;;  %v5386_v29 = vld [vmem:[#allocation11 + $0xc8] ss:$16 sps:$4 sm:$0xff]   ;;  %v5387_v30 = vld [vmem:[#allocation11 + $0xe4] ss:$16 sps:$4 sm:$0xff]  }
  0xd6   : > { %v5389_v31 = vld [vmem:[#allocation11 + $0xec] ss:$16 sps:$4 sm:$0xff]   ;;  %v5391_v32 = vld [vmem:[#allocation11 + $0xe0] ss:$16 sps:$4 sm:$0xff]   ;;  %v5392_v33 = vld [vmem:[#allocation11 + $0xe8] ss:$16 sps:$4 sm:$0xff]  }
  0xd7   : > { %688 = vmatpush1.bf16.msra.mxu0 %v5361_v12  ;;  %741 = vmatpush1.bf16.msra.mxu1 %v5362_v13  ;;  %v6459_v34 = vld [vmem:[#allocation13 + $0x4] ss:$16 sps:$4 sm:$0xff]   ;;  %v6461_v35 = vld [vmem:[#allocation13 + $0xc] ss:$16 sps:$4 sm:$0xff]   ;;  %v6464_v37 = vld [vmem:[#allocation13] ss:$16 sps:$4 sm:$0xff]  }
  0xd8   : > { %689 = vmatprep.subr.bf16.mxu0 %v5363_v14  ;;  %742 = vmatprep.subr.bf16.mxu1 %v5365_v15  ;;  %v5393_v36 = vld [vmem:[%s6435_s19] sm:$0xff]   ;;  %v6466_v38 = vld [vmem:[#allocation13 + $0x8] ss:$16 sps:$4 sm:$0xff]   ;;  %v6472_v40 = vld [vmem:[#allocation13 + $0x2c] ss:$16 sps:$4 sm:$0xff]   ;;  %s7794_s9 = sld [smem:[#allocation77_spill]] }
  0xd9   : > { %v6468_v39 = vld [vmem:[#allocation13 + $0x24] ss:$16 sps:$4 sm:$0xff]   ;;  %v6474_v41 = vld [vmem:[#allocation13 + $0x20] ss:$16 sps:$4 sm:$0xff]   ;;  %v6478_v42 = vld [vmem:[#allocation13 + $0x28] ss:$16 sps:$4 sm:$0xff]  }
  0xda   : > { %v6480_v43 = vld [vmem:[#allocation13 + $0x44] ss:$16 sps:$4 sm:$0xff]   ;;  %v6484_v44 = vld [vmem:[#allocation13 + $0x4c] ss:$16 sps:$4 sm:$0xff]   ;;  %v6491_v46 = vld [vmem:[#allocation13 + $0x40] ss:$16 sps:$4 sm:$0xff]  }
  0xdb   : > { %690 = vmatpush1.bf16.msra.mxu0 %v5367_v16  ;;  %743 = vmatpush1.bf16.msra.mxu1 %v5368_v17  ;;  %v5430_v45 = vld [vmem:[%s6435_s19 + $0x8] sm:$0xff]   ;;  %v6497_v48 = vld [vmem:[#allocation13 + $0x64] ss:$16 sps:$4 sm:$0xff]   ;;  %v6503_v50 = vld [vmem:[#allocation13 + $0x60] ss:$16 sps:$4 sm:$0xff]   ;;  %s5193_s27 = sshll.u32 %s6091_s12, 9 }
  0xdc   : > { %691 = vmatprep.subr.bf16.mxu0 %v5369_v18  ;;  %744 = vmatprep.subr.bf16.mxu1 %v5371_v19  ;;  %v6493_v47 = vld [vmem:[#allocation13 + $0x48] ss:$16 sps:$4 sm:$0xff]   ;;  %v6499_v49 = vld [vmem:[#allocation13 + $0x6c] ss:$16 sps:$4 sm:$0xff]   ;;  %v6507_v52 = vld [vmem:[#allocation13 + $0x84] ss:$16 sps:$4 sm:$0xff]  }
  0xdd   : > { %v6505_v51 = vld [vmem:[#allocation13 + $0x68] ss:$16 sps:$4 sm:$0xff]   ;;  %v6511_v53 = vld [vmem:[#allocation13 + $0x8c] ss:$16 sps:$4 sm:$0xff]   ;;  %v6513_v54 = vld [vmem:[#allocation13 + $0x80] ss:$16 sps:$4 sm:$0xff]  }
  0xde   : > { %v6515_v55 = vld [vmem:[#allocation13 + $0x88] ss:$16 sps:$4 sm:$0xff]   ;;  %v6519_v56 = vld [vmem:[#allocation13 + $0xa4] ss:$16 sps:$4 sm:$0xff]   ;;  %v6521_v57 = vld [vmem:[#allocation13 + $0xac] ss:$16 sps:$4 sm:$0xff]  }
  0xdf   : > { %692 = vmatpush1.bf16.msra.mxu0 %v5373_v20  ;;  %745 = vmatpush1.bf16.msra.mxu1 %v5374_v21  ;;  %v6527_v58 = vld [vmem:[#allocation13 + $0xa0] ss:$16 sps:$4 sm:$0xff]   ;;  %v6529_v59 = vld [vmem:[#allocation13 + $0xa8] ss:$16 sps:$4 sm:$0xff]   ;;  %v6531_v60 = vld [vmem:[#allocation13 + $0xc4] ss:$16 sps:$4 sm:$0xff]  }
  0xe0   : > { %693 = vmatprep.subr.bf16.mxu0 %v5375_v22  ;;  %746 = vmatprep.subr.bf16.mxu1 %v5377_v23  ;;  %v6533_v61 = vld [vmem:[#allocation13 + $0xcc] ss:$16 sps:$4 sm:$0xff]   ;;  %v6539_v62 = vld [vmem:[#allocation13 + $0xc0] ss:$16 sps:$4 sm:$0xff]   ;;  %v6541_v63 = vld [vmem:[#allocation13 + $0xc8] ss:$16 sps:$4 sm:$0xff]  }
  0xe1   : > { %v6543_v0 = vld [vmem:[#allocation13 + $0xe4] ss:$16 sps:$4 sm:$0xff]   ;;  %v6545_v1 = vld [vmem:[#allocation13 + $0xec] ss:$16 sps:$4 sm:$0xff]   ;;  %v6551_v2 = vld [vmem:[#allocation13 + $0xe0] ss:$16 sps:$4 sm:$0xff]  }
  0xe2   : > { %v6553_v4 = vld [vmem:[#allocation13 + $0xe8] ss:$16 sps:$4 sm:$0xff]   ;;  %v827_v5 = vld [vmem:[#allocation2] sm:$0xff]  ;;  %v6565_v8 = vld [vmem:[#allocation14 + $0xc] ss:$16 sps:$4 sm:$0xff]   ;;  %s4577_s24 = sshll.u32 %s6454_s26, 4  ;;  %s7422_s24 = int_to_ptr.vmem [resolvable:$true] %s4577_s24 }
  0xe3   : > { %694 = vmatpush1.bf16.msra.mxu0 %v5379_v24  ;;  %747 = vmatpush1.bf16.msra.mxu1 %v5380_v25  ;;  %v871_v6 = vpack.c.bf16 %v827_v5, %v827_v5  ;;  %v6563_v7 = vld [vmem:[#allocation14 + $0x4] ss:$16 sps:$4 sm:$0xff]   ;;  %v6567_v9 = vld [vmem:[#allocation14] ss:$16 sps:$4 sm:$0xff]   ;;  %v6569_v10 = vld [vmem:[#allocation14 + $0x8] ss:$16 sps:$4 sm:$0xff]  }
  0xe4   : > { %695 = vmatprep.subr.bf16.mxu0 %v5381_v26  ;;  %748 = vmatprep.subr.bf16.mxu1 %v5383_v27  ;;  %v6575_v11 = vld [vmem:[#allocation14 + $0x24] ss:$16 sps:$4 sm:$0xff]   ;;  %v6577_v12 = vld [vmem:[#allocation14 + $0x2c] ss:$16 sps:$4 sm:$0xff]   ;;  %v6579_v13 = vld [vmem:[#allocation14 + $0x20] ss:$16 sps:$4 sm:$0xff]  }
  0xe5   : > { %7598 = vst [vmem:[#allocation25_spill] sm:$0xff] %v6575_v11  ;;  %7599 = vst [vmem:[#allocation26_spill] sm:$0xff] %v6577_v12  ;;  %v6581_v14 = vld [vmem:[#allocation14 + $0x28] ss:$16 sps:$4 sm:$0xff]   ;;  %v6587_v15 = vld [vmem:[#allocation14 + $0x44] ss:$16 sps:$4 sm:$0xff]  }
  0xe6   : > { %7600 = vst [vmem:[#allocation27_spill] sm:$0xff] %v6579_v13  ;;  %7601 = vst [vmem:[#allocation28_spill] sm:$0xff] %v6581_v14  ;;  %v6589_v16 = vld [vmem:[#allocation14 + $0x4c] ss:$16 sps:$4 sm:$0xff]   ;;  %v6591_v17 = vld [vmem:[#allocation14 + $0x40] ss:$16 sps:$4 sm:$0xff]  }
  0xe7   : > { %696 = vmatpush1.bf16.msra.mxu0 %v5385_v28  ;;  %749 = vmatpush1.bf16.msra.mxu1 %v5386_v29  ;;  %7602 = vst [vmem:[#allocation29_spill] sm:$0xff] %v6587_v15  ;;  %7603 = vst [vmem:[#allocation30_spill] sm:$0xff] %v6589_v16  ;;  %v6593_v18 = vld [vmem:[#allocation14 + $0x48] ss:$16 sps:$4 sm:$0xff]   ;;  %v6599_v19 = vld [vmem:[#allocation14 + $0x64] ss:$16 sps:$4 sm:$0xff]  }
  0xe8   : > { %697 = vmatprep.subr.bf16.mxu0 %v5387_v30  ;;  %750 = vmatprep.subr.bf16.mxu1 %v5389_v31  ;;  %7604 = vst [vmem:[#allocation31_spill] sm:$0xff] %v6591_v17  ;;  %7605 = vst [vmem:[#allocation32_spill] sm:$0xff] %v6593_v18  ;;  %v6601_v20 = vld [vmem:[#allocation14 + $0x6c] ss:$16 sps:$4 sm:$0xff]   ;;  %v6603_v21 = vld [vmem:[#allocation14 + $0x60] ss:$16 sps:$4 sm:$0xff]  }
  0xe9   : > { %7606 = vst [vmem:[#allocation33_spill] sm:$0xff] %v6599_v19  ;;  %7607 = vst [vmem:[#allocation34_spill] sm:$0xff] %v6601_v20  ;;  %v6605_v22 = vld [vmem:[#allocation14 + $0x68] ss:$16 sps:$4 sm:$0xff]   ;;  %v6611_v23 = vld [vmem:[#allocation14 + $0x84] ss:$16 sps:$4 sm:$0xff]  }
  0xea   : > { %7608 = vst [vmem:[#allocation35_spill] sm:$0xff] %v6603_v21  ;;  %7609 = vst [vmem:[#allocation36_spill] sm:$0xff] %v6605_v22  ;;  %v6613_v24 = vld [vmem:[#allocation14 + $0x8c] ss:$16 sps:$4 sm:$0xff]   ;;  %v6615_v25 = vld [vmem:[#allocation14 + $0x80] ss:$16 sps:$4 sm:$0xff]  }
  0xeb   : > { %698 = vmatpush1.bf16.msra.mxu0 %v5391_v32  ;;  %751 = vmatpush1.bf16.msra.mxu1 %v5392_v33  ;;  %7610 = vst [vmem:[#allocation37_spill] sm:$0xff] %v6611_v23  ;;  %7611 = vst [vmem:[#allocation38_spill] sm:$0xff] %v6613_v24  ;;  %v6617_v26 = vld [vmem:[#allocation14 + $0x88] ss:$16 sps:$4 sm:$0xff]   ;;  %v6621_v27 = vld [vmem:[#allocation14 + $0xa4] ss:$16 sps:$4 sm:$0xff]  }
  0xec   : > { %1064 = vmatprep.subr.bf16.mxu0 %v6459_v34  ;;  %1105 = vmatprep.subr.bf16.mxu1 %v6461_v35  ;;  %7612 = vst [vmem:[#allocation39_spill] sm:$0xff] %v6615_v25  ;;  %7613 = vst [vmem:[#allocation40_spill] sm:$0xff] %v6617_v26  ;;  %v6623_v28 = vld [vmem:[#allocation14 + $0xac] ss:$16 sps:$4 sm:$0xff]   ;;  %v6627_v29 = vld [vmem:[#allocation14 + $0xa0] ss:$16 sps:$4 sm:$0xff]  }
  0xed   : > { %7614 = vst [vmem:[#allocation41_spill] sm:$0xff] %v6621_v27  ;;  %7615 = vst [vmem:[#allocation42_spill] sm:$0xff] %v6623_v28  ;;  %v6629_v30 = vld [vmem:[#allocation14 + $0xa8] ss:$16 sps:$4 sm:$0xff]   ;;  %v6633_v31 = vld [vmem:[#allocation14 + $0xc4] ss:$16 sps:$4 sm:$0xff]  }
  0xee   : > { %716 = vmatmul.mubr.bf16.vlgmr.msra.gmra.mrb[0].mxu0 %v5393_v36  ;;  %769 = vmatmul.mubr.bf16.vlgmr.msra.gmra.mrb[0].mxu1 %v5393_v36  ;;  %7616 = vst [vmem:[#allocation43_spill] sm:$0xff] %v6627_v29  ;;  %7617 = vst [vmem:[#allocation44_spill] sm:$0xff] %v6629_v30  ;;  %v6635_v32 = vld [vmem:[#allocation14 + $0xcc] ss:$16 sps:$4 sm:$0xff]   ;;  %v6639_v33 = vld [vmem:[#allocation14 + $0xc0] ss:$16 sps:$4 sm:$0xff]  }
  0xef   : > { %1065 = vmatpush1.bf16.msra.mxu0 %v6464_v37  ;;  %1106 = vmatpush1.bf16.msra.mxu1 %v6466_v38  ;;  %7618 = vst [vmem:[#allocation45_spill] sm:$0xff] %v6633_v31  ;;  %7619 = vst [vmem:[#allocation46_spill] sm:$0xff] %v6635_v32  ;;  %v6641_v36 = vld [vmem:[#allocation14 + $0xc8] ss:$16 sps:$4 sm:$0xff]   ;;  %v6647_v5 = vld [vmem:[#allocation14 + $0xec] ss:$16 sps:$4 sm:$0xff]  }
  0xf0   : > { %1066 = vmatprep.subr.bf16.mxu0 %v6468_v39  ;;  %1107 = vmatprep.subr.bf16.mxu1 %v6472_v40  ;;  %7620 = vst [vmem:[#allocation47_spill] sm:$0xff] %v6639_v33  ;;  %7621 = vst [vmem:[#allocation48_spill] sm:$0xff] %v6641_v36  ;;  %s7795_s17 = sld [smem:[#allocation78_spill]]  ;;  %s4562_s18 = scalar_lea.sflag [#allocation10], %s6431_s20 }
  0xf1   : > { %725 = vmatprep.mubr.bf16.mxu0 %v7489_v3  ;;  %778 = vmatprep.mubr.bf16.mxu1 %v7489_v3  ;;  %7623 = vst [vmem:[#allocation50_spill] sm:$0xff] %v6647_v5  ;;  %s6005_s12 = scalar_lea.vmem %s7422_s24, 512  ;;  %p7796_p10 = scmp.ne.s32.totalorder %s7592_s29, 0 }
  0xf2   : > { %p6006_p5 = scmp.ne.s32.totalorder %s7422_s24, %s6005_s12  ;;  %s6113_s28 = smov [#allocation19]  }
  0xf3   : > { %1067 = vmatpush1.bf16.msra.mxu0 %v6474_v41  ;;  %1108 = vmatpush1.bf16.msra.mxu1 %v6478_v42  ;;  %s6009_s15 = sshll.u32 %s6113_s28, 4  ;;  %s6010_s15 = int_to_ptr.vmem [resolvable:$false] %s6009_s15 }
  0xf4   : > { %1068 = vmatprep.subr.bf16.mxu0 %v6480_v43  ;;  %1109 = vmatprep.subr.bf16.mxu1 %v6484_v44  ;;  %p6007_p11 = pnand %p6006_p5, %p7796_p10  ;;  %p6012_p4 = scmp.lt.s32.totalorder %s7422_s24, %s6010_s15 }
  0xf6   : > { %726 = vmatmul.mubr.bf16.gmra.mrb[4].mxu0 %v5430_v45  ;;  %779 = vmatmul.mubr.bf16.gmra.mrb[4].mxu1 %v5430_v45  ;;  %v6645_v45 = vld [vmem:[#allocation14 + $0xe4] ss:$16 sps:$4 sm:$0xff]   ;;  %s7420_s16 = scalar_lea.hbm %s7795_s17, %s5193_s27  ;;  %p6008_p2 = pneg %p6007_p11 }
  0xf7   : > { %1069 = vmatpush1.bf16.msra.mxu0 %v6491_v46  ;;  %1110 = vmatpush1.bf16.msra.mxu1 %v6493_v47  ;;  %7622 = vst [vmem:[#allocation49_spill] sm:$0xff] %v6645_v45 }
  0xf8   : > { %1070 = vmatprep.subr.bf16.mxu0 %v6497_v48  ;;  %1111 = vmatprep.subr.bf16.mxu1 %v6499_v49 }
  0xf9   : > { %1096 = vmatprep.mubr.bf16.mxu0 %v7489_v3  ;;  %1137 = vmatprep.mubr.bf16.mxu1 %v7489_v3 }
  0xfb   : > { %1071 = vmatpush1.bf16.msra.mxu0 %v6503_v50  ;;  %1112 = vmatpush1.bf16.msra.mxu1 %v6505_v51 }
  0xfc   : > { %1072 = vmatprep.subr.bf16.mxu0 %v6507_v52  ;;  %1113 = vmatprep.subr.bf16.mxu1 %v6511_v53 }
  0xff   : > { %1073 = vmatpush1.bf16.msra.mxu0 %v6513_v54  ;;  %1114 = vmatpush1.bf16.msra.mxu1 %v6515_v55 }
 0x100   : > { %1074 = vmatprep.subr.bf16.mxu0 %v6519_v56  ;;  %1115 = vmatprep.subr.bf16.mxu1 %v6521_v57 }
 0x103   : > { %1075 = vmatpush1.bf16.msra.mxu0 %v6527_v58  ;;  %1116 = vmatpush1.bf16.msra.mxu1 %v6529_v59 }
 0x104   : > { %1076 = vmatprep.subr.bf16.mxu0 %v6531_v60  ;;  %1117 = vmatprep.subr.bf16.mxu1 %v6533_v61 }
 0x107   : > { %1077 = vmatpush1.bf16.msra.mxu0 %v6539_v62  ;;  %1118 = vmatpush1.bf16.msra.mxu1 %v6541_v63 }
 0x108   : > { %1078 = vmatprep.subr.bf16.mxu0 %v6543_v0  ;;  %1119 = vmatprep.subr.bf16.mxu1 %v6545_v1 }
 0x10b   : > { %1079 = vmatpush1.bf16.msra.mxu0 %v6551_v2  ;;  %1120 = vmatpush1.bf16.msra.mxu1 %v6553_v4 }
 0x10c   : > { %1367 = vmatprep.subr.bf16.mxu0 %v6563_v7  ;;  %1408 = vmatprep.subr.bf16.mxu1 %v6565_v8 }
 0x10e   : > { %1097 = vmatmul.mubr.bf16.vlgmr.msra.gmra.mrb[8].mxu0 %v871_v6  ;;  %1138 = vmatmul.mubr.bf16.vlgmr.msra.gmra.mrb[8].mxu1 %v871_v6  ;;  %v6651_v6 = vld [vmem:[#allocation14 + $0xe0] ss:$16 sps:$4 sm:$0xff]  }
 0x10f   : > { %1399 = vmatprep.mubr.bf16.mxu0 %v7489_v3  ;;  %1440 = vmatprep.mubr.bf16.mxu1 %v7489_v3  ;;  %7624 = vst [vmem:[#allocation51_spill] sm:$0xff] %v6651_v6  ;;  %v6653_v3 = vld [vmem:[#allocation14 + $0xe8] ss:$16 sps:$4 sm:$0xff]  }
 0x110   : > { %1368 = vmatpush1.bf16.msra.mxu0 %v6567_v9  ;;  %1409 = vmatpush1.bf16.msra.mxu1 %v6569_v10  ;;  %7625 = vst [vmem:[#allocation52_spill] sm:$0xff] %v6653_v3 }
 0x111   : > { %1369 = vmatprep.subr.bf16.mxu0 %v6575_v11  ;;  %1410 = vmatprep.subr.bf16.mxu1 %v6577_v12 }
 0x114   : > { %1370 = vmatpush1.bf16.msra.mxu0 %v6579_v13  ;;  %1411 = vmatpush1.bf16.msra.mxu1 %v6581_v14 }
 0x115   : > { %1371 = vmatprep.subr.bf16.mxu0 %v6587_v15  ;;  %1412 = vmatprep.subr.bf16.mxu1 %v6589_v16 }
 0x118   : > { %1372 = vmatpush1.bf16.msra.mxu0 %v6591_v17  ;;  %1413 = vmatpush1.bf16.msra.mxu1 %v6593_v18 }
 0x119   : > { %1373 = vmatprep.subr.bf16.mxu0 %v6599_v19  ;;  %1414 = vmatprep.subr.bf16.mxu1 %v6601_v20 }
 0x11c   : > { %1374 = vmatpush1.bf16.msra.mxu0 %v6603_v21  ;;  %1415 = vmatpush1.bf16.msra.mxu1 %v6605_v22 }
 0x11d   : > { %1375 = vmatprep.subr.bf16.mxu0 %v6611_v23  ;;  %1416 = vmatprep.subr.bf16.mxu1 %v6613_v24 }
 0x120   : > { %1376 = vmatpush1.bf16.msra.mxu0 %v6615_v25  ;;  %1417 = vmatpush1.bf16.msra.mxu1 %v6617_v26 }
 0x121   : > { %1377 = vmatprep.subr.bf16.mxu0 %v6621_v27  ;;  %1418 = vmatprep.subr.bf16.mxu1 %v6623_v28 }
 0x124   : > { %1378 = vmatpush1.bf16.msra.mxu0 %v6627_v29  ;;  %1419 = vmatpush1.bf16.msra.mxu1 %v6629_v30  ;;  %v6657_v30 = vld [vmem:[#allocation16 + $0x4] ss:$16 sps:$4 sm:$0xff]  }
 0x125   : > { %1379 = vmatprep.subr.bf16.mxu0 %v6633_v31  ;;  %1420 = vmatprep.subr.bf16.mxu1 %v6635_v32  ;;  %7626 = vst [vmem:[#allocation53_spill] sm:$0xff] %v6657_v30  ;;  %v6659_v31 = vld [vmem:[#allocation16 + $0xc] ss:$16 sps:$4 sm:$0xff]  }
 0x126   : > { %7627 = vst [vmem:[#allocation54_spill] sm:$0xff] %v6659_v31 }
 0x128   : > { %1380 = vmatpush1.bf16.msra.mxu0 %v6639_v33  ;;  %1421 = vmatpush1.bf16.msra.mxu1 %v6641_v36  ;;  %v491_v36 = vlaneseq }
 0x129   : > { %1381 = vmatprep.subr.bf16.mxu0 %v6645_v45  ;;  %1422 = vmatprep.subr.bf16.mxu1 %v6647_v5  ;;  %v489_v5 = vld [vmem:[%s7475_s3] sm:$0xf] }
 0x12a   : > { %v6665_v33 = vshrl.u32 %v491_v36, 7 }
 0x12c   : > { %1382 = vmatpush1.bf16.msra.mxu0 %v6651_v6  ;;  %1423 = vmatpush1.bf16.msra.mxu1 %v6653_v3  ;;  %7628 = vst [vmem:[#allocation55_spill] sm:$0xff] %v6665_v33  ;;  %v7512_v32 = vsub.s32 0, %v6665_v33  ;;  %v7514_v45 = vsub.s32 2, %v6665_v33  ;;  %v7517_v29 = vsub.s32 3, %v6665_v33  ;;  %v7520_v6 = vsub.s32 1, %v6665_v33 }
 0x12d   : > { %1609 = vmatprep.subr.bf16.mxu0 %v6657_v30  ;;  %1650 = vmatprep.subr.bf16.mxu1 %v6659_v31 }
 0x12e   : > { %v494_v30 = vrot.slane %v489_v5, %v7512_v32  ;;  %v502_v31 = vrot.slane %v489_v5, %v7514_v45  ;;  %v506_v28 = vrot.slane %v489_v5, %v7517_v29  ;;  %v498_v25 = vrot.slane %v489_v5, %v7520_v6 }
 0x1c1   : > { %v717_v36 = vpop.f32.mrb[0].mxu0  ;;  %v770_v3 = vpop.f32.mrb[0].mxu1 }
 0x1c2   : > { %v719_v27 = vpop.f32.mrb[1].mxu0  ;;  %v772_v26 = vpop.f32.mrb[1].mxu1 }
 0x1c3   : > { %v721_v24 = vpop.f32.mrb[2].mxu0  ;;  %v774_v23 = vpop.f32.mrb[2].mxu1  ;;  %v773_v33 = vadd.f32 %v772_v26, %v506_v28 }
 0x1c4   : > { %v6682_v22 = vadd.f32 %v721_v24, %v494_v30  ;;  %v723_v21 = vpop.f32.mrb[3].mxu0  ;;  %v6684_v20 = vadd.f32 %v774_v23, %v502_v31  ;;  %v776_v32 = vpop.f32.mrb[3].mxu1 }
 0x1c5   : > { %v6686_v19 = vadd.f32 %v723_v21, %v498_v25  ;;  %v6688_v45 = vadd.f32 %v776_v32, %v506_v28 }
 0x1c6   : > { %7629 = vst [vmem:[#allocation56_spill] sm:$0xff] %v6682_v22  ;;  %7630 = vst [vmem:[#allocation57_spill] sm:$0xff] %v6684_v20 }
 0x1c7   : > { %7631 = vst [vmem:[#allocation58_spill] sm:$0xff] %v6686_v19  ;;  %7632 = vst [vmem:[#allocation59_spill] sm:$0xff] %v6688_v45 }
 0x1c9   : > { %v727_v18 = vpop.f32.mrb[4].mxu0  ;;  %v780_v17 = vpop.f32.mrb[4].mxu1 }
 0x1ca   : > { %v6690_v29 = vadd.f32 %v727_v18, %v494_v30  ;;  %v729_v16 = vpop.f32.mrb[5].mxu0  ;;  %v6692_v15 = vadd.f32 %v780_v17, %v502_v31  ;;  %v782_v5 = vpop.f32.mrb[5].mxu1  ;;  %v771_v17 = vadd.f32 %v770_v3, %v502_v31 }
 0x1cb   : > { %v6694_v6 = vadd.f32 %v729_v16, %v498_v25  ;;  %v731_v24 = vpop.f32.mrb[6].mxu0  ;;  %v6696_v22 = vadd.f32 %v782_v5, %v506_v28  ;;  %v784_v23 = vpop.f32.mrb[6].mxu1 }
 0x1cc   : > { %7633 = vst [vmem:[#allocation60_spill] sm:$0xff] %v6690_v29  ;;  %7634 = vst [vmem:[#allocation61_spill] sm:$0xff] %v6692_v15  ;;  %v6698_v20 = vadd.f32 %v731_v24, %v494_v30  ;;  %v733_v21 = vpop.f32.mrb[7].mxu0  ;;  %v6700_v19 = vadd.f32 %v784_v23, %v502_v31  ;;  %v786_v32 = vpop.f32.mrb[7].mxu1  ;;  %v718_v29 = vadd.f32 %v717_v36, %v494_v30 }
 0x1cd   : > { %7635 = vst [vmem:[#allocation62_spill] sm:$0xff] %v6694_v6  ;;  %7636 = vst [vmem:[#allocation63_spill] sm:$0xff] %v6696_v22  ;;  %v6702_v45 = vadd.f32 %v733_v21, %v498_v25  ;;  %v6704_v18 = vadd.f32 %v786_v32, %v506_v28  ;;  %v720_v15 = vadd.f32 %v719_v27, %v498_v25  ;;  %v6715_v32 = vld [vmem:[#allocation16 + $0x24] ss:$16 sps:$4 sm:$0xff]  }
 0x1ce   : > { %7637 = vst [vmem:[#allocation64_spill] sm:$0xff] %v6698_v20  ;;  %7638 = vst [vmem:[#allocation65_spill] sm:$0xff] %v6700_v19 }
 0x1cf   : > { %7639 = vst [vmem:[#allocation66_spill] sm:$0xff] %v6702_v45  ;;  %7640 = vst [vmem:[#allocation67_spill] sm:$0xff] %v6704_v18  ;;  %v6785_v18 = vld [vmem:[#allocation16 + $0xc0] ss:$16 sps:$4 sm:$0xff]  }
 0x1e1   : > { %v1098_v16 = vpop.f32.mrb[8].mxu0  ;;  %v1139_v6 = vpop.f32.mrb[8].mxu1 }
 0x1e2   : > { %v1146_v14 = vadd.f32 %v1098_v16, %v718_v29  ;;  %v1148_v5 = vadd.f32 %v1139_v6, %v771_v17  ;;  %v1100_v22 = vpop.f32.mrb[9].mxu0  ;;  %v1141_v13 = vpop.f32.mrb[9].mxu1  ;;  %v6711_v6 = vld [vmem:[#allocation16 + $0x8] ss:$16 sps:$4 sm:$0xff]   ;;  %v6717_v17 = vld [vmem:[#allocation16 + $0x2c] ss:$16 sps:$4 sm:$0xff]  }
 0x1e3   : > { %v1147_v24 = vadd.f32 %v1100_v22, %v720_v15  ;;  %v1149_v20 = vadd.f32 %v1141_v13, %v773_v33  ;;  %v1102_v12 = vpop.f32.mrb[10].mxu0  ;;  %v1143_v23 = vpop.f32.mrb[10].mxu1  ;;  %v828_v13 = vld [vmem:[#allocation3] sm:$0xff]  ;;  %v6723_v16 = vld [vmem:[#allocation16 + $0x20] ss:$16 sps:$4 sm:$0xff]  }
 0x1e4   : > { %v4802_v19 = vmul.f32 -1.442695, %v1146_v14  ;;  %v1103_v11 = vpop.f32.mrb[11].mxu0  ;;  %v1144_v21 = vpop.f32.mrb[11].mxu1  ;;  %v6731_v23 = vld [vmem:[#allocation16 + $0x4c] ss:$16 sps:$4 sm:$0xff]  }
 0x1e5   : > { %v4803_v45 = vmul.f32 -1.442695, %v1147_v24  ;;  %v4804_v30 = vmul.f32 -1.442695, %v1149_v20  ;;  %v6729_v24 = vld [vmem:[#allocation16 + $0x44] ss:$16 sps:$4 sm:$0xff]  }
 0x1e6   : > { %5691 = vpow2.f32 %v4802_v19  ;;  %v7641_v21 = vmov 0  }
 0x1e7   : > { %5693 = vpow2.f32 %v4803_v45  ;;  %v6709_v45 = vld [vmem:[#allocation16] ss:$16 sps:$4 sm:$0xff]  }
 0x1e8   : > { %5695 = vpow2.f32 %v4804_v30  ;;  %v6737_v30 = vld [vmem:[#allocation16 + $0x40] ss:$16 sps:$4 sm:$0xff]  }
 0x1e9   : > { %5697 = vtanh.f32 %v1148_v5  ;;  %v6725_v5 = vld [vmem:[#allocation16 + $0x28] ss:$16 sps:$4 sm:$0xff]  }
 0x1f0   : > { %v5692_v3 = vpop.eup %5691 }
 0x1f1   : > { %v5694_v25 = vpop.eup %5693  ;;  %v1153_v26 = vadd.f32 1.0, %v5692_v3  ;;  %v6739_v3 = vld [vmem:[#allocation16 + $0x48] ss:$16 sps:$4 sm:$0xff]  }
 0x1f2   : > { %v1159_v27 = vadd.f32 1.0, %v5694_v25  ;;  %v5696_v28 = vpop.eup %5695  ;;  %v6743_v25 = vld [vmem:[#allocation16 + $0x64] ss:$16 sps:$4 sm:$0xff]  }
 0x1f3   : > { %5699 = vrcp.f32 %v1153_v26  ;;  %v5698_v15 = vpop.eup %5697  ;;  %v1166_v11 = vadd.f32 1.0, %v5696_v28  ;;  %v6745_v26 = vld [vmem:[#allocation16 + $0x6c] ss:$16 sps:$4 sm:$0xff]   ;;  %v6751_v28 = vld [vmem:[#allocation16 + $0x68] ss:$16 sps:$4 sm:$0xff]  }
 0x1f4   : > { %5701 = vrcp.f32 %v1159_v27  ;;  %v6749_v27 = vld [vmem:[#allocation16 + $0x60] ss:$16 sps:$4 sm:$0xff]  }
 0x1f5   : > { %5703 = vrcp.f32 %v1166_v11  ;;  %v6769_v11 = vld [vmem:[#allocation16 + $0xac] ss:$16 sps:$4 sm:$0xff]  }
 0x1f6   : > { %7645 = vst [vmem:[#allocation71_spill] sm:$0xff] %v6769_v11 }
 0x1fd   : > { %v5700_v12 = vpop.eup %5699 }
 0x1fe   : > { %v5702_v22 = vpop.eup %5701  ;;  %v1170_v14 = vmul.f32 %v5700_v12, %v5698_v15  ;;  %v6755_v15 = vld [vmem:[#allocation16 + $0x84] ss:$16 sps:$4 sm:$0xff]   ;;  %v6761_v12 = vld [vmem:[#allocation16 + $0x80] ss:$16 sps:$4 sm:$0xff]  }
 0x1ff   : > { %v1169_v29 = vmul.f32 %v5702_v22, %v828_v13  ;;  %v5704_v19 = vpop.eup %5703  ;;  %v6757_v13 = vld [vmem:[#allocation16 + $0x8c] ss:$16 sps:$4 sm:$0xff]   ;;  %7642 = vst [vmem:[#allocation68_spill] sm:$0xff] %v6761_v12  ;;  %v6763_v22 = vld [vmem:[#allocation16 + $0x88] ss:$16 sps:$4 sm:$0xff]  }
 0x200   : > { %7643 = vst [vmem:[#allocation69_spill] sm:$0xff] %v6763_v22 }
 0x201   : > { %v6706_v31 = vadd.f32 %v1170_v14, %v1169_v29  ;;  %v6767_v14 = vld [vmem:[#allocation16 + $0xa4] ss:$16 sps:$4 sm:$0xff]   ;;  %v6773_v29 = vld [vmem:[#allocation16 + $0xa0] ss:$16 sps:$4 sm:$0xff]  }
 0x202   : > { %7644 = vst [vmem:[#allocation70_spill] sm:$0xff] %v6767_v14  ;;  %7646 = vst [vmem:[#allocation72_spill] sm:$0xff] %v6773_v29 }
 0x203   : > { %5705 = vtanh.f32 %v6706_v31 }
 0x20d   : > { %v5706_v20 = vpop.eup %5705 }
 0x20e   : > { %v1173_v33 = vmul.f32 %v5706_v20, %v5704_v19  ;;  %v6775_v19 = vld [vmem:[#allocation16 + $0xa8] ss:$16 sps:$4 sm:$0xff]   ;;  %v6779_v20 = vld [vmem:[#allocation16 + $0xc4] ss:$16 sps:$4 sm:$0xff]  }
 0x20f   : > { %7647 = vst [vmem:[#allocation73_spill] sm:$0xff] %v6775_v19  ;;  %7648 = vst [vmem:[#allocation74_spill] sm:$0xff] %v6779_v20 }
 0x210   : > { %v6713_v36 = vpack.c.bf16 %v1173_v33, %v1173_v33  ;;  %v6781_v33 = vld [vmem:[#allocation16 + $0xcc] ss:$16 sps:$4 sm:$0xff]  }
 0x212   : > { %1400 = vmatmul.mubr.bf16.vlgmr.msra.gmra.mrb[12].mxu0 %v6713_v36  ;;  %1441 = vmatmul.mubr.bf16.vlgmr.msra.gmra.mrb[12].mxu1 %v6713_v36 }
 0x213   : > { %1610 = vmatpush1.bf16.msra.mxu0 %v6709_v45  ;;  %1651 = vmatpush1.bf16.msra.mxu1 %v6711_v6 }
 0x214   : > { %1611 = vmatprep.subr.bf16.mxu0 %v6715_v32  ;;  %1652 = vmatprep.subr.bf16.mxu1 %v6717_v17 }
 0x215   : > { %1641 = vmatprep.mubr.bf16.mxu0 %v7641_v21  ;;  %1682 = vmatprep.mubr.bf16.mxu1 %v7641_v21 }
 0x217   : > { %1612 = vmatpush1.bf16.msra.mxu0 %v6723_v16  ;;  %1653 = vmatpush1.bf16.msra.mxu1 %v6725_v5 }
 0x218   : > { %1613 = vmatprep.subr.bf16.mxu0 %v6729_v24  ;;  %1654 = vmatprep.subr.bf16.mxu1 %v6731_v23 }
 0x21b   : > { %1614 = vmatpush1.bf16.msra.mxu0 %v6737_v30  ;;  %1655 = vmatpush1.bf16.msra.mxu1 %v6739_v3 }
 0x21c   : > { %1615 = vmatprep.subr.bf16.mxu0 %v6743_v25  ;;  %1656 = vmatprep.subr.bf16.mxu1 %v6745_v26 }
 0x21f   : > { %1616 = vmatpush1.bf16.msra.mxu0 %v6749_v27  ;;  %1657 = vmatpush1.bf16.msra.mxu1 %v6751_v28 }
 0x220   : > { %1617 = vmatprep.subr.bf16.mxu0 %v6755_v15  ;;  %1658 = vmatprep.subr.bf16.mxu1 %v6757_v13 }
 0x223   : > { %1618 = vmatpush1.bf16.msra.mxu0 %v6761_v12  ;;  %1659 = vmatpush1.bf16.msra.mxu1 %v6763_v22  ;;  %v6787_v12 = vld [vmem:[#allocation16 + $0xc8] ss:$16 sps:$4 sm:$0xff]   ;;  %v6791_v22 = vld [vmem:[#allocation16 + $0xe4] ss:$16 sps:$4 sm:$0xff]  }
 0x224   : > { %1619 = vmatprep.subr.bf16.mxu0 %v6767_v14  ;;  %1660 = vmatprep.subr.bf16.mxu1 %v6769_v11  ;;  %v6793_v14 = vld [vmem:[#allocation16 + $0xec] ss:$16 sps:$4 sm:$0xff]   ;;  %v6797_v11 = vld [vmem:[#allocation16 + $0xe0] ss:$16 sps:$4 sm:$0xff]  }
 0x227   : > { %1620 = vmatpush1.bf16.msra.mxu0 %v6773_v29  ;;  %1661 = vmatpush1.bf16.msra.mxu1 %v6775_v19  ;;  %v6799_v29 = vld [vmem:[#allocation16 + $0xe8] ss:$16 sps:$4 sm:$0xff]   ;;  %v829_v19 = vld [vmem:[#allocation4] sm:$0xff] }
 0x228   : > { %1621 = vmatprep.subr.bf16.mxu0 %v6779_v20  ;;  %1662 = vmatprep.subr.bf16.mxu1 %v6781_v33  ;;  %v831_v20 = vpack.c.bf16 %v829_v19, %v829_v19 }
 0x22b   : > { %1622 = vmatpush1.bf16.msra.mxu0 %v6785_v18  ;;  %1663 = vmatpush1.bf16.msra.mxu1 %v6787_v12 }
 0x22c   : > { %1623 = vmatprep.subr.bf16.mxu0 %v6791_v22  ;;  %1664 = vmatprep.subr.bf16.mxu1 %v6793_v14 }
 0x22f   : > { %1624 = vmatpush1.bf16.msra.mxu0 %v6797_v11  ;;  %1665 = vmatpush1.bf16.msra.mxu1 %v6799_v29 }
 0x230   : > { %1952 = vmatprep.subr.bf16.mxu0 %v6459_v34  ;;  %1993 = vmatprep.subr.bf16.mxu1 %v6461_v35  ;;  %v7649_v34 = vld [vmem:[#allocation25_spill] sm:$0xff]  ;;  %v7650_v35 = vld [vmem:[#allocation26_spill] sm:$0xff] }
 0x232   : > { %1642 = vmatmul.mubr.bf16.vlgmr.msra.gmra.mrb[16].mxu0 %v831_v20  ;;  %1683 = vmatmul.mubr.bf16.vlgmr.msra.gmra.mrb[16].mxu1 %v831_v20  ;;  %v6880_v20 = vld [vmem:[%s7679_s8] sm:$0xf]  ;;  %s6011_s8 = scalar_lea.vmem %s6010_s15, 1024 }
 0x233   : > { %1953 = vmatpush1.bf16.msra.mxu0 %v6464_v37  ;;  %1994 = vmatpush1.bf16.msra.mxu1 %v6466_v38  ;;  %v7651_v37 = vld [vmem:[#allocation27_spill] sm:$0xff]  ;;  %v7652_v38 = vld [vmem:[#allocation28_spill] sm:$0xff]  ;;  %p6013_p9 = scmp.lt.s32.totalorder %s6011_s8, %s6005_s12 }
 0x234   : > { %1954 = vmatprep.subr.bf16.mxu0 %v6468_v39  ;;  %1995 = vmatprep.subr.bf16.mxu1 %v6472_v40  ;;  %v7653_v39 = vld [vmem:[#allocation29_spill] sm:$0xff]  ;;  %v7654_v40 = vld [vmem:[#allocation30_spill] sm:$0xff] }
 0x235   : > { %1984 = vmatprep.mubr.bf16.mxu0 %v7641_v21  ;;  %2025 = vmatprep.mubr.bf16.mxu1 %v7641_v21  ;;  %p6014_p8 = por %p6013_p9, %p6012_p4 }
 0x237   : > { %1955 = vmatpush1.bf16.msra.mxu0 %v6474_v41  ;;  %1996 = vmatpush1.bf16.msra.mxu1 %v6478_v42  ;;  %v7655_v41 = vld [vmem:[#allocation31_spill] sm:$0xff]  ;;  %v7656_v42 = vld [vmem:[#allocation32_spill] sm:$0xff]  ;;  %p6015_p3 = pnand %p6014_p8, %p6008_p2 }
 0x238   : > { %1956 = vmatprep.subr.bf16.mxu0 %v6480_v43  ;;  %1997 = vmatprep.subr.bf16.mxu1 %v6484_v44  ;;  %v7657_v43 = vld [vmem:[#allocation33_spill] sm:$0xff]  ;;  %v7658_v44 = vld [vmem:[#allocation34_spill] sm:$0xff] }
 0x23b   : > { %1957 = vmatpush1.bf16.msra.mxu0 %v6491_v46  ;;  %1998 = vmatpush1.bf16.msra.mxu1 %v6493_v47  ;;  %v7659_v46 = vld [vmem:[#allocation35_spill] sm:$0xff]  ;;  %v7660_v47 = vld [vmem:[#allocation36_spill] sm:$0xff] }
 0x23c   : > { %1958 = vmatprep.subr.bf16.mxu0 %v6497_v48  ;;  %1999 = vmatprep.subr.bf16.mxu1 %v6499_v49  ;;  %v7661_v48 = vld [vmem:[#allocation37_spill] sm:$0xff]  ;;  %v7662_v49 = vld [vmem:[#allocation38_spill] sm:$0xff] }
 0x23f   : > { %1959 = vmatpush1.bf16.msra.mxu0 %v6503_v50  ;;  %2000 = vmatpush1.bf16.msra.mxu1 %v6505_v51  ;;  %v7663_v50 = vld [vmem:[#allocation39_spill] sm:$0xff]  ;;  %v7664_v51 = vld [vmem:[#allocation40_spill] sm:$0xff] }
 0x240   : > { %1960 = vmatprep.subr.bf16.mxu0 %v6507_v52  ;;  %2001 = vmatprep.subr.bf16.mxu1 %v6511_v53  ;;  %v7665_v52 = vld [vmem:[#allocation41_spill] sm:$0xff]  ;;  %v7666_v53 = vld [vmem:[#allocation42_spill] sm:$0xff] }
 0x243   : > { %1961 = vmatpush1.bf16.msra.mxu0 %v6513_v54  ;;  %2002 = vmatpush1.bf16.msra.mxu1 %v6515_v55  ;;  %v7667_v54 = vld [vmem:[#allocation43_spill] sm:$0xff]  ;;  %v7668_v55 = vld [vmem:[#allocation44_spill] sm:$0xff] }
 0x244   : > { %1962 = vmatprep.subr.bf16.mxu0 %v6519_v56  ;;  %2003 = vmatprep.subr.bf16.mxu1 %v6521_v57  ;;  %v7669_v56 = vld [vmem:[#allocation45_spill] sm:$0xff]  ;;  %v7670_v57 = vld [vmem:[#allocation46_spill] sm:$0xff] }
 0x247   : > { %1963 = vmatpush1.bf16.msra.mxu0 %v6527_v58  ;;  %2004 = vmatpush1.bf16.msra.mxu1 %v6529_v59  ;;  %v7671_v58 = vld [vmem:[#allocation47_spill] sm:$0xff]  ;;  %v7672_v59 = vld [vmem:[#allocation48_spill] sm:$0xff] }
 0x248   : > { %1964 = vmatprep.subr.bf16.mxu0 %v6531_v60  ;;  %2005 = vmatprep.subr.bf16.mxu1 %v6533_v61  ;;  %v7673_v60 = vld [vmem:[#allocation49_spill] sm:$0xff]  ;;  %v7674_v61 = vld [vmem:[#allocation50_spill] sm:$0xff] }
 0x24b   : > { %1965 = vmatpush1.bf16.msra.mxu0 %v6539_v62  ;;  %2006 = vmatpush1.bf16.msra.mxu1 %v6541_v63  ;;  %v7675_v62 = vld [vmem:[#allocation51_spill] sm:$0xff]  ;;  %v7676_v63 = vld [vmem:[#allocation52_spill] sm:$0xff] }
 0x24c   : > { %1966 = vmatprep.subr.bf16.mxu0 %v6543_v0  ;;  %2007 = vmatprep.subr.bf16.mxu1 %v6545_v1  ;;  %v7677_v0 = vld [vmem:[#allocation53_spill] sm:$0xff]  ;;  %v7678_v1 = vld [vmem:[#allocation54_spill] sm:$0xff] }
 0x24f   : > { %1967 = vmatpush1.bf16.msra.mxu0 %v6551_v2  ;;  %2008 = vmatpush1.bf16.msra.mxu1 %v6553_v4 }
 0x250   : > { %2255 = vmatprep.subr.bf16.mxu0 %v6563_v7  ;;  %2296 = vmatprep.subr.bf16.mxu1 %v6565_v8 }
 0x252   : > { %1985 = vmatmul.mubr.bf16.vlgmr.msra.gmra.mrb[20].mxu0 %v6713_v36  ;;  %2026 = vmatmul.mubr.bf16.vlgmr.msra.gmra.mrb[20].mxu1 %v6713_v36 }
 0x253   : > { %2256 = vmatpush1.bf16.msra.mxu0 %v6567_v9  ;;  %2297 = vmatpush1.bf16.msra.mxu1 %v6569_v10 }
 0x254   : > { %2257 = vmatprep.subr.bf16.mxu0 %v7649_v34  ;;  %2298 = vmatprep.subr.bf16.mxu1 %v7650_v35  ;;  %v7680_v34 = vld [vmem:[#allocation55_spill] sm:$0xff] }
 0x255   : > { %2287 = vmatprep.mubr.bf16.mxu0 %v7641_v21  ;;  %2328 = vmatprep.mubr.bf16.mxu1 %v7641_v21  ;;  %v7681_v35 = vsub.s32 0, %v7680_v34 }
 0x257   : > { %2258 = vmatpush1.bf16.msra.mxu0 %v7651_v37  ;;  %2299 = vmatpush1.bf16.msra.mxu1 %v7652_v38  ;;  %v6885_v37 = vrot.slane %v6880_v20, %v7681_v35  ;;  %v7685_v35 = vld [vmem:[#allocation57_spill] sm:$0xff] }
 0x258   : > { %2259 = vmatprep.subr.bf16.mxu0 %v7653_v39  ;;  %2300 = vmatprep.subr.bf16.mxu1 %v7654_v40  ;;  %v7682_v40 = vsub.s32 1, %v7680_v34 }
 0x25b   : > { %2260 = vmatpush1.bf16.msra.mxu0 %v7655_v41  ;;  %2301 = vmatpush1.bf16.msra.mxu1 %v7656_v42  ;;  %v6890_v41 = vrot.slane %v6880_v20, %v7682_v40 }
 0x25c   : > { %2261 = vmatprep.subr.bf16.mxu0 %v7657_v43  ;;  %2302 = vmatprep.subr.bf16.mxu1 %v7658_v44 }
 0x25f   : > { %2262 = vmatpush1.bf16.msra.mxu0 %v7659_v46  ;;  %2303 = vmatpush1.bf16.msra.mxu1 %v7660_v47 }
 0x260   : > { %2263 = vmatprep.subr.bf16.mxu0 %v7661_v48  ;;  %2304 = vmatprep.subr.bf16.mxu1 %v7662_v49 }
 0x263   : > { %2264 = vmatpush1.bf16.msra.mxu0 %v7663_v50  ;;  %2305 = vmatpush1.bf16.msra.mxu1 %v7664_v51 }
 0x264   : > { %2265 = vmatprep.subr.bf16.mxu0 %v7665_v52  ;;  %2306 = vmatprep.subr.bf16.mxu1 %v7666_v53 }
 0x267   : > { %2266 = vmatpush1.bf16.msra.mxu0 %v7667_v54  ;;  %2307 = vmatpush1.bf16.msra.mxu1 %v7668_v55 }
 0x268   : > { %2267 = vmatprep.subr.bf16.mxu0 %v7669_v56  ;;  %2308 = vmatprep.subr.bf16.mxu1 %v7670_v57  ;;  %v7683_v57 = vsub.s32 2, %v7680_v34 }
 0x26b   : > { %2268 = vmatpush1.bf16.msra.mxu0 %v7671_v58  ;;  %2309 = vmatpush1.bf16.msra.mxu1 %v7672_v59  ;;  %v6899_v58 = vrot.slane %v6880_v20, %v7683_v57 }
 0x26c   : > { %2269 = vmatprep.subr.bf16.mxu0 %v7673_v60  ;;  %2310 = vmatprep.subr.bf16.mxu1 %v7674_v61 }
 0x26f   : > { %2270 = vmatpush1.bf16.msra.mxu0 %v7675_v62  ;;  %2311 = vmatpush1.bf16.msra.mxu1 %v7676_v63 }
 0x270   : > { %2497 = vmatprep.subr.bf16.mxu0 %v7677_v0  ;;  %2538 = vmatprep.subr.bf16.mxu1 %v7678_v1  ;;  %v830_v1 = vld [vmem:[#allocation5] sm:$0xff] }
 0x2e5   : > { %v1401_v2 = vpop.f32.mrb[12].mxu0  ;;  %v1442_v4 = vpop.f32.mrb[12].mxu1 }
 0x2e6   : > { %v1403_v7 = vpop.f32.mrb[13].mxu0  ;;  %v1444_v8 = vpop.f32.mrb[13].mxu1 }
 0x2e7   : > { %v1405_v9 = vpop.f32.mrb[14].mxu0  ;;  %v1446_v10 = vpop.f32.mrb[14].mxu1 }
 0x2e8   : > { %v1406_v36 = vpop.f32.mrb[15].mxu0  ;;  %v1447_v19 = vpop.f32.mrb[15].mxu1 }
 0x2e9   : > { %v7684_v36 = vld [vmem:[#allocation56_spill] sm:$0xff] }
 0x305   : > { %v1643_v38 = vpop.f32.mrb[16].mxu0  ;;  %v1684_v39 = vpop.f32.mrb[16].mxu1 }
 0x306   : > { %v1644_v42 = vadd.f32 %v1643_v38, %v1401_v2  ;;  %v1685_v43 = vadd.f32 %v1684_v39, %v1442_v4  ;;  %v1645_v44 = vpop.f32.mrb[17].mxu0  ;;  %v1686_v46 = vpop.f32.mrb[17].mxu1 }
 0x307   : > { %v1646_v47 = vadd.f32 %v1645_v44, %v1403_v7  ;;  %v6892_v48 = vadd.f32 %v1686_v46, %v1444_v8  ;;  %v1647_v49 = vpop.f32.mrb[18].mxu0  ;;  %v1688_v50 = vpop.f32.mrb[18].mxu1  ;;  %v7687_v46 = vld [vmem:[#allocation59_spill] sm:$0xff] }
 0x308   : > { %v1691_v51 = vadd.f32 %v1644_v42, %v6885_v37  ;;  %v1648_v52 = vpop.f32.mrb[19].mxu0  ;;  %v1689_v53 = vpop.f32.mrb[19].mxu1  ;;  %v1693_v59 = vadd.f32 %v1685_v43, %v6899_v58  ;;  %v7686_v43 = vld [vmem:[#allocation58_spill] sm:$0xff] }
 0x309   : > { %v1692_v54 = vadd.f32 %v1646_v47, %v6890_v41 }
 0x30a   : > { %v4869_v55 = vmul.f32 -1.442695, %v1691_v51 }
 0x30b   : > { %v4870_v56 = vmul.f32 -1.442695, %v1692_v54 }
 0x30c   : > { %5707 = vpow2.f32 %v4869_v55 }
 0x30d   : > { %5709 = vpow2.f32 %v4870_v56 }
 0x30e   : > { %5711 = vtanh.f32 %v1693_v59 }
 0x316   : > { %v5708_v60 = vpop.eup %5707 }
 0x317   : > { %v5710_v61 = vpop.eup %5709  ;;  %v1698_v62 = vadd.f32 1.0, %v5708_v60 }
 0x318   : > { %v1704_v63 = vadd.f32 1.0, %v5710_v61  ;;  %v5712_v0 = vpop.eup %5711 }
 0x319   : > { %5713 = vrcp.f32 %v1698_v62 }
 0x31a   : > { %5715 = vrcp.f32 %v1704_v63 }
 0x323   : > { %v5714_v2 = vpop.eup %5713 }
 0x324   : > { %v5716_v4 = vpop.eup %5715  ;;  %v1715_v7 = vmul.f32 %v5714_v2, %v5712_v0 }
 0x325   : > { %v1714_v8 = vmul.f32 %v5716_v4, %v830_v1  ;;  %v1986_v9 = vpop.f32.mrb[20].mxu0  ;;  %v2027_v10 = vpop.f32.mrb[20].mxu1 }
 0x326   : > { %v2034_v19 = vadd.f32 %v1986_v9, %v7684_v36  ;;  %v2036_v38 = vadd.f32 %v2027_v10, %v7685_v35  ;;  %v1988_v39 = vpop.f32.mrb[21].mxu0  ;;  %v2029_v40 = vpop.f32.mrb[21].mxu1 }
 0x327   : > { %v6904_v42 = vadd.f32 %v1715_v7, %v1714_v8  ;;  %v2035_v44 = vadd.f32 %v1988_v39, %v7686_v43  ;;  %v2037_v47 = vadd.f32 %v2029_v40, %v7687_v46  ;;  %v1990_v49 = vpop.f32.mrb[22].mxu0  ;;  %v2031_v50 = vpop.f32.mrb[22].mxu1  ;;  %v7688_v8 = vsub.s32 3, %v7680_v34  ;;  %v6996_v34 = vld [vmem:[#allocation13 + $0x64] ss:$16 sps:$4 sm:$0xff]  }
 0x328   : > { %v4904_v51 = vmul.f32 -1.442695, %v2034_v19  ;;  %v1991_v52 = vpop.f32.mrb[23].mxu0  ;;  %v2032_v53 = vpop.f32.mrb[23].mxu1  ;;  %v7002_v40 = vld [vmem:[#allocation13 + $0x60] ss:$16 sps:$4 sm:$0xff]  }
 0x329   : > { %v4905_v54 = vmul.f32 -1.442695, %v2035_v44  ;;  %v4906_v55 = vmul.f32 -1.442695, %v2037_v47  ;;  %v6915_v9 = vrot.slane %v6880_v20, %v7688_v8  ;;  %v6992_v20 = vld [vmem:[#allocation13 + $0x48] ss:$16 sps:$4 sm:$0xff]  }
 0x32a   : > { %5717 = vpow2.f32 %v4904_v51  ;;  %v7004_v43 = vld [vmem:[#allocation13 + $0x68] ss:$16 sps:$4 sm:$0xff]   ;;  %v7008_v44 = vld [vmem:[#allocation13 + $0x84] ss:$16 sps:$4 sm:$0xff]   ;;  %v7010_v46 = vld [vmem:[#allocation13 + $0x8c] ss:$16 sps:$4 sm:$0xff]  }
 0x32b   : > { %5719 = vpow2.f32 %v4905_v54  ;;  %v1694_v10 = vadd.f32 %v6892_v48, %v6915_v9  ;;  %v6998_v48 = vld [vmem:[#allocation13 + $0x6c] ss:$16 sps:$4 sm:$0xff]   ;;  %v7014_v47 = vld [vmem:[#allocation13 + $0x80] ss:$16 sps:$4 sm:$0xff]   ;;  %v7016_v49 = vld [vmem:[#allocation13 + $0x88] ss:$16 sps:$4 sm:$0xff]  }
 0x32c   : > { %5721 = vpow2.f32 %v4906_v55  ;;  %v7020_v50 = vld [vmem:[#allocation13 + $0xa4] ss:$16 sps:$4 sm:$0xff]   ;;  %v7022_v51 = vld [vmem:[#allocation13 + $0xac] ss:$16 sps:$4 sm:$0xff]   ;;  %v7026_v52 = vld [vmem:[#allocation13 + $0xa0] ss:$16 sps:$4 sm:$0xff]  }
 0x32d   : > { %5723 = vtanh.f32 %v2036_v38  ;;  %v4871_v19 = vmul.f32 -1.442695, %v1694_v10  ;;  %v7028_v53 = vld [vmem:[#allocation13 + $0xa8] ss:$16 sps:$4 sm:$0xff]   ;;  %v7032_v54 = vld [vmem:[#allocation13 + $0xc4] ss:$16 sps:$4 sm:$0xff]  }
 0x32e   : > { %v7034_v55 = vld [vmem:[#allocation13 + $0xcc] ss:$16 sps:$4 sm:$0xff]   ;;  %v7078_v10 = vld [vmem:[#allocation14 + $0x20] ss:$16 sps:$4 sm:$0xff]  }
 0x32f   : > { %v7076_v8 = vld [vmem:[#allocation14 + $0x2c] ss:$16 sps:$4 sm:$0xff]   ;;  %7700 = vst [vmem:[#allocation29_spill] sm:$0xff] %v7078_v10 }
 0x330   : > { %7699 = vst [vmem:[#allocation28_spill] sm:$0xff] %v7076_v8 }
 0x334   : > { %v5718_v56 = vpop.eup %5717 }
 0x335   : > { %v5720_v57 = vpop.eup %5719  ;;  %v2041_v59 = vadd.f32 1.0, %v5718_v56  ;;  %v7038_v56 = vld [vmem:[#allocation13 + $0xc0] ss:$16 sps:$4 sm:$0xff]  }
 0x336   : > { %v2047_v60 = vadd.f32 1.0, %v5720_v57  ;;  %v5722_v61 = vpop.eup %5721  ;;  %v7040_v57 = vld [vmem:[#allocation13 + $0xc8] ss:$16 sps:$4 sm:$0xff]  }
 0x337   : > { %5725 = vrcp.f32 %v2041_v59  ;;  %v5724_v62 = vpop.eup %5723  ;;  %v2054_v2 = vadd.f32 1.0, %v5722_v61  ;;  %v7044_v59 = vld [vmem:[#allocation13 + $0xe4] ss:$16 sps:$4 sm:$0xff]   ;;  %v7050_v61 = vld [vmem:[#allocation13 + $0xe0] ss:$16 sps:$4 sm:$0xff]  }
 0x338   : > { %5727 = vrcp.f32 %v2047_v60  ;;  %v7046_v60 = vld [vmem:[#allocation13 + $0xec] ss:$16 sps:$4 sm:$0xff]  }
 0x339   : > { %5729 = vrcp.f32 %v2054_v2  ;;  %v7068_v2 = vld [vmem:[#allocation14 + $0x8] ss:$16 sps:$4 sm:$0xff]  }
 0x33a   : > { %7697 = vst [vmem:[#allocation26_spill] sm:$0xff] %v7068_v2 }
 0x341   : > { %v5726_v63 = vpop.eup %5725 }
 0x342   : > { %v5728_v0 = vpop.eup %5727  ;;  %v2058_v1 = vmul.f32 %v5726_v63, %v5724_v62  ;;  %v7052_v62 = vld [vmem:[#allocation13 + $0xe8] ss:$16 sps:$4 sm:$0xff]   ;;  %v7062_v63 = vld [vmem:[#allocation14 + $0x4] ss:$16 sps:$4 sm:$0xff]  }
 0x343   : > { %v2057_v4 = vmul.f32 %v5728_v0, %v6706_v31  ;;  %v5730_v36 = vpop.eup %5729  ;;  %v7064_v0 = vld [vmem:[#allocation14 + $0xc] ss:$16 sps:$4 sm:$0xff]  }
 0x345   : > { %v6909_v7 = vadd.f32 %v2058_v1, %v2057_v4  ;;  %v7066_v1 = vld [vmem:[#allocation14] ss:$16 sps:$4 sm:$0xff]   ;;  %v7074_v4 = vld [vmem:[#allocation14 + $0x24] ss:$16 sps:$4 sm:$0xff]  }
 0x346   : > { %7698 = vst [vmem:[#allocation27_spill] sm:$0xff] %v7074_v4 }
 0x347   : > { %5731 = vtanh.f32 %v6909_v7 }
 0x348   : > { %5733 = vpow2.f32 %v4871_v19  ;;  %v7086_v19 = vld [vmem:[#allocation14 + $0x44] ss:$16 sps:$4 sm:$0xff]  }
 0x349   : > { %5735 = vtanh.f32 %v6904_v42  ;;  %7702 = vst [vmem:[#allocation31_spill] sm:$0xff] %v7086_v19 }
 0x351   : > { %v5732_v35 = vpop.eup %5731 }
 0x352   : > { %v2061_v38 = vmul.f32 %v5732_v35, %v5730_v36  ;;  %v5734_v31 = vpop.eup %5733  ;;  %v7080_v36 = vld [vmem:[#allocation14 + $0x28] ss:$16 sps:$4 sm:$0xff]   ;;  %v7088_v35 = vld [vmem:[#allocation14 + $0x4c] ss:$16 sps:$4 sm:$0xff]  }
 0x353   : > { %7701 = vst [vmem:[#allocation30_spill] sm:$0xff] %v7080_v36  ;;  %7703 = vst [vmem:[#allocation32_spill] sm:$0xff] %v7088_v35 }
 0x354   : > { %v6919_v39 = vpack.c.bf16 %v2061_v38, %v2061_v38  ;;  %v7090_v38 = vld [vmem:[#allocation14 + $0x40] ss:$16 sps:$4 sm:$0xff]  }
 0x355   : > { %7704 = vst [vmem:[#allocation33_spill] sm:$0xff] %v7090_v38 }
 0x356   : > { %2288 = vmatmul.mubr.bf16.vlgmr.msra.gmra.mrb[24].mxu0 %v6919_v39  ;;  %2329 = vmatmul.mubr.bf16.vlgmr.msra.gmra.mrb[24].mxu1 %v6919_v39 }
 0x357   : > { %2498 = vmatpush1.bf16.msra.mxu0 %v6709_v45  ;;  %2539 = vmatpush1.bf16.msra.mxu1 %v6711_v6  ;;  %v1711_v45 = vadd.f32 1.0, %v5734_v31  ;;  %v7689_v6 = vld [vmem:[#allocation68_spill] sm:$0xff]  ;;  %v7098_v31 = vld [vmem:[#allocation14 + $0x64] ss:$16 sps:$4 sm:$0xff]  }
 0x358   : > { %2499 = vmatprep.subr.bf16.mxu0 %v6715_v32  ;;  %2540 = vmatprep.subr.bf16.mxu1 %v6717_v17  ;;  %v7690_v32 = vld [vmem:[#allocation69_spill] sm:$0xff]  ;;  %v7691_v17 = vld [vmem:[#allocation70_spill] sm:$0xff]  ;;  %7706 = vst [vmem:[#allocation35_spill] sm:$0xff] %v7098_v31 }
 0x359   : > { %2529 = vmatprep.mubr.bf16.mxu0 %v7641_v21  ;;  %2570 = vmatprep.mubr.bf16.mxu1 %v7641_v21  ;;  %5737 = vrcp.f32 %v1711_v45  ;;  %v7100_v45 = vld [vmem:[#allocation14 + $0x6c] ss:$16 sps:$4 sm:$0xff]  }
 0x35a   : > { %7707 = vst [vmem:[#allocation36_spill] sm:$0xff] %v7100_v45 }
 0x35b   : > { %2500 = vmatpush1.bf16.msra.mxu0 %v6723_v16  ;;  %2541 = vmatpush1.bf16.msra.mxu1 %v6725_v5  ;;  %v7692_v16 = vld [vmem:[#allocation71_spill] sm:$0xff]  ;;  %v7693_v5 = vld [vmem:[#allocation72_spill] sm:$0xff] }
 0x35c   : > { %2501 = vmatprep.subr.bf16.mxu0 %v6729_v24  ;;  %2542 = vmatprep.subr.bf16.mxu1 %v6731_v23  ;;  %v7694_v24 = vld [vmem:[#allocation73_spill] sm:$0xff]  ;;  %v7695_v23 = vld [vmem:[#allocation74_spill] sm:$0xff] }
 0x35f   : > { %2502 = vmatpush1.bf16.msra.mxu0 %v6737_v30  ;;  %2543 = vmatpush1.bf16.msra.mxu1 %v6739_v3  ;;  %v5736_v30 = vpop.eup %5735 }
 0x360   : > { %2503 = vmatprep.subr.bf16.mxu0 %v6743_v25  ;;  %2544 = vmatprep.subr.bf16.mxu1 %v6745_v26  ;;  %v6956_v26 = vld [vmem:[#allocation13 + $0x4] ss:$16 sps:$4 sm:$0xff]  }
 0x363   : > { %2504 = vmatpush1.bf16.msra.mxu0 %v6749_v27  ;;  %2545 = vmatpush1.bf16.msra.mxu1 %v6751_v28  ;;  %v5738_v3 = vpop.eup %5737  ;;  %v6958_v27 = vld [vmem:[#allocation13 + $0xc] ss:$16 sps:$4 sm:$0xff]   ;;  %v6962_v28 = vld [vmem:[#allocation13] ss:$16 sps:$4 sm:$0xff]  }
 0x364   : > { %2505 = vmatprep.subr.bf16.mxu0 %v6755_v15  ;;  %2546 = vmatprep.subr.bf16.mxu1 %v6757_v13  ;;  %v6954_v25 = vmul.f32 %v5738_v3, %v5736_v30  ;;  %v6964_v15 = vld [vmem:[#allocation13 + $0x8] ss:$16 sps:$4 sm:$0xff]   ;;  %v6970_v13 = vld [vmem:[#allocation13 + $0x24] ss:$16 sps:$4 sm:$0xff]   ;;  %v7122_v30 = vld [vmem:[#allocation14 + $0xac] ss:$16 sps:$4 sm:$0xff]  }
 0x365   : > { %7715 = vst [vmem:[#allocation44_spill] sm:$0xff] %v7122_v30  ;;  %v7126_v3 = vld [vmem:[#allocation14 + $0xa0] ss:$16 sps:$4 sm:$0xff]  }
 0x366   : > { %7696 = vst [vmem:[#allocation25_spill] sm:$0xff] %v6954_v25  ;;  %7716 = vst [vmem:[#allocation45_spill] sm:$0xff] %v7126_v3 }
 0x367   : > { %2506 = vmatpush1.bf16.msra.mxu0 %v7689_v6  ;;  %2547 = vmatpush1.bf16.msra.mxu1 %v7690_v32  ;;  %v7102_v6 = vld [vmem:[#allocation14 + $0x60] ss:$16 sps:$4 sm:$0xff]   ;;  %v7104_v32 = vld [vmem:[#allocation14 + $0x68] ss:$16 sps:$4 sm:$0xff]  }
 0x368   : > { %2507 = vmatprep.subr.bf16.mxu0 %v7691_v17  ;;  %2548 = vmatprep.subr.bf16.mxu1 %v7692_v16  ;;  %7708 = vst [vmem:[#allocation37_spill] sm:$0xff] %v7102_v6  ;;  %7709 = vst [vmem:[#allocation38_spill] sm:$0xff] %v7104_v32  ;;  %v7110_v17 = vld [vmem:[#allocation14 + $0x84] ss:$16 sps:$4 sm:$0xff]   ;;  %v7112_v16 = vld [vmem:[#allocation14 + $0x8c] ss:$16 sps:$4 sm:$0xff]  }
 0x369   : > { %7710 = vst [vmem:[#allocation39_spill] sm:$0xff] %v7110_v17  ;;  %7711 = vst [vmem:[#allocation40_spill] sm:$0xff] %v7112_v16 }
 0x36b   : > { %2508 = vmatpush1.bf16.msra.mxu0 %v7693_v5  ;;  %2549 = vmatpush1.bf16.msra.mxu1 %v7694_v24  ;;  %v7114_v5 = vld [vmem:[#allocation14 + $0x80] ss:$16 sps:$4 sm:$0xff]   ;;  %v7116_v24 = vld [vmem:[#allocation14 + $0x88] ss:$16 sps:$4 sm:$0xff]  }
 0x36c   : > { %2509 = vmatprep.subr.bf16.mxu0 %v7695_v23  ;;  %2550 = vmatprep.subr.bf16.mxu1 %v6781_v33  ;;  %v6990_v33 = vld [vmem:[#allocation13 + $0x40] ss:$16 sps:$4 sm:$0xff]   ;;  %7712 = vst [vmem:[#allocation41_spill] sm:$0xff] %v7114_v5  ;;  %7713 = vst [vmem:[#allocation42_spill] sm:$0xff] %v7116_v24  ;;  %v7120_v23 = vld [vmem:[#allocation14 + $0xa4] ss:$16 sps:$4 sm:$0xff]  }
 0x36d   : > { %7714 = vst [vmem:[#allocation43_spill] sm:$0xff] %v7120_v23 }
 0x36f   : > { %2510 = vmatpush1.bf16.msra.mxu0 %v6785_v18  ;;  %2551 = vmatpush1.bf16.msra.mxu1 %v6787_v12  ;;  %v1720_v18 = vpack.c.bf16 %v6954_v25, %v6954_v25  ;;  %v6972_v12 = vld [vmem:[#allocation13 + $0x2c] ss:$16 sps:$4 sm:$0xff]   ;;  %v7132_v25 = vld [vmem:[#allocation14 + $0xc4] ss:$16 sps:$4 sm:$0xff]  }
 0x370   : > { %2511 = vmatprep.subr.bf16.mxu0 %v6791_v22  ;;  %2552 = vmatprep.subr.bf16.mxu1 %v6793_v14  ;;  %v6976_v22 = vld [vmem:[#allocation13 + $0x20] ss:$16 sps:$4 sm:$0xff]   ;;  %v6978_v14 = vld [vmem:[#allocation13 + $0x28] ss:$16 sps:$4 sm:$0xff]   ;;  %7718 = vst [vmem:[#allocation47_spill] sm:$0xff] %v7132_v25 }
 0x373   : > { %2512 = vmatpush1.bf16.msra.mxu0 %v6797_v11  ;;  %2553 = vmatpush1.bf16.msra.mxu1 %v6799_v29  ;;  %v6982_v11 = vld [vmem:[#allocation13 + $0x44] ss:$16 sps:$4 sm:$0xff]   ;;  %v6984_v29 = vld [vmem:[#allocation13 + $0x4c] ss:$16 sps:$4 sm:$0xff]  }
 0x374   : > { %2841 = vmatprep.subr.bf16.mxu0 %v6956_v26  ;;  %2882 = vmatprep.subr.bf16.mxu1 %v6958_v27 }
 0x376   : > { %2530 = vmatmul.mubr.bf16.vlgmr.msra.gmra.mrb[28].mxu0 %v1720_v18  ;;  %2571 = vmatmul.mubr.bf16.vlgmr.msra.gmra.mrb[28].mxu1 %v1720_v18  ;;  %v7128_v18 = vld [vmem:[#allocation14 + $0xa8] ss:$16 sps:$4 sm:$0xff]  }
 0x377   : > { %2842 = vmatpush1.bf16.msra.mxu0 %v6962_v28  ;;  %2883 = vmatpush1.bf16.msra.mxu1 %v6964_v15  ;;  %7717 = vst [vmem:[#allocation46_spill] sm:$0xff] %v7128_v18 }
 0x378   : > { %2843 = vmatprep.subr.bf16.mxu0 %v6970_v13  ;;  %2884 = vmatprep.subr.bf16.mxu1 %v6972_v12 }
 0x379   : > { %2873 = vmatprep.mubr.bf16.mxu0 %v7641_v21  ;;  %2914 = vmatprep.mubr.bf16.mxu1 %v7641_v21 }
 0x37b   : > { %2844 = vmatpush1.bf16.msra.mxu0 %v6976_v22  ;;  %2885 = vmatpush1.bf16.msra.mxu1 %v6978_v14 }
 0x37c   : > { %2845 = vmatprep.subr.bf16.mxu0 %v6982_v11  ;;  %2886 = vmatprep.subr.bf16.mxu1 %v6984_v29 }
 0x37f   : > { %2846 = vmatpush1.bf16.msra.mxu0 %v6990_v33  ;;  %2887 = vmatpush1.bf16.msra.mxu1 %v6992_v20 }
 0x380   : > { %2847 = vmatprep.subr.bf16.mxu0 %v6996_v34  ;;  %2888 = vmatprep.subr.bf16.mxu1 %v6998_v48 }
 0x383   : > { %2848 = vmatpush1.bf16.msra.mxu0 %v7002_v40  ;;  %2889 = vmatpush1.bf16.msra.mxu1 %v7004_v43 }
 0x384   : > { %2849 = vmatprep.subr.bf16.mxu0 %v7008_v44  ;;  %2890 = vmatprep.subr.bf16.mxu1 %v7010_v46 }
 0x387   : > { %2850 = vmatpush1.bf16.msra.mxu0 %v7014_v47  ;;  %2891 = vmatpush1.bf16.msra.mxu1 %v7016_v49 }
 0x388   : > { %2851 = vmatprep.subr.bf16.mxu0 %v7020_v50  ;;  %2892 = vmatprep.subr.bf16.mxu1 %v7022_v51 }
 0x38b   : > { %2852 = vmatpush1.bf16.msra.mxu0 %v7026_v52  ;;  %2893 = vmatpush1.bf16.msra.mxu1 %v7028_v53 }
 0x38c   : > { %2853 = vmatprep.subr.bf16.mxu0 %v7032_v54  ;;  %2894 = vmatprep.subr.bf16.mxu1 %v7034_v55 }
 0x38f   : > { %2854 = vmatpush1.bf16.msra.mxu0 %v7038_v56  ;;  %2895 = vmatpush1.bf16.msra.mxu1 %v7040_v57 }
 0x390   : > { %2855 = vmatprep.subr.bf16.mxu0 %v7044_v59  ;;  %2896 = vmatprep.subr.bf16.mxu1 %v7046_v60 }
 0x393   : > { %2856 = vmatpush1.bf16.msra.mxu0 %v7050_v61  ;;  %2897 = vmatpush1.bf16.msra.mxu1 %v7052_v62 }
 0x394   : > { %3144 = vmatprep.subr.bf16.mxu0 %v7062_v63  ;;  %3185 = vmatprep.subr.bf16.mxu1 %v7064_v0 }
 0x396   : > { %2874 = vmatmul.mubr.bf16.vlgmr.msra.gmra.mrb[32].mxu0 %v6919_v39  ;;  %2915 = vmatmul.mubr.bf16.vlgmr.msra.gmra.mrb[32].mxu1 %v6919_v39  ;;  %v7092_v39 = vld [vmem:[#allocation14 + $0x48] ss:$16 sps:$4 sm:$0xff]  }
 0x397   : > { %3176 = vmatprep.mubr.bf16.mxu0 %v7641_v21  ;;  %3217 = vmatprep.mubr.bf16.mxu1 %v7641_v21  ;;  %7705 = vst [vmem:[#allocation34_spill] sm:$0xff] %v7092_v39 }
 0x398   : > { %3145 = vmatpush1.bf16.msra.mxu0 %v7066_v1  ;;  %3186 = vmatpush1.bf16.msra.mxu1 %v7068_v2 }
 0x399   : > { %3146 = vmatprep.subr.bf16.mxu0 %v7074_v4  ;;  %3187 = vmatprep.subr.bf16.mxu1 %v7076_v8 }
 0x39c   : > { %3147 = vmatpush1.bf16.msra.mxu0 %v7078_v10  ;;  %3188 = vmatpush1.bf16.msra.mxu1 %v7080_v36 }
 0x39d   : > { %3148 = vmatprep.subr.bf16.mxu0 %v7086_v19  ;;  %3189 = vmatprep.subr.bf16.mxu1 %v7088_v35 }
 0x3a0   : > { %3149 = vmatpush1.bf16.msra.mxu0 %v7090_v38  ;;  %3190 = vmatpush1.bf16.msra.mxu1 %v7092_v39 }
 0x3a1   : > { %3150 = vmatprep.subr.bf16.mxu0 %v7098_v31  ;;  %3191 = vmatprep.subr.bf16.mxu1 %v7100_v45 }
 0x3a4   : > { %3151 = vmatpush1.bf16.msra.mxu0 %v7102_v6  ;;  %3192 = vmatpush1.bf16.msra.mxu1 %v7104_v32 }
 0x3a5   : > { %3152 = vmatprep.subr.bf16.mxu0 %v7110_v17  ;;  %3193 = vmatprep.subr.bf16.mxu1 %v7112_v16  ;;  %v7134_v17 = vld [vmem:[#allocation14 + $0xcc] ss:$16 sps:$4 sm:$0xff]   ;;  %v7138_v16 = vld [vmem:[#allocation14 + $0xc0] ss:$16 sps:$4 sm:$0xff]  }
 0x3a6   : > { %7719 = vst [vmem:[#allocation48_spill] sm:$0xff] %v7134_v17  ;;  %7720 = vst [vmem:[#allocation49_spill] sm:$0xff] %v7138_v16 }
 0x3a8   : > { %3153 = vmatpush1.bf16.msra.mxu0 %v7114_v5  ;;  %3194 = vmatpush1.bf16.msra.mxu1 %v7116_v24  ;;  %v7140_v5 = vld [vmem:[#allocation14 + $0xc8] ss:$16 sps:$4 sm:$0xff]   ;;  %v7144_v24 = vld [vmem:[#allocation14 + $0xe4] ss:$16 sps:$4 sm:$0xff]  }
 0x3a9   : > { %3154 = vmatprep.subr.bf16.mxu0 %v7120_v23  ;;  %3195 = vmatprep.subr.bf16.mxu1 %v7122_v30  ;;  %7721 = vst [vmem:[#allocation50_spill] sm:$0xff] %v7140_v5  ;;  %7722 = vst [vmem:[#allocation51_spill] sm:$0xff] %v7144_v24  ;;  %v7146_v23 = vld [vmem:[#allocation14 + $0xec] ss:$16 sps:$4 sm:$0xff]   ;;  %v7150_v30 = vld [vmem:[#allocation14 + $0xe0] ss:$16 sps:$4 sm:$0xff]  }
 0x3aa   : > { %7723 = vst [vmem:[#allocation52_spill] sm:$0xff] %v7146_v23  ;;  %7724 = vst [vmem:[#allocation53_spill] sm:$0xff] %v7150_v30 }
 0x3ac   : > { %3155 = vmatpush1.bf16.msra.mxu0 %v7126_v3  ;;  %3196 = vmatpush1.bf16.msra.mxu1 %v7128_v18  ;;  %v7152_v3 = vld [vmem:[#allocation14 + $0xe8] ss:$16 sps:$4 sm:$0xff]   ;;  %v7156_v18 = vld [vmem:[#allocation16 + $0x4] ss:$16 sps:$4 sm:$0xff]  }
 0x3ad   : > { %3156 = vmatprep.subr.bf16.mxu0 %v7132_v25  ;;  %3197 = vmatprep.subr.bf16.mxu1 %v7134_v17  ;;  %7725 = vst [vmem:[#allocation54_spill] sm:$0xff] %v7152_v3  ;;  %7726 = vst [vmem:[#allocation55_spill] sm:$0xff] %v7156_v18  ;;  %v7158_v25 = vld [vmem:[#allocation16 + $0xc] ss:$16 sps:$4 sm:$0xff]  }
 0x3ae   : > { %7727 = vst [vmem:[#allocation56_spill] sm:$0xff] %v7158_v25 }
 0x3b0   : > { %3157 = vmatpush1.bf16.msra.mxu0 %v7138_v16  ;;  %3198 = vmatpush1.bf16.msra.mxu1 %v7140_v5 }
 0x3b1   : > { %3158 = vmatprep.subr.bf16.mxu0 %v7144_v24  ;;  %3199 = vmatprep.subr.bf16.mxu1 %v7146_v23 }
 0x3b4   : > { %3159 = vmatpush1.bf16.msra.mxu0 %v7150_v30  ;;  %3200 = vmatpush1.bf16.msra.mxu1 %v7152_v3 }
 0x3b5   : > { %3386 = vmatprep.subr.bf16.mxu0 %v7156_v18  ;;  %3427 = vmatprep.subr.bf16.mxu1 %v7158_v25 }
 0x429   : > { %v2289_v5 = vpop.f32.mrb[24].mxu0  ;;  %v2330_v16 = vpop.f32.mrb[24].mxu1 }
 0x42a   : > { %v2291_v17 = vpop.f32.mrb[25].mxu0  ;;  %v2332_v32 = vpop.f32.mrb[25].mxu1 }
 0x42b   : > { %v2293_v6 = vpop.f32.mrb[26].mxu0  ;;  %v2334_v24 = vpop.f32.mrb[26].mxu1 }
 0x42c   : > { %v2294_v45 = vpop.f32.mrb[27].mxu0  ;;  %v2335_v23 = vpop.f32.mrb[27].mxu1 }
 0x449   : > { %v2531_v31 = vpop.f32.mrb[28].mxu0  ;;  %v2572_v39 = vpop.f32.mrb[28].mxu1 }
 0x44a   : > { %v2532_v38 = vadd.f32 %v2531_v31, %v2289_v5  ;;  %v2573_v35 = vadd.f32 %v2572_v39, %v2330_v16  ;;  %v2533_v19 = vpop.f32.mrb[29].mxu0  ;;  %v2574_v30 = vpop.f32.mrb[29].mxu1  ;;  %v7729_v5 = vld [vmem:[#allocation61_spill] sm:$0xff] }
 0x44b   : > { %v2534_v36 = vadd.f32 %v2533_v19, %v2291_v17  ;;  %v2575_v3 = vadd.f32 %v2574_v30, %v2332_v32  ;;  %v2535_v10 = vpop.f32.mrb[30].mxu0  ;;  %v2576_v18 = vpop.f32.mrb[30].mxu1 }
 0x44c   : > { %v2579_v25 = vadd.f32 %v2532_v38, %v6885_v37  ;;  %v2536_v8 = vpop.f32.mrb[31].mxu0  ;;  %v2577_v4 = vpop.f32.mrb[31].mxu1  ;;  %v2581_v45 = vadd.f32 %v2573_v35, %v6899_v58 }
 0x44d   : > { %v2580_v2 = vadd.f32 %v2534_v36, %v6890_v41 }
 0x44e   : > { %v4971_v6 = vmul.f32 -1.442695, %v2579_v25 }
 0x44f   : > { %v4972_v24 = vmul.f32 -1.442695, %v2580_v2  ;;  %v7728_v2 = vld [vmem:[#allocation60_spill] sm:$0xff] }
 0x450   : > { %5739 = vpow2.f32 %v4971_v6  ;;  %v7730_v6 = vld [vmem:[#allocation62_spill] sm:$0xff] }
 0x451   : > { %5741 = vpow2.f32 %v4972_v24 }
 0x452   : > { %5743 = vtanh.f32 %v2581_v45  ;;  %v7731_v45 = vld [vmem:[#allocation63_spill] sm:$0xff] }
 0x45a   : > { %v5740_v31 = vpop.eup %5739 }
 0x45b   : > { %v5742_v39 = vpop.eup %5741  ;;  %v2586_v16 = vadd.f32 1.0, %v5740_v31 }
 0x45c   : > { %v2592_v19 = vadd.f32 1.0, %v5742_v39  ;;  %v5744_v10 = vpop.eup %5743 }
 0x45d   : > { %5745 = vrcp.f32 %v2586_v16 }
 0x45e   : > { %5747 = vrcp.f32 %v2592_v19 }
 0x467   : > { %v5746_v32 = vpop.eup %5745 }
 0x468   : > { %v5748_v38 = vpop.eup %5747  ;;  %v2603_v8 = vmul.f32 %v5746_v32, %v5744_v10 }
 0x469   : > { %v2602_v4 = vmul.f32 %v5748_v38, %v6904_v42  ;;  %v2875_v36 = vpop.f32.mrb[32].mxu0  ;;  %v2916_v25 = vpop.f32.mrb[32].mxu1 }
 0x46a   : > { %v2923_v17 = vadd.f32 %v2875_v36, %v7728_v2  ;;  %v2925_v23 = vadd.f32 %v2916_v25, %v7729_v5  ;;  %v2877_v35 = vpop.f32.mrb[33].mxu0  ;;  %v2918_v30 = vpop.f32.mrb[33].mxu1 }
 0x46b   : > { %v7170_v18 = vadd.f32 %v2603_v8, %v2602_v4  ;;  %v2924_v24 = vadd.f32 %v2877_v35, %v7730_v6  ;;  %v2926_v31 = vadd.f32 %v2918_v30, %v7731_v45  ;;  %v2879_v39 = vpop.f32.mrb[34].mxu0  ;;  %v2920_v16 = vpop.f32.mrb[34].mxu1 }
 0x46c   : > { %v5006_v19 = vmul.f32 -1.442695, %v2923_v17  ;;  %v2880_v10 = vpop.f32.mrb[35].mxu0  ;;  %v2921_v32 = vpop.f32.mrb[35].mxu1 }
 0x46d   : > { %v5007_v42 = vmul.f32 -1.442695, %v2924_v24  ;;  %v5008_v38 = vmul.f32 -1.442695, %v2926_v31  ;;  %v2582_v31 = vadd.f32 %v2575_v3, %v6915_v9  ;;  %v7179_v10 = vld [vmem:[#allocation16] ss:$16 sps:$4 sm:$0xff]  }
 0x46e   : > { %5749 = vpow2.f32 %v5006_v19  ;;  %v7181_v32 = vld [vmem:[#allocation16 + $0x8] ss:$16 sps:$4 sm:$0xff]   ;;  %v7193_v3 = vld [vmem:[#allocation16 + $0x20] ss:$16 sps:$4 sm:$0xff]  }
 0x46f   : > { %5751 = vpow2.f32 %v5007_v42 }
 0x470   : > { %5753 = vpow2.f32 %v5008_v38  ;;  %v7185_v38 = vld [vmem:[#allocation16 + $0x24] ss:$16 sps:$4 sm:$0xff]  }
 0x471   : > { %5755 = vtanh.f32 %v2925_v23  ;;  %v4973_v23 = vmul.f32 -1.442695, %v2582_v31  ;;  %v7227_v31 = vld [vmem:[#allocation16 + $0x8c] ss:$16 sps:$4 sm:$0xff]  }
 0x472   : > { %7736 = vst [vmem:[#allocation69_spill] sm:$0xff] %v7227_v31 }
 0x478   : > { %v5750_v36 = vpop.eup %5749 }
 0x479   : > { %v5752_v2 = vpop.eup %5751  ;;  %v2930_v25 = vadd.f32 1.0, %v5750_v36  ;;  %v7195_v36 = vld [vmem:[#allocation16 + $0x28] ss:$16 sps:$4 sm:$0xff]  }
 0x47a   : > { %v2936_v8 = vadd.f32 1.0, %v5752_v2  ;;  %v5754_v4 = vpop.eup %5753  ;;  %v7199_v2 = vld [vmem:[#allocation16 + $0x44] ss:$16 sps:$4 sm:$0xff]  }
 0x47b   : > { %5757 = vrcp.f32 %v2930_v25  ;;  %v5756_v5 = vpop.eup %5755  ;;  %v2943_v17 = vadd.f32 1.0, %v5754_v4  ;;  %v7201_v25 = vld [vmem:[#allocation16 + $0x4c] ss:$16 sps:$4 sm:$0xff]   ;;  %v7209_v4 = vld [vmem:[#allocation16 + $0x48] ss:$16 sps:$4 sm:$0xff]  }
 0x47c   : > { %5759 = vrcp.f32 %v2936_v8  ;;  %v7207_v8 = vld [vmem:[#allocation16 + $0x40] ss:$16 sps:$4 sm:$0xff]  }
 0x47d   : > { %5761 = vrcp.f32 %v2943_v17  ;;  %v7221_v17 = vld [vmem:[#allocation16 + $0x68] ss:$16 sps:$4 sm:$0xff]  }
 0x47e   : > { %7734 = vst [vmem:[#allocation59_spill] sm:$0xff] %v7221_v17 }
 0x485   : > { %v5758_v35 = vpop.eup %5757 }
 0x486   : > { %v5760_v30 = vpop.eup %5759  ;;  %v2947_v6 = vmul.f32 %v5758_v35, %v5756_v5  ;;  %v7213_v5 = vld [vmem:[#allocation16 + $0x64] ss:$16 sps:$4 sm:$0xff]   ;;  %v7215_v35 = vld [vmem:[#allocation16 + $0x6c] ss:$16 sps:$4 sm:$0xff]  }
 0x487   : > { %v2946_v45 = vmul.f32 %v5760_v30, %v6909_v7  ;;  %v5762_v39 = vpop.eup %5761  ;;  %v7187_v7 = vld [vmem:[#allocation16 + $0x2c] ss:$16 sps:$4 sm:$0xff]   ;;  %7732 = vst [vmem:[#allocation57_spill] sm:$0xff] %v7215_v35 }
 0x489   : > { %v7175_v24 = vadd.f32 %v2947_v6, %v2946_v45  ;;  %v7219_v6 = vld [vmem:[#allocation16 + $0x60] ss:$16 sps:$4 sm:$0xff]   ;;  %v7225_v45 = vld [vmem:[#allocation16 + $0x84] ss:$16 sps:$4 sm:$0xff]  }
 0x48a   : > { %7733 = vst [vmem:[#allocation58_spill] sm:$0xff] %v7219_v6  ;;  %7735 = vst [vmem:[#allocation68_spill] sm:$0xff] %v7225_v45 }
 0x48b   : > { %5763 = vtanh.f32 %v7175_v24 }
 0x48c   : > { %5765 = vpow2.f32 %v4973_v23  ;;  %v7231_v23 = vld [vmem:[#allocation16 + $0x80] ss:$16 sps:$4 sm:$0xff]  }
 0x48d   : > { %7737 = vst [vmem:[#allocation70_spill] sm:$0xff] %v7231_v23  ;;  %5767 = vtanh.f32 %v7170_v18 }
 0x495   : > { %v5764_v16 = vpop.eup %5763 }
 0x496   : > { %v2950_v19 = vmul.f32 %v5764_v16, %v5762_v39  ;;  %v5766_v30 = vpop.eup %5765  ;;  %v7233_v16 = vld [vmem:[#allocation16 + $0x88] ss:$16 sps:$4 sm:$0xff]  }
 0x497   : > { %v2599_v39 = vadd.f32 1.0, %v5766_v30  ;;  %7738 = vst [vmem:[#allocation71_spill] sm:$0xff] %v7233_v16  ;;  %v7244_v30 = vld [vmem:[#allocation16 + $0xa0] ss:$16 sps:$4 sm:$0xff]  }
 0x498   : > { %v7183_v42 = vpack.c.bf16 %v2950_v19, %v2950_v19  ;;  %v7238_v19 = vld [vmem:[#allocation16 + $0xa4] ss:$16 sps:$4 sm:$0xff]   ;;  %7741 = vst [vmem:[#allocation74_spill] sm:$0xff] %v7244_v30 }
 0x499   : > { %7739 = vst [vmem:[#allocation72_spill] sm:$0xff] %v7238_v19  ;;  %5769 = vrcp.f32 %v2599_v39  ;;  %v7256_v39 = vld [vmem:[#allocation16 + $0xc0] ss:$16 sps:$4 sm:$0xff]  }
 0x49a   : > { %3177 = vmatmul.mubr.bf16.vlgmr.msra.gmra.mrb[36].mxu0 %v7183_v42  ;;  %3218 = vmatmul.mubr.bf16.vlgmr.msra.gmra.mrb[36].mxu1 %v7183_v42 }
 0x49b   : > { %3387 = vmatpush1.bf16.msra.mxu0 %v7179_v10  ;;  %3428 = vmatpush1.bf16.msra.mxu1 %v7181_v32 }
 0x49c   : > { %3388 = vmatprep.subr.bf16.mxu0 %v7185_v38  ;;  %3429 = vmatprep.subr.bf16.mxu1 %v7187_v7 }
 0x49d   : > { %3418 = vmatprep.mubr.bf16.mxu0 %v7641_v21  ;;  %3459 = vmatprep.mubr.bf16.mxu1 %v7641_v21 }
 0x49f   : > { %3389 = vmatpush1.bf16.msra.mxu0 %v7193_v3  ;;  %3430 = vmatpush1.bf16.msra.mxu1 %v7195_v36 }
 0x4a0   : > { %3390 = vmatprep.subr.bf16.mxu0 %v7199_v2  ;;  %3431 = vmatprep.subr.bf16.mxu1 %v7201_v25 }
 0x4a3   : > { %3391 = vmatpush1.bf16.msra.mxu0 %v7207_v8  ;;  %3432 = vmatpush1.bf16.msra.mxu1 %v7209_v4 }
 0x4a4   : > { %3392 = vmatprep.subr.bf16.mxu0 %v7213_v5  ;;  %3433 = vmatprep.subr.bf16.mxu1 %v7215_v35  ;;  %v7240_v35 = vld [vmem:[#allocation16 + $0xac] ss:$16 sps:$4 sm:$0xff]  }
 0x4a5   : > { %7740 = vst [vmem:[#allocation73_spill] sm:$0xff] %v7240_v35 }
 0x4a7   : > { %3393 = vmatpush1.bf16.msra.mxu0 %v7219_v6  ;;  %3434 = vmatpush1.bf16.msra.mxu1 %v7221_v17  ;;  %v7246_v17 = vld [vmem:[#allocation16 + $0xa8] ss:$16 sps:$4 sm:$0xff]  }
 0x4a8   : > { %3394 = vmatprep.subr.bf16.mxu0 %v7225_v45  ;;  %3435 = vmatprep.subr.bf16.mxu1 %v7227_v31  ;;  %7742 = vst [vmem:[#allocation60_spill] sm:$0xff] %v7246_v17  ;;  %v7250_v45 = vld [vmem:[#allocation16 + $0xc4] ss:$16 sps:$4 sm:$0xff]   ;;  %v7252_v31 = vld [vmem:[#allocation16 + $0xcc] ss:$16 sps:$4 sm:$0xff]  }
 0x4a9   : > { %7743 = vst [vmem:[#allocation61_spill] sm:$0xff] %v7250_v45  ;;  %7744 = vst [vmem:[#allocation62_spill] sm:$0xff] %v7252_v31 }
 0x4ab   : > { %3395 = vmatpush1.bf16.msra.mxu0 %v7231_v23  ;;  %3436 = vmatpush1.bf16.msra.mxu1 %v7233_v16  ;;  %v7258_v23 = vld [vmem:[#allocation16 + $0xc8] ss:$16 sps:$4 sm:$0xff]   ;;  %v7262_v16 = vld [vmem:[#allocation16 + $0xe4] ss:$16 sps:$4 sm:$0xff]  }
 0x4ac   : > { %3396 = vmatprep.subr.bf16.mxu0 %v7238_v19  ;;  %3437 = vmatprep.subr.bf16.mxu1 %v7240_v35  ;;  %v7264_v19 = vld [vmem:[#allocation16 + $0xec] ss:$16 sps:$4 sm:$0xff]   ;;  %v5768_v35 = vpop.eup %5767 }
 0x4ad   : > { %v5770_v6 = vpop.eup %5769 }
 0x4af   : > { %3397 = vmatpush1.bf16.msra.mxu0 %v7244_v30  ;;  %3438 = vmatpush1.bf16.msra.mxu1 %v7246_v17  ;;  %v7268_v30 = vld [vmem:[#allocation16 + $0xe0] ss:$16 sps:$4 sm:$0xff]   ;;  %v7270_v17 = vld [vmem:[#allocation16 + $0xe8] ss:$16 sps:$4 sm:$0xff]  }
 0x4b0   : > { %3398 = vmatprep.subr.bf16.mxu0 %v7250_v45  ;;  %3439 = vmatprep.subr.bf16.mxu1 %v7252_v31  ;;  %v7274_v45 = vmul.f32 %v5770_v6, %v5768_v35 }
 0x4b2   : > { %v2609_v31 = vpack.c.bf16 %v7274_v45, %v7274_v45 }
 0x4b3   : > { %3399 = vmatpush1.bf16.msra.mxu0 %v7256_v39  ;;  %3440 = vmatpush1.bf16.msra.mxu1 %v7258_v23 }
 0x4b4   : > { %3400 = vmatprep.subr.bf16.mxu0 %v7262_v16  ;;  %3441 = vmatprep.subr.bf16.mxu1 %v7264_v19 }
 0x4b7   : > { %3401 = vmatpush1.bf16.msra.mxu0 %v7268_v30  ;;  %3442 = vmatpush1.bf16.msra.mxu1 %v7270_v17 }
 0x4b8   : > { %3730 = vmatprep.subr.bf16.mxu0 %v6956_v26  ;;  %3771 = vmatprep.subr.bf16.mxu1 %v6958_v27  ;;  %v7745_v26 = vld [vmem:[#allocation26_spill] sm:$0xff]  ;;  %v7746_v27 = vld [vmem:[#allocation27_spill] sm:$0xff] }
 0x4ba   : > { %3419 = vmatmul.mubr.bf16.vlgmr.msra.gmra.mrb[40].mxu0 %v2609_v31  ;;  %3460 = vmatmul.mubr.bf16.vlgmr.msra.gmra.mrb[40].mxu1 %v2609_v31 }
 0x4bb   : > { %3731 = vmatpush1.bf16.msra.mxu0 %v6962_v28  ;;  %3772 = vmatpush1.bf16.msra.mxu1 %v6964_v15  ;;  %v7747_v28 = vld [vmem:[#allocation28_spill] sm:$0xff]  ;;  %v7748_v15 = vld [vmem:[#allocation29_spill] sm:$0xff] }
 0x4bc   : > { %3732 = vmatprep.subr.bf16.mxu0 %v6970_v13  ;;  %3773 = vmatprep.subr.bf16.mxu1 %v6972_v12  ;;  %v7749_v13 = vld [vmem:[#allocation30_spill] sm:$0xff]  ;;  %v7750_v12 = vld [vmem:[#allocation31_spill] sm:$0xff] }
 0x4bd   : > { %3762 = vmatprep.mubr.bf16.mxu0 %v7641_v21  ;;  %3803 = vmatprep.mubr.bf16.mxu1 %v7641_v21 }
 0x4bf   : > { %3733 = vmatpush1.bf16.msra.mxu0 %v6976_v22  ;;  %3774 = vmatpush1.bf16.msra.mxu1 %v6978_v14  ;;  %v7751_v22 = vld [vmem:[#allocation32_spill] sm:$0xff]  ;;  %v7752_v14 = vld [vmem:[#allocation33_spill] sm:$0xff] }
 0x4c0   : > { %3734 = vmatprep.subr.bf16.mxu0 %v6982_v11  ;;  %3775 = vmatprep.subr.bf16.mxu1 %v6984_v29  ;;  %v7753_v11 = vld [vmem:[#allocation34_spill] sm:$0xff]  ;;  %v7754_v29 = vld [vmem:[#allocation35_spill] sm:$0xff] }
 0x4c3   : > { %3735 = vmatpush1.bf16.msra.mxu0 %v6990_v33  ;;  %3776 = vmatpush1.bf16.msra.mxu1 %v6992_v20  ;;  %v7755_v33 = vld [vmem:[#allocation36_spill] sm:$0xff]  ;;  %v7756_v20 = vld [vmem:[#allocation37_spill] sm:$0xff] }
 0x4c4   : > { %3736 = vmatprep.subr.bf16.mxu0 %v6996_v34  ;;  %3777 = vmatprep.subr.bf16.mxu1 %v6998_v48  ;;  %v7757_v34 = vld [vmem:[#allocation38_spill] sm:$0xff]  ;;  %v7758_v48 = vld [vmem:[#allocation39_spill] sm:$0xff] }
 0x4c7   : > { %3737 = vmatpush1.bf16.msra.mxu0 %v7002_v40  ;;  %3778 = vmatpush1.bf16.msra.mxu1 %v7004_v43  ;;  %v7759_v40 = vld [vmem:[#allocation40_spill] sm:$0xff]  ;;  %v7760_v43 = vld [vmem:[#allocation41_spill] sm:$0xff] }
 0x4c8   : > { %3738 = vmatprep.subr.bf16.mxu0 %v7008_v44  ;;  %3779 = vmatprep.subr.bf16.mxu1 %v7010_v46  ;;  %v7761_v44 = vld [vmem:[#allocation42_spill] sm:$0xff]  ;;  %v7762_v46 = vld [vmem:[#allocation43_spill] sm:$0xff] }
 0x4cb   : > { %3739 = vmatpush1.bf16.msra.mxu0 %v7014_v47  ;;  %3780 = vmatpush1.bf16.msra.mxu1 %v7016_v49  ;;  %v7763_v47 = vld [vmem:[#allocation44_spill] sm:$0xff]  ;;  %v7764_v49 = vld [vmem:[#allocation45_spill] sm:$0xff] }
 0x4cc   : > { %3740 = vmatprep.subr.bf16.mxu0 %v7020_v50  ;;  %3781 = vmatprep.subr.bf16.mxu1 %v7022_v51  ;;  %v7765_v50 = vld [vmem:[#allocation46_spill] sm:$0xff]  ;;  %v7766_v51 = vld [vmem:[#allocation47_spill] sm:$0xff] }
 0x4cf   : > { %3741 = vmatpush1.bf16.msra.mxu0 %v7026_v52  ;;  %3782 = vmatpush1.bf16.msra.mxu1 %v7028_v53  ;;  %v7767_v52 = vld [vmem:[#allocation48_spill] sm:$0xff]  ;;  %v7768_v53 = vld [vmem:[#allocation49_spill] sm:$0xff] }
 0x4d0   : > { %3742 = vmatprep.subr.bf16.mxu0 %v7032_v54  ;;  %3783 = vmatprep.subr.bf16.mxu1 %v7034_v55  ;;  %v7769_v54 = vld [vmem:[#allocation50_spill] sm:$0xff]  ;;  %v7770_v55 = vld [vmem:[#allocation51_spill] sm:$0xff] }
 0x4d3   : > { %3743 = vmatpush1.bf16.msra.mxu0 %v7038_v56  ;;  %3784 = vmatpush1.bf16.msra.mxu1 %v7040_v57  ;;  %v7771_v56 = vld [vmem:[#allocation52_spill] sm:$0xff]  ;;  %v7772_v57 = vld [vmem:[#allocation53_spill] sm:$0xff] }
 0x4d4   : > { %3744 = vmatprep.subr.bf16.mxu0 %v7044_v59  ;;  %3785 = vmatprep.subr.bf16.mxu1 %v7046_v60  ;;  %v7773_v59 = vld [vmem:[#allocation54_spill] sm:$0xff]  ;;  %v7774_v60 = vld [vmem:[#allocation55_spill] sm:$0xff] }
 0x4d7   : > { %3745 = vmatpush1.bf16.msra.mxu0 %v7050_v61  ;;  %3786 = vmatpush1.bf16.msra.mxu1 %v7052_v62  ;;  %v7775_v61 = vld [vmem:[#allocation56_spill] sm:$0xff] }
 0x4d8   : > { %4033 = vmatprep.subr.bf16.mxu0 %v7062_v63  ;;  %4074 = vmatprep.subr.bf16.mxu1 %v7064_v0 }
 0x4da   : > { %3763 = vmatmul.mubr.bf16.vlgmr.msra.gmra.mrb[44].mxu0 %v7183_v42  ;;  %3804 = vmatmul.mubr.bf16.vlgmr.msra.gmra.mrb[44].mxu1 %v7183_v42 }
 0x4db   : > { %4034 = vmatpush1.bf16.msra.mxu0 %v7066_v1  ;;  %4075 = vmatpush1.bf16.msra.mxu1 %v7745_v26 }
 0x4dc   : > { %4035 = vmatprep.subr.bf16.mxu0 %v7746_v27  ;;  %4076 = vmatprep.subr.bf16.mxu1 %v7747_v28 }
 0x4dd   : > { %4065 = vmatprep.mubr.bf16.mxu0 %v7641_v21  ;;  %4106 = vmatprep.mubr.bf16.mxu1 %v7641_v21 }
 0x4df   : > { %4036 = vmatpush1.bf16.msra.mxu0 %v7748_v15  ;;  %4077 = vmatpush1.bf16.msra.mxu1 %v7749_v13 }
 0x4e0   : > { %4037 = vmatprep.subr.bf16.mxu0 %v7750_v12  ;;  %4078 = vmatprep.subr.bf16.mxu1 %v7751_v22 }
 0x4e3   : > { %4038 = vmatpush1.bf16.msra.mxu0 %v7752_v14  ;;  %4079 = vmatpush1.bf16.msra.mxu1 %v7753_v11 }
 0x4e4   : > { %4039 = vmatprep.subr.bf16.mxu0 %v7754_v29  ;;  %4080 = vmatprep.subr.bf16.mxu1 %v7755_v33 }
 0x4e7   : > { %4040 = vmatpush1.bf16.msra.mxu0 %v7756_v20  ;;  %4081 = vmatpush1.bf16.msra.mxu1 %v7757_v34 }
 0x4e8   : > { %4041 = vmatprep.subr.bf16.mxu0 %v7758_v48  ;;  %4082 = vmatprep.subr.bf16.mxu1 %v7759_v40 }
 0x4eb   : > { %4042 = vmatpush1.bf16.msra.mxu0 %v7760_v43  ;;  %4083 = vmatpush1.bf16.msra.mxu1 %v7761_v44 }
 0x4ec   : > { %4043 = vmatprep.subr.bf16.mxu0 %v7762_v46  ;;  %4084 = vmatprep.subr.bf16.mxu1 %v7763_v47 }
 0x4ef   : > { %4044 = vmatpush1.bf16.msra.mxu0 %v7764_v49  ;;  %4085 = vmatpush1.bf16.msra.mxu1 %v7765_v50 }
 0x4f0   : > { %4045 = vmatprep.subr.bf16.mxu0 %v7766_v51  ;;  %4086 = vmatprep.subr.bf16.mxu1 %v7767_v52 }
 0x4f3   : > { %4046 = vmatpush1.bf16.msra.mxu0 %v7768_v53  ;;  %4087 = vmatpush1.bf16.msra.mxu1 %v7769_v54 }
 0x4f4   : > { %4047 = vmatprep.subr.bf16.mxu0 %v7770_v55  ;;  %4088 = vmatprep.subr.bf16.mxu1 %v7771_v56 }
 0x4f7   : > { %4048 = vmatpush1.bf16.msra.mxu0 %v7772_v57  ;;  %4089 = vmatpush1.bf16.msra.mxu1 %v7773_v59  ;;  %v7776_v59 = vld [vmem:[#allocation64_spill] sm:$0xff] }
 0x4f8   : > { %4275 = vmatprep.subr.bf16.mxu0 %v7774_v60  ;;  %4316 = vmatprep.subr.bf16.mxu1 %v7775_v61  ;;  %v7777_v61 = vld [vmem:[#allocation65_spill] sm:$0xff] }
 0x56d   : > { %v3178_v62 = vpop.f32.mrb[36].mxu0  ;;  %v3219_v63 = vpop.f32.mrb[36].mxu1 }
 0x56e   : > { %v3180_v0 = vpop.f32.mrb[37].mxu0  ;;  %v3221_v1 = vpop.f32.mrb[37].mxu1 }
 0x56f   : > { %v3182_v42 = vpop.f32.mrb[38].mxu0  ;;  %v3223_v35 = vpop.f32.mrb[38].mxu1 }
 0x570   : > { %v3183_v6 = vpop.f32.mrb[39].mxu0  ;;  %v3224_v31 = vpop.f32.mrb[39].mxu1  ;;  %v7778_v42 = vld [vmem:[#allocation66_spill] sm:$0xff] }
 0x571   : > { %v7779_v6 = vld [vmem:[#allocation67_spill] sm:$0xff] }
 0x58d   : > { %v3420_v26 = vpop.f32.mrb[40].mxu0  ;;  %v3461_v27 = vpop.f32.mrb[40].mxu1 }
 0x58e   : > { %v3421_v28 = vadd.f32 %v3420_v26, %v3178_v62  ;;  %v3462_v15 = vadd.f32 %v3461_v27, %v3219_v63  ;;  %v3422_v13 = vpop.f32.mrb[41].mxu0  ;;  %v3463_v12 = vpop.f32.mrb[41].mxu1 }
 0x58f   : > { %v3423_v22 = vadd.f32 %v3422_v13, %v3180_v0  ;;  %v3464_v14 = vadd.f32 %v3463_v12, %v3221_v1  ;;  %v3424_v11 = vpop.f32.mrb[42].mxu0  ;;  %v3465_v29 = vpop.f32.mrb[42].mxu1 }
 0x590   : > { %v3468_v33 = vadd.f32 %v3421_v28, %v6885_v37  ;;  %v3425_v20 = vpop.f32.mrb[43].mxu0  ;;  %v3466_v34 = vpop.f32.mrb[43].mxu1  ;;  %v3470_v44 = vadd.f32 %v3462_v15, %v6899_v58 }
 0x591   : > { %v3469_v48 = vadd.f32 %v3423_v22, %v6890_v41 }
 0x592   : > { %v5073_v40 = vmul.f32 -1.442695, %v3468_v33 }
 0x593   : > { %v5074_v43 = vmul.f32 -1.442695, %v3469_v48 }
 0x594   : > { %5771 = vpow2.f32 %v5073_v40 }
 0x595   : > { %5773 = vpow2.f32 %v5074_v43 }
 0x596   : > { %5775 = vtanh.f32 %v3470_v44 }
 0x59e   : > { %v5772_v46 = vpop.eup %5771 }
 0x59f   : > { %v5774_v47 = vpop.eup %5773  ;;  %v3475_v49 = vadd.f32 1.0, %v5772_v46 }
 0x5a0   : > { %v3481_v50 = vadd.f32 1.0, %v5774_v47  ;;  %v5776_v51 = vpop.eup %5775 }
 0x5a1   : > { %5777 = vrcp.f32 %v3475_v49  ;;  %v3471_v49 = vadd.f32 %v3464_v14, %v6915_v9  ;;  %v7791_v14 = vld [vmem:[#allocation61_spill] sm:$0xff] }
 0x5a2   : > { %5779 = vrcp.f32 %v3481_v50 }
 0x5ab   : > { %v5778_v52 = vpop.eup %5777 }
 0x5ac   : > { %v5780_v53 = vpop.eup %5779  ;;  %v3492_v54 = vmul.f32 %v5778_v52, %v5776_v51  ;;  %v5075_v51 = vmul.f32 -1.442695, %v3471_v49 }
 0x5ad   : > { %v3491_v55 = vmul.f32 %v5780_v53, %v7170_v18  ;;  %v3764_v56 = vpop.f32.mrb[44].mxu0  ;;  %v3805_v57 = vpop.f32.mrb[44].mxu1 }
 0x5ae   : > { %v3812_v60 = vadd.f32 %v3764_v56, %v7776_v59  ;;  %v3814_v62 = vadd.f32 %v3805_v57, %v7777_v61  ;;  %v3766_v63 = vpop.f32.mrb[45].mxu0  ;;  %v3807_v0 = vpop.f32.mrb[45].mxu1  ;;  %v7793_v61 = vld [vmem:[#allocation25_spill] sm:$0xff] }
 0x5af   : > { %v7358_v1 = vadd.f32 %v3492_v54, %v3491_v55  ;;  %v3813_v35 = vadd.f32 %v3766_v63, %v7778_v42  ;;  %v3815_v31 = vadd.f32 %v3807_v0, %v7779_v6  ;;  %v3768_v26 = vpop.f32.mrb[46].mxu0  ;;  %v3809_v27 = vpop.f32.mrb[46].mxu1  ;;  %v7792_v55 = vld [vmem:[#allocation62_spill] sm:$0xff]  ;;  %v5690_v63 = vld [vmem:[#allocation17 + $0x38] sm:$0xff]  }
 0x5b0   : > { %v5108_v28 = vmul.f32 -1.442695, %v3812_v60  ;;  %v3769_v15 = vpop.f32.mrb[47].mxu0  ;;  %v3810_v13 = vpop.f32.mrb[47].mxu1 }
 0x5b1   : > { %v5109_v18 = vmul.f32 -1.442695, %v3813_v35  ;;  %v5110_v12 = vmul.f32 -1.442695, %v3815_v31 }
 0x5b2   : > { %5781 = vpow2.f32 %v5108_v28 }
 0x5b3   : > { %5783 = vpow2.f32 %v5109_v18 }
 0x5b4   : > { %5785 = vpow2.f32 %v5110_v12 }
 0x5b5   : > { %5787 = vtanh.f32 %v3814_v62  ;;  %v4395_v62 = vpack.c.bf16 %v7274_v45, %v7793_v61  ;;  %v5689_v45 = vld [vmem:[#allocation17 + $0x30] sm:$0xff]  }
 0x5bc   : > { %v5782_v22 = vpop.eup %5781 }
 0x5bd   : > { %v5784_v11 = vpop.eup %5783  ;;  %v3819_v29 = vadd.f32 1.0, %v5782_v22 }
 0x5be   : > { %v3825_v33 = vadd.f32 1.0, %v5784_v11  ;;  %v5786_v20 = vpop.eup %5785 }
 0x5bf   : > { %5789 = vrcp.f32 %v3819_v29  ;;  %v5788_v34 = vpop.eup %5787  ;;  %v3832_v44 = vadd.f32 1.0, %v5786_v20 }
 0x5c0   : > { %5791 = vrcp.f32 %v3825_v33 }
 0x5c1   : > { %5793 = vrcp.f32 %v3832_v44 }
 0x5c9   : > { %v5790_v48 = vpop.eup %5789 }
 0x5ca   : > { %v5792_v40 = vpop.eup %5791  ;;  %v3836_v43 = vmul.f32 %v5790_v48, %v5788_v34 }
 0x5cb   : > { %v3835_v46 = vmul.f32 %v5792_v40, %v7175_v24  ;;  %v5794_v50 = vpop.eup %5793 }
 0x5cd   : > { %v3837_v47 = vadd.f32 %v3836_v43, %v3835_v46 }
 0x5cf   : > { %5795 = vtanh.f32 %v3837_v47  ;;  %4388 = vst [vmem:[#allocation3] sm:$0xff] %v3837_v47 }
 0x5d0   : > { %5797 = vpow2.f32 %v5075_v51 }
 0x5d1   : > { %5799 = vtanh.f32 %v7358_v1 }
 0x5d9   : > { %v5796_v52 = vpop.eup %5795 }
 0x5da   : > { %v3839_v53 = vmul.f32 %v5796_v52, %v5794_v50  ;;  %v5798_v24 = vpop.eup %5797 }
 0x5db   : > { %v5800_v56 = vpop.eup %5799 }
 0x5dc   : > { %v3840_v54 = vpack.c.bf16 %v3839_v53, %v3839_v53  ;;  %4387 = vst [vmem:[#allocation2] sm:$0xff] %v3839_v53 }
 0x5de   : > { %4066 = vmatmul.mubr.bf16.vlgmr.msra.gmra.mrb[48].mxu0 %v3840_v54  ;;  %4107 = vmatmul.mubr.bf16.vlgmr.msra.gmra.mrb[48].mxu1 %v3840_v54 }
 0x5df   : > { %4276 = vmatpush1.bf16.msra.mxu0 %v7179_v10  ;;  %4317 = vmatpush1.bf16.msra.mxu1 %v7181_v32  ;;  %v7780_v10 = vld [vmem:[#allocation57_spill] sm:$0xff]  ;;  %v3488_v32 = vadd.f32 1.0, %v5798_v24 }
 0x5e0   : > { %4277 = vmatprep.subr.bf16.mxu0 %v7185_v38  ;;  %4318 = vmatprep.subr.bf16.mxu1 %v7187_v7  ;;  %v7781_v38 = vld [vmem:[#allocation58_spill] sm:$0xff]  ;;  %v7783_v7 = vld [vmem:[#allocation68_spill] sm:$0xff] }
 0x5e1   : > { %4307 = vmatprep.mubr.bf16.mxu0 %v7641_v21  ;;  %4348 = vmatprep.mubr.bf16.mxu1 %v7641_v21  ;;  %v7782_v21 = vld [vmem:[#allocation59_spill] sm:$0xff]  ;;  %5801 = vrcp.f32 %v3488_v32 }
 0x5e3   : > { %4278 = vmatpush1.bf16.msra.mxu0 %v7193_v3  ;;  %4319 = vmatpush1.bf16.msra.mxu1 %v7195_v36  ;;  %v7784_v3 = vld [vmem:[#allocation69_spill] sm:$0xff]  ;;  %v7785_v36 = vld [vmem:[#allocation70_spill] sm:$0xff] }
 0x5e4   : > { %4279 = vmatprep.subr.bf16.mxu0 %v7199_v2  ;;  %4320 = vmatprep.subr.bf16.mxu1 %v7201_v25  ;;  %v7786_v2 = vld [vmem:[#allocation71_spill] sm:$0xff]  ;;  %v7787_v25 = vld [vmem:[#allocation72_spill] sm:$0xff] }
 0x5e7   : > { %4280 = vmatpush1.bf16.msra.mxu0 %v7207_v8  ;;  %4321 = vmatpush1.bf16.msra.mxu1 %v7209_v4  ;;  %v7788_v8 = vld [vmem:[#allocation73_spill] sm:$0xff]  ;;  %v7789_v4 = vld [vmem:[#allocation74_spill] sm:$0xff] }
 0x5e8   : > { %4281 = vmatprep.subr.bf16.mxu0 %v7213_v5  ;;  %4322 = vmatprep.subr.bf16.mxu1 %v7780_v10  ;;  %v7790_v5 = vld [vmem:[#allocation60_spill] sm:$0xff] }
 0x5eb   : > { %4282 = vmatpush1.bf16.msra.mxu0 %v7781_v38  ;;  %4323 = vmatpush1.bf16.msra.mxu1 %v7782_v21  ;;  %v5802_v57 = vpop.eup %5801 }
 0x5ec   : > { %4283 = vmatprep.subr.bf16.mxu0 %v7783_v7  ;;  %4324 = vmatprep.subr.bf16.mxu1 %v7784_v3  ;;  %v7395_v59 = vmul.f32 %v5802_v57, %v5800_v56 }
 0x5ee   : > { %v3498_v60 = vpack.c.bf16 %v7395_v59, %v7395_v59 }
 0x5ef   : > { %4284 = vmatpush1.bf16.msra.mxu0 %v7785_v36  ;;  %4325 = vmatpush1.bf16.msra.mxu1 %v7786_v2 }
 0x5f0   : > { %4285 = vmatprep.subr.bf16.mxu0 %v7787_v25  ;;  %4326 = vmatprep.subr.bf16.mxu1 %v7788_v8  ;;  %v5178_v25 = vld [vmem:[%s7794_s9] ss:$0 sm:$0xff] }
 0x5f3   : > { %4286 = vmatpush1.bf16.msra.mxu0 %v7789_v4  ;;  %4327 = vmatpush1.bf16.msra.mxu1 %v7790_v5 }
 0x5f4   : > { %4287 = vmatprep.subr.bf16.mxu0 %v7791_v14  ;;  %4328 = vmatprep.subr.bf16.mxu1 %v7792_v55 }
 0x5f7   : > { %4288 = vmatpush1.bf16.msra.mxu0 %v7256_v39  ;;  %4329 = vmatpush1.bf16.msra.mxu1 %v7258_v23  ;;  %v5683_v23 = vld [vmem:[#allocation17] sm:$0xff]   ;;  %v5688_v39 = vld [vmem:[#allocation17 + $0x28] sm:$0xff]  }
 0x5f8   : > { %4289 = vmatprep.subr.bf16.mxu0 %v7262_v16  ;;  %4330 = vmatprep.subr.bf16.mxu1 %v7264_v19  ;;  %v5684_v16 = vld [vmem:[#allocation17 + $0x8] sm:$0xff]   ;;  %v5685_v19 = vld [vmem:[#allocation17 + $0x10] sm:$0xff]  }
 0x5fb   : > { %4290 = vmatpush1.bf16.msra.mxu0 %v7268_v30  ;;  %4331 = vmatpush1.bf16.msra.mxu1 %v7270_v17  ;;  %v5686_v30 = vld [vmem:[#allocation17 + $0x18] sm:$0xff]   ;;  %v5687_v17 = vld [vmem:[#allocation17 + $0x20] sm:$0xff]  }
 0x5fc   : > { %5204 = vmatprep.subr.bf16.mxu0 %v5683_v23 }
 0x5fe   : > { %4308 = vmatmul.mubr.bf16.vlgmr.msra.gmra.mrb[52].mxu0 %v3498_v60  ;;  %4349 = vmatmul.mubr.bf16.vlgmr.msra.gmra.mrb[52].mxu1 %v3498_v60 }
 0x5ff   : > { %5220 = vmatprep.mubr.bf16.mxu0 %v4395_v62  ;;  %5205 = vmatpush3.bf16.msra.mxu0 %v5683_v23 }
 0x600   : > { %5206 = vmatprep.subr.bf16.mxu0 %v5684_v16 }
 0x603   : > { %5207 = vmatpush3.bf16.msra.mxu0 %v5684_v16 }
 0x604   : > { %5208 = vmatprep.subr.bf16.mxu0 %v5685_v19 }
 0x607   : > { %5209 = vmatpush3.bf16.msra.mxu0 %v5685_v19 }
 0x608   : > { %5210 = vmatprep.subr.bf16.mxu0 %v5686_v30 }
 0x60b   : > { %5211 = vmatpush3.bf16.msra.mxu0 %v5686_v30 }
 0x60c   : > { %5212 = vmatprep.subr.bf16.mxu0 %v5687_v17 }
 0x60f   : > { %5213 = vmatpush3.bf16.msra.mxu0 %v5687_v17 }
 0x610   : > { %5214 = vmatprep.subr.bf16.mxu0 %v5688_v39 }
 0x613   : > { %5215 = vmatpush3.bf16.msra.mxu0 %v5688_v39 }
 0x614   : > { %5216 = vmatprep.subr.bf16.mxu0 %v5689_v45 }
 0x617   : > { %5217 = vmatpush3.bf16.msra.mxu0 %v5689_v45 }
 0x618   : > { %5218 = vmatprep.subr.bf16.mxu0 %v5690_v63 }
 0x61b   : > { %5219 = vmatpush3.bf16.msra.mxu0 %v5690_v63 }
 0x6b1   : > { %v4067_v0 = vpop.f32.mrb[48].mxu0  ;;  %v4108_v42 = vpop.f32.mrb[48].mxu1 }
 0x6b2   : > { %v4069_v35 = vpop.f32.mrb[49].mxu0  ;;  %v4110_v6 = vpop.f32.mrb[49].mxu1 }
 0x6b3   : > { %v4071_v31 = vpop.f32.mrb[50].mxu0  ;;  %v4112_v26 = vpop.f32.mrb[50].mxu1 }
 0x6b4   : > { %v4072_v27 = vpop.f32.mrb[51].mxu0  ;;  %v4113_v28 = vpop.f32.mrb[51].mxu1 }
 0x6d1   : > { %v4309_v15 = vpop.f32.mrb[52].mxu0  ;;  %v4350_v13 = vpop.f32.mrb[52].mxu1 }
 0x6d2   : > { %v4310_v18 = vadd.f32 %v4309_v15, %v4067_v0  ;;  %v4351_v12 = vadd.f32 %v4350_v13, %v4108_v42  ;;  %v4311_v22 = vpop.f32.mrb[53].mxu0  ;;  %v4352_v11 = vpop.f32.mrb[53].mxu1 }
 0x6d3   : > { %v4312_v29 = vadd.f32 %v4311_v22, %v4069_v35  ;;  %v4353_v33 = vadd.f32 %v4352_v11, %v4110_v6  ;;  %v4313_v20 = vpop.f32.mrb[54].mxu0  ;;  %v4354_v34 = vpop.f32.mrb[54].mxu1 }
 0x6d4   : > { %v4357_v48 = vadd.f32 %v4310_v18, %v6885_v37  ;;  %v4314_v40 = vpop.f32.mrb[55].mxu0  ;;  %v4355_v43 = vpop.f32.mrb[55].mxu1  ;;  %v4359_v51 = vadd.f32 %v4351_v12, %v6899_v58 }
 0x6d5   : > { %v4358_v44 = vadd.f32 %v4312_v29, %v6890_v41  ;;  %v4360_v49 = vadd.f32 %v4353_v33, %v6915_v9 }
 0x6d6   : > { %v5175_v46 = vmul.f32 -1.442695, %v4357_v48 }
 0x6d7   : > { %v5176_v47 = vmul.f32 -1.442695, %v4358_v44  ;;  %v5177_v50 = vmul.f32 -1.442695, %v4360_v49 }
 0x6d8   : > { %5803 = vpow2.f32 %v5175_v46 }
 0x6d9   : > { %5805 = vpow2.f32 %v5176_v47 }
 0x6da   : > { %5807 = vpow2.f32 %v5177_v50 }
 0x6db   : > { %5809 = vtanh.f32 %v4359_v51 }
 0x6e2   : > { %v5804_v52 = vpop.eup %5803 }
 0x6e3   : > { %v5806_v53 = vpop.eup %5805  ;;  %v4364_v54 = vadd.f32 1.0, %v5804_v52 }
 0x6e4   : > { %v4370_v24 = vadd.f32 1.0, %v5806_v53  ;;  %v5808_v37 = vpop.eup %5807 }
 0x6e5   : > { %5811 = vrcp.f32 %v4364_v54  ;;  %v5810_v10 = vpop.eup %5809  ;;  %v4377_v21 = vadd.f32 1.0, %v5808_v37 }
 0x6e6   : > { %5813 = vrcp.f32 %v4370_v24 }
 0x6e7   : > { %5815 = vrcp.f32 %v4377_v21 }
 0x6ef   : > { %v5812_v41 = vpop.eup %5811 }
 0x6f0   : > { %v5814_v32 = vpop.eup %5813  ;;  %v4381_v38 = vmul.f32 %v5812_v41, %v5810_v10 }
 0x6f1   : > { %v4380_v7 = vmul.f32 %v5814_v32, %v7358_v1  ;;  %v5816_v58 = vpop.eup %5815 }
 0x6f3   : > { %v4382_v9 = vadd.f32 %v4381_v38, %v4380_v7 }
 0x6f5   : > { %4390 = vst [vmem:[#allocation5] sm:$0xff] %v4382_v9  ;;  %5817 = vtanh.f32 %v4382_v9 }
 0x6ff   : > { %v5818_v3 = vpop.eup %5817 }
 0x700   : > { %v4384_v36 = vmul.f32 %v5818_v3, %v5816_v58 }
 0x702   : > { %4389 = vst [vmem:[#allocation4] sm:$0xff] %v4384_v36  ;;  %v4396_v2 = vpack.c.bf16 %v4384_v36, %v7395_v59 }
 0x704   : > { %5221 = vmatmul.mubr.bf16.vlgmr.msra.gmra.mrb[56].mxu0 %v4396_v2 }
 0x7d7   : > { %v5222_v8 = vpop.f32.mrb[56].mxu0 }
 0x7d8   : > { %v4511_v4 = vadd.f32 %v5222_v8, %v5178_v25  ;;  %v4502_v5 = vpop.f32.mrb[57].mxu0 }
 0x7d9   : > { %v4503_v14 = vadd.f32 %v5178_v25, %v4502_v5  ;;  %v5223_v1 = vpop.f32.mrb[58].mxu0 }
 0x7da   : > { %4521 = vmax.xlane.f32.xlu1 %v4511_v4  ;;  %v4505_v55 = vpop.f32.mrb[59].mxu0  ;;  %v4514_v56 = vadd.f32 %v5223_v1, %v5178_v25 }
 0x7db   : > { %4517 = vmax.xlane.f32.xlu0 %v4503_v14  ;;  %v4506_v57 = vadd.f32 %v5178_v25, %v4505_v55 }
 0x7de   : > { %4523 = vmax.xlane.f32.xlu1 %v4514_v56 }
 0x7df   : > { %4519 = vmax.xlane.f32.xlu0 %v4506_v57 }
 0x867   : > { %v4522_v60 = vpop.xlane.xlu1 %4521 }
 0x868   : > { %v4527_v61 = vsub.f32 %v4511_v4, %v4522_v60  ;;  %v4518_v59 = vpop.xlane.xlu0 %4517 }
 0x869   : > { %v4525_v62 = vsub.f32 %v4503_v14, %v4518_v59 }
 0x86a   : > { %v4533_v19 = vmul.f32 1.442695, %v4527_v61 }
 0x86b   : > { %v4529_v23 = vmul.f32 1.442695, %v4525_v62  ;;  %v4524_v16 = vpop.xlane.xlu1 %4523 }
 0x86c   : > { %v4520_v30 = vpop.xlane.xlu0 %4519  ;;  %v4528_v17 = vsub.f32 %v4514_v56, %v4524_v16 }
 0x86d   : > { %5819 = vpow2.f32 %v4529_v23  ;;  %v4526_v39 = vsub.f32 %v4506_v57, %v4520_v30 }
 0x86e   : > { %5821 = vpow2.f32 %v4533_v19  ;;  %v4535_v63 = vmul.f32 1.442695, %v4528_v17 }
 0x86f   : > { %v4531_v45 = vmul.f32 1.442695, %v4526_v39 }
 0x871   : > { %5823 = vpow2.f32 %v4531_v45 }
 0x872   : > { %5825 = vpow2.f32 %v4535_v63 }
 0x877   : > { %v5820_v0 = vpop.eup %5819 }
 0x878   : > { %4537 = vadd.xlane.f32.xlu0 %v5820_v0  ;;  %v5822_v42 = vpop.eup %5821 }
 0x87b   : > { %v5824_v35 = vpop.eup %5823 }
 0x87c   : > { %4541 = vadd.xlane.f32.xlu0 %v5822_v42  ;;  %4539 = vadd.xlane.f32.xlu1 %v5824_v35  ;;  %v5826_v6 = vpop.eup %5825 }
 0x880   : > { %4543 = vadd.xlane.f32.xlu1 %v5826_v6 }
 0x905   : > { %v4538_v31 = vpop.xlane.xlu0 %4537 }
 0x906   : > { %5827 = vlog2.f32 %v4538_v31 }
 0x909   : > { %v4540_v26 = vpop.xlane.xlu1 %4539  ;;  %v4542_v27 = vpop.xlane.xlu0 %4541 }
 0x90a   : > { %5829 = vlog2.f32 %v4540_v26 }
 0x90b   : > { %5831 = vlog2.f32 %v4542_v27 }
 0x90d   : > { %v4544_v28 = vpop.xlane.xlu1 %4543 }
 0x90e   : > { %5833 = vlog2.f32 %v4544_v28 }
 0x910   : > { %v5828_v15 = vpop.eup %5827 }
 0x911   : > { %v4546_v13 = vmul.f32 0.6931472, %v5828_v15 }
 0x913   : > { %v4553_v18 = vsub.f32 %v4525_v62, %v4546_v13 }
 0x914   : > { %v5830_v12 = vpop.eup %5829 }
 0x915   : > { %v5832_v22 = vpop.eup %5831  ;;  %4557 = vst [vmem:[%s6454_s26] sm:$0xff] %v4553_v18  ;;  %v4548_v11 = vmul.f32 0.6931472, %v5830_v12 }
 0x916   : > { %v4550_v29 = vmul.f32 0.6931472, %v5832_v22 }
 0x917   : > { %v4554_v33 = vsub.f32 %v4526_v39, %v4548_v11 }
 0x918   : > { %v5834_v20 = vpop.eup %5833  ;;  %v4555_v34 = vsub.f32 %v4527_v61, %v4550_v29 }
 0x919   : > { %4558 = vst [vmem:[%s6454_s26 + $0x8] sm:$0xff] %v4554_v33  ;;  %v4552_v48 = vmul.f32 0.6931472, %v5834_v20 }
 0x91a   : > { %4559 = vst [vmem:[%s6454_s26 + $0x10] sm:$0xff] %v4555_v34 }
 0x91b   : > { %v4556_v40 = vsub.f32 %v4528_v17, %v4552_v48 }
 0x91d   : > { %4560 = vst [vmem:[%s6454_s26 + $0x18] sm:$0xff] %v4556_v40 }
 0x91e   : > { %6018 = shalt.err (!%p6015_p3)
}
 0x91f   : > { %s6019_s26 = scalar_lea.hbm %s7420_s16, 512  ;;  %s6023_s9 = scalar_lea.hbm %s7795_s17, 1024 }
 0x920   : > { %p6020_p12 = scmp.ne.s32.totalorder %s7420_s16, %s6019_s26  ;;  %p6024_p1 = scmp.lt.u32.totalorder %s7420_s16, %s7795_s17 }
 0x921   : > { %p6025_p7 = scmp.lt.u32.totalorder %s6023_s9, %s6019_s26  ;;  %p6027_p5 = scmp.lt.u32.totalorder %s6019_s26, %s7420_s16 }
 0x922   : > { %p6021_p13 = pnand %p6020_p12, %p7796_p10 }
 0x923   : > { %p6026_p6 = por %p6025_p7, %p6024_p1 }
 0x924   : > { %p6022_p0 = pneg %p6021_p13 }
 0x925   : > { %p6028_p11 = por %p6027_p5, %p6026_p6 }
 0x927   : > { %p6029_p2 = pnand %p6028_p11, %p6022_p0 }
 0x929   : > { %6032 = shalt.err (!%p6029_p2)
}
 0x92a   : > { %s6114_s19 = smov 128   ;;  %s6115_s12 = smov 8  }
 0x92b   : > { %5246 = dma.vmem_to_hbm [thread:$0]  (%p7796_p10), %s7422_s24, 512, %s7420_s16, %s4562_s18, %s6114_s19, %s6114_s19, %s6115_s12  }
 0x92c PF: > { %s4592_s28 = sand.u32 1, %s6079_s30   ;;  %p7797_p4 = scmp.ne.s32.totalorder %s7593_s23, 0 }
 0x92d   : > { %p7798_p9 = scmp.ge.s32.totalorder %s6099_s14, 2  ;;  %s4593_s15 = scalar_lea.sflag [#allocation10], %s4592_s28 }
 0x92f   : > { %p5269_p8 = pnand %p7798_p9, %p7797_p4 }
 0x931   : > { %6074 = dma.done.wait (!%p5269_p8), %s4593_s15, 512  }
 0x932   : > { %6076 = vsyncadd (!%p5269_p8), %s4593_s15, 4294966784  ;;  %s28_s14 = sadd.s32 1, %s6099_s14   ;;  %s7799_s30 = smov %s6083_s10 }
 0x933   : > { %p25_p3 = scmp.ge.s32.totalorder %s28_s14, 4   ;;  %s7800_s10 = smov %s6087_s11 }
 0x934   : > { %s7801_s11 = smov %s6376_s21  ;;  %s7802_s12 = smov %s6095_s13 }
 0x935   : > { %s7803_s13 = smov %s7805_s1  ;;  %27 = sbr.rel (!%p25_p3) target bundleno = 14 (0xe), region = 132 }
 0x93c   :  { %4598 = vsyncpa [#allocation9], 1 }
 0x93d   :  { %4600 = vsyncpa [#allocation9 + $0x1], 1 }
 0x93e   :  { %4601 = vsyncpa [#allocation12], 1 }
 0x93f   :  { %4602 = vsyncpa [#allocation15], 1 }
 0x940   :  { %4603 = vsyncpa [#allocation18], 1 }
 0x941   :  { %4604 = vsyncpa [#allocation10], 1 }
 0x942   :  { %4606 = vsyncpa [#allocation10 + $0x1], 1 }

</bundles_post_ra>
